<compile_context>
chip_gen: v7x
topology: tpu7x:2x2x1
jax: 0.10.0
libtpu: 0.0.40
codegen_flags: <defaults>
</compile_context>

<pallas_src>
import numpy as np
import jax
import jax.numpy as jnp
from jax.experimental import pallas as pl
from jax.experimental.pallas import tpu as pltpu

BN_EPS = 1e-5


# ----------------------------------------------------------------------------------
# in-kernel building blocks (channel-last (L, C) values, C on the 128-lane axis)
# ----------------------------------------------------------------------------------
def _shift_rows(h):
    """Return (h_prev, h_next): rows shifted by +/-1 along axis 0, zero at the boundary.

    Uses pltpu.roll (circular, jnp.roll semantics) on the XLU and masks the wrapped row,
    instead of a zero-pad concatenate + misaligned slices.
    """
    L = h.shape[0]
    row = jax.lax.broadcasted_iota(jnp.int32, h.shape, 0)
    h_prev = jnp.where(row == 0, 0.0, pltpu.roll(h, 1, axis=0))       # h_prev[i] = h[i-1]
    h_next = jnp.where(row == L - 1, 0.0, pltpu.roll(h, L - 1, axis=0))  # h_next[i] = h[i+1]
    return h_prev, h_next


def _conv3_relu(h, w_packed, bias):
    """Conv1d(k=3, pad=1) + folded-BN + ReLU as ONE im2col MXU matmul.

    h: (L, Cin); w_packed: (3*Cin, Cout) with tap order [k=0 (x_{i-1}); k=1; k=2 (x_{i+1})];
    bias: (1, Cout).
    """
    h_prev, h_next = _shift_rows(h)
    patches = jnp.concatenate([h_prev, h, h_next], axis=1)            # (L, 3*Cin)
    y = jnp.dot(patches, w_packed, preferred_element_type=jnp.float32) + bias
    return jnp.maximum(y, 0.0)


def _conv3_cin1_relu(x, w_packed, bias):
    """First conv (Cin == 1): cheap VPU broadcast-multiplies (K=3 MXU would be wasted)."""
    x_prev, x_next = _shift_rows(x)                                   # (L, 1) each
    w = w_packed                                                      # (3, 64)
    y = x_prev * w[0:1, :] + x * w[1:2, :] + x_next * w[2:3, :] + bias
    return jnp.maximum(y, 0.0)


def _maxpool2(h):
    """MaxPool1d(2) along the length (sublane) axis. (L, C) -> (L//2, C)."""
    L, C = h.shape
    return jnp.max(h.reshape(L // 2, 2, C), axis=1)


# ----------------------------------------------------------------------------------
# fused kernel: inc -> down1 -> down2 for one batch element
# ----------------------------------------------------------------------------------
def hypernetwork_kernel(x_ref,
                        w1, b1, w2, b2, w3, b3, w4, b4, w5, b5, w6, b6,
                        out_ref):
    x = x_ref[0]                                                      # (L, 1)

    # inc = DoubleConv(1, 64)
    h = _conv3_cin1_relu(x, w1[...], b1[...])
    h = _conv3_relu(h, w2[...], b2[...])

    # down1 = MaxPool1d(2) + DoubleConv(64, 128)
    h = _maxpool2(h)
    h = _conv3_relu(h, w3[...], b3[...])
    h = _conv3_relu(h, w4[...], b4[...])

    # down2 = MaxPool1d(2) + DoubleConv(128, 256)
    h = _maxpool2(h)
    h = _conv3_relu(h, w5[...], b5[...])
    h = _conv3_relu(h, w6[...], b6[...])

    out_ref[0] = h                                                    # (L//4, 256), lane-dense


# ----------------------------------------------------------------------------------
# parameter handling: raw (Conv, BN) params + offline Conv/BN folding + tap packing
# ----------------------------------------------------------------------------------
def init_params(key):
    """Raw PyTorch-style params: per conv (w, gamma, beta, running_mean, running_var)."""
    dims = [(1, 64), (64, 64), (64, 128), (128, 128), (128, 256), (256, 256)]
    keys = jax.random.split(key, len(dims))
    params = []
    for k, (cin, cout) in zip(keys, dims):
        kw, kg, kb, km, kv = jax.random.split(k, 5)
        w = jax.random.normal(kw, (cout, cin, 3), jnp.float32) / np.sqrt(3 * cin)
        gamma = 1.0 + 0.1 * jax.random.normal(kg, (cout,), jnp.float32)
        beta = 0.1 * jax.random.normal(kb, (cout,), jnp.float32)
        mean = 0.1 * jax.random.normal(km, (cout,), jnp.float32)
        var = jnp.abs(jax.random.normal(kv, (cout,), jnp.float32)) + 0.5
        params.append((w, gamma, beta, mean, var))
    return params


def _fold_conv_bn(w, gamma, beta, mean, var):
    """Fold eval-mode BN into the bias-free conv and pack the 3 taps into one matrix.

    Returns (w_packed (3*Cin, Cout), bias (1, Cout)); row blocks of w_packed are the
    taps in order k=0 (multiplies x_{i-1}), k=1 (x_i), k=2 (x_{i+1}).
    """
    scale = gamma / jnp.sqrt(var + BN_EPS)                            # (Cout,)
    wf = w * scale[:, None, None]                                     # (Cout, Cin, 3)
    bias = (beta - scale * mean).reshape(1, -1)                       # (1, Cout)
    w_packed = jnp.concatenate(
        [jnp.transpose(wf[:, :, k]) for k in range(3)], axis=0)       # (3*Cin, Cout)
    return w_packed, bias


# ----------------------------------------------------------------------------------
# wrapper: layout glue in plain JAX, compute in one fused Pallas kernel
# ----------------------------------------------------------------------------------
def hypernetwork_forward(params, x, *, channels_last=False):
    """x: (B, L) float. Returns (B, 256, L//4) (PyTorch layout) or (B, L//4, 256)."""
    B, L = x.shape
    assert L % 4 == 0, "length must be divisible by 4 (two MaxPool1d(2) stages)"
    Lo = L // 4

    x_cl = x.reshape(B, L, 1).astype(jnp.float32)                     # channel-last, Cin=1

    flat_weights = []
    in_specs = [pl.BlockSpec((1, L, 1), lambda b: (b, 0, 0))]
    for (w, g, be, m, v) in params:
        wp, bias = _fold_conv_bn(w, g, be, m, v)
        for arr in (wp, bias):
            flat_weights.append(arr)
            # constant index_map -> weights stay resident in VMEM across grid steps
            in_specs.append(pl.BlockSpec(arr.shape, lambda b: (0, 0)))

    out_cl = pl.pallas_call(
        hypernetwork_kernel,
        out_shape=jax.ShapeDtypeStruct((B, Lo, 256), jnp.float32),
        grid=(B,),
        in_specs=in_specs,
        out_specs=pl.BlockSpec((1, Lo, 256), lambda b: (b, 0, 0)),
        compiler_params=pltpu.CompilerParams(dimension_semantics=("parallel",)),
    )(x_cl, *flat_weights)

    if channels_last:
        return out_cl                                                 # (B, L//4, 256), no extra HBM pass
    return jnp.transpose(out_cl, (0, 2, 1))                           # (B, 256, L//4), PyTorch layout


# ----------------------------------------------------------------------------------
# pure-JAX reference (conv_general_dilated + eval-mode BN) for correctness check
# ----------------------------------------------------------------------------------
def _ref_conv_bn_relu(h, w, gamma, beta, mean, var):
    y = jax.lax.conv_general_dilated(
        h, w, window_strides=(1,), padding=((1, 1),),
        dimension_numbers=('NCH', 'OIH', 'NCH'),
        precision=jax.lax.Precision.HIGHEST)
    s = gamma / jnp.sqrt(var + BN_EPS)
    y = y * s[None, :, None] + (beta - s * mean)[None, :, None]
    return jnp.maximum(y, 0.0)


def _ref_maxpool2(h):
    B, C, L = h.shape
    return jnp.max(h.reshape(B, C, L // 2, 2), axis=-1)


def reference_forward(params, x):
    h = x[:, None, :].astype(jnp.float32)                             # (B, 1, L)
    h = _ref_conv_bn_relu(h, *params[0])
    h = _ref_conv_bn_relu(h, *params[1])
    h = _ref_maxpool2(h)
    h = _ref_conv_bn_relu(h, *params[2])
    h = _ref_conv_bn_relu(h, *params[3])
    h = _ref_maxpool2(h)
    h = _ref_conv_bn_relu(h, *params[4])
    h = _ref_conv_bn_relu(h, *params[5])
    return h                                                          # (B, 256, L//4)


if __name__ == "__main__":
    B, L = 2, 64

    key = jax.random.PRNGKey(0)
    kx, kp = jax.random.split(key)
    x = jax.random.normal(kx, (B, L), jnp.float32)
    params = init_params(kp)

    out = hypernetwork_forward(params, x)
    out = jax.block_until_ready(out)
    assert out.shape == (B, 256, L // 4), out.shape

    ref = reference_forward(params, x)
    np.testing.assert_allclose(np.asarray(out), np.asarray(ref), atol=2e-3, rtol=2e-3)
    print("KERNEL_OK")
</pallas_src>

<mosaic_0001>
module attributes {stable_mosaic.version = 11 : i64} {
  func.func @hypernetwork_kernel(%arg0: i32, %arg1: memref<1x64x1xf32, #tpu.memory_space<vmem>>, %arg2: memref<3x64xf32, #tpu.memory_space<vmem>>, %arg3: memref<1x64xf32, #tpu.memory_space<vmem>>, %arg4: memref<192x64xf32, #tpu.memory_space<vmem>>, %arg5: memref<1x64xf32, #tpu.memory_space<vmem>>, %arg6: memref<192x128xf32, #tpu.memory_space<vmem>>, %arg7: memref<1x128xf32, #tpu.memory_space<vmem>>, %arg8: memref<384x128xf32, #tpu.memory_space<vmem>>, %arg9: memref<1x128xf32, #tpu.memory_space<vmem>>, %arg10: memref<384x256xf32, #tpu.memory_space<vmem>>, %arg11: memref<1x256xf32, #tpu.memory_space<vmem>>, %arg12: memref<768x256xf32, #tpu.memory_space<vmem>>, %arg13: memref<1x256xf32, #tpu.memory_space<vmem>>, %arg14: memref<1x16x256xf32, #tpu.memory_space<vmem>>) attributes {dimension_semantics = [#tpu.dimension_semantics<parallel>], iteration_bounds = array<i64: 2>, scalar_prefetch = 0 : i64, scratch_operands = 0 : i64, tpu.core_type = #tpu.core_type<tc>, window_params = [{transform_indices = @transform_0, window_bounds = array<i64: 1, 64, 1>}, {pipeline_mode = #tpu.pipeline_mode<synchronous>, transform_indices = @transform_1, window_bounds = array<i64: 3, 64>}, {pipeline_mode = #tpu.pipeline_mode<synchronous>, transform_indices = @transform_2, window_bounds = array<i64: 1, 64>}, {pipeline_mode = #tpu.pipeline_mode<synchronous>, transform_indices = @transform_3, window_bounds = array<i64: 192, 64>}, {pipeline_mode = #tpu.pipeline_mode<synchronous>, transform_indices = @transform_4, window_bounds = array<i64: 1, 64>}, {pipeline_mode = #tpu.pipeline_mode<synchronous>, transform_indices = @transform_5, window_bounds = array<i64: 192, 128>}, {pipeline_mode = #tpu.pipeline_mode<synchronous>, transform_indices = @transform_6, window_bounds = array<i64: 1, 128>}, {pipeline_mode = #tpu.pipeline_mode<synchronous>, transform_indices = @transform_7, window_bounds = array<i64: 384, 128>}, {pipeline_mode = #tpu.pipeline_mode<synchronous>, transform_indices = @transform_8, window_bounds = array<i64: 1, 128>}, {pipeline_mode = #tpu.pipeline_mode<synchronous>, transform_indices = @transform_9, window_bounds = array<i64: 384, 256>}, {pipeline_mode = #tpu.pipeline_mode<synchronous>, transform_indices = @transform_10, window_bounds = array<i64: 1, 256>}, {pipeline_mode = #tpu.pipeline_mode<synchronous>, transform_indices = @transform_11, window_bounds = array<i64: 768, 256>}, {pipeline_mode = #tpu.pipeline_mode<synchronous>, transform_indices = @transform_12, window_bounds = array<i64: 1, 256>}, {transform_indices = @transform_13, window_bounds = array<i64: 1, 16, 256>}]} {
    %c0 = arith.constant 0 : index
    %c0_0 = arith.constant 0 : index
    %c0_1 = arith.constant 0 : index
    %0 = vector.load %arg1[%c0, %c0_0, %c0_1] : memref<1x64x1xf32, #tpu.memory_space<vmem>>, vector<1x64x1xf32>
    %1 = vector.shape_cast %0 : vector<1x64x1xf32> to vector<64x1xf32>
    %c0_2 = arith.constant 0 : index
    %c0_3 = arith.constant 0 : index
    %2 = vector.load %arg2[%c0_2, %c0_3] : memref<3x64xf32, #tpu.memory_space<vmem>>, vector<3x64xf32>
    %c0_4 = arith.constant 0 : index
    %c0_5 = arith.constant 0 : index
    %3 = vector.load %arg3[%c0_4, %c0_5] : memref<1x64xf32, #tpu.memory_space<vmem>>, vector<1x64xf32>
    %4 = tpu.iota {dimensions = array<i32: 0>} : vector<64x1xi32>
    %c0_i32 = arith.constant 0 : i32
    %5 = vector.broadcast %c0_i32 : i32 to vector<64x1xi32>
    %6 = arith.cmpi eq, %4, %5 : vector<64x1xi32>
    %c1_i32 = arith.constant 1 : i32
    %7 = tpu.dynamic_rotate %1 by %c1_i32 dim 0 : vector<64x1xf32>, i32 -> vector<64x1xf32>
    %cst = arith.constant 0.000000e+00 : f32
    %8 = vector.broadcast %cst : f32 to vector<64x1xf32>
    %9 = arith.select %6, %8, %7 : vector<64x1xi1>, vector<64x1xf32>
    %c63_i32 = arith.constant 63 : i32
    %10 = vector.broadcast %c63_i32 : i32 to vector<64x1xi32>
    %11 = arith.cmpi eq, %4, %10 : vector<64x1xi32>
    %c63_i32_6 = arith.constant 63 : i32
    %12 = tpu.dynamic_rotate %1 by %c63_i32_6 dim 0 : vector<64x1xf32>, i32 -> vector<64x1xf32>
    %cst_7 = arith.constant 0.000000e+00 : f32
    %13 = vector.broadcast %cst_7 : f32 to vector<64x1xf32>
    %14 = arith.select %11, %13, %12 : vector<64x1xi1>, vector<64x1xf32>
    %15 = vector.extract_strided_slice %2 {offsets = [0, 0], sizes = [1, 64], strides = [1, 1]} : vector<3x64xf32> to vector<1x64xf32>
    %16 = vector.broadcast %9 : vector<64x1xf32> to vector<64x64xf32>
    %17 = vector.broadcast %15 : vector<1x64xf32> to vector<64x64xf32>
    %18 = arith.mulf %16, %17 : vector<64x64xf32>
    %19 = vector.extract_strided_slice %2 {offsets = [1, 0], sizes = [1, 64], strides = [1, 1]} : vector<3x64xf32> to vector<1x64xf32>
    %20 = vector.broadcast %1 : vector<64x1xf32> to vector<64x64xf32>
    %21 = vector.broadcast %19 : vector<1x64xf32> to vector<64x64xf32>
    %22 = arith.mulf %20, %21 : vector<64x64xf32>
    %23 = arith.addf %18, %22 : vector<64x64xf32>
    %24 = vector.extract_strided_slice %2 {offsets = [2, 0], sizes = [1, 64], strides = [1, 1]} : vector<3x64xf32> to vector<1x64xf32>
    %25 = vector.broadcast %14 : vector<64x1xf32> to vector<64x64xf32>
    %26 = vector.broadcast %24 : vector<1x64xf32> to vector<64x64xf32>
    %27 = arith.mulf %25, %26 : vector<64x64xf32>
    %28 = arith.addf %23, %27 : vector<64x64xf32>
    %29 = vector.broadcast %3 : vector<1x64xf32> to vector<64x64xf32>
    %30 = arith.addf %28, %29 : vector<64x64xf32>
    %cst_8 = arith.constant 0.000000e+00 : f32
    %31 = vector.broadcast %cst_8 : f32 to vector<64x64xf32>
    %32 = arith.maximumf %30, %31 : vector<64x64xf32>
    %c0_9 = arith.constant 0 : index
    %c0_10 = arith.constant 0 : index
    %33 = vector.load %arg4[%c0_9, %c0_10] : memref<192x64xf32, #tpu.memory_space<vmem>>, vector<192x64xf32>
    %c0_11 = arith.constant 0 : index
    %c0_12 = arith.constant 0 : index
    %34 = vector.load %arg5[%c0_11, %c0_12] : memref<1x64xf32, #tpu.memory_space<vmem>>, vector<1x64xf32>
    %35 = tpu.iota {dimensions = array<i32: 0>} : vector<64x64xi32>
    %c0_i32_13 = arith.constant 0 : i32
    %36 = vector.broadcast %c0_i32_13 : i32 to vector<64x64xi32>
    %37 = arith.cmpi eq, %35, %36 : vector<64x64xi32>
    %c1_i32_14 = arith.constant 1 : i32
    %38 = tpu.dynamic_rotate %32 by %c1_i32_14 dim 0 : vector<64x64xf32>, i32 -> vector<64x64xf32>
    %cst_15 = arith.constant 0.000000e+00 : f32
    %39 = vector.broadcast %cst_15 : f32 to vector<64x64xf32>
    %40 = arith.select %37, %39, %38 : vector<64x64xi1>, vector<64x64xf32>
    %c63_i32_16 = arith.constant 63 : i32
    %41 = vector.broadcast %c63_i32_16 : i32 to vector<64x64xi32>
    %42 = arith.cmpi eq, %35, %41 : vector<64x64xi32>
    %c63_i32_17 = arith.constant 63 : i32
    %43 = tpu.dynamic_rotate %32 by %c63_i32_17 dim 0 : vector<64x64xf32>, i32 -> vector<64x64xf32>
    %cst_18 = arith.constant 0.000000e+00 : f32
    %44 = vector.broadcast %cst_18 : f32 to vector<64x64xf32>
    %45 = arith.select %42, %44, %43 : vector<64x64xi1>, vector<64x64xf32>
    %46 = tpu.concatenate %40, %32, %45 in 1 : vector<64x64xf32>, vector<64x64xf32>, vector<64x64xf32> -> vector<64x192xf32>
    %cst_19 = arith.constant dense<0.000000e+00> : vector<64x64xf32>
    %47 = tpu.matmul %46, %33, %cst_19 {dimension_numbers = #tpu.dot_dimension_numbers<[1], [0], [0], [1], [0, 0, 1, 1], [], []>} : vector<64x192xf32>, vector<192x64xf32>, vector<64x64xf32> -> vector<64x64xf32>
    %48 = vector.broadcast %34 : vector<1x64xf32> to vector<64x64xf32>
    %49 = arith.addf %47, %48 : vector<64x64xf32>
    %cst_20 = arith.constant 0.000000e+00 : f32
    %50 = vector.broadcast %cst_20 : f32 to vector<64x64xf32>
    %51 = arith.maximumf %49, %50 : vector<64x64xf32>
    %52 = vector.shape_cast %51 : vector<64x64xf32> to vector<32x2x64xf32>
    %cst_21 = arith.constant dense<0xFF800000> : vector<32x64xf32>
    %53 = vector.multi_reduction <maximumf>, %52, %cst_21 [1] : vector<32x2x64xf32> to vector<32x64xf32>
    %c0_22 = arith.constant 0 : index
    %c0_23 = arith.constant 0 : index
    %54 = vector.load %arg6[%c0_22, %c0_23] : memref<192x128xf32, #tpu.memory_space<vmem>>, vector<192x128xf32>
    %c0_24 = arith.constant 0 : index
    %c0_25 = arith.constant 0 : index
    %55 = vector.load %arg7[%c0_24, %c0_25] : memref<1x128xf32, #tpu.memory_space<vmem>>, vector<1x128xf32>
    %56 = tpu.iota {dimensions = array<i32: 0>} : vector<32x64xi32>
    %c0_i32_26 = arith.constant 0 : i32
    %57 = vector.broadcast %c0_i32_26 : i32 to vector<32x64xi32>
    %58 = arith.cmpi eq, %56, %57 : vector<32x64xi32>
    %c1_i32_27 = arith.constant 1 : i32
    %59 = tpu.dynamic_rotate %53 by %c1_i32_27 dim 0 : vector<32x64xf32>, i32 -> vector<32x64xf32>
    %cst_28 = arith.constant 0.000000e+00 : f32
    %60 = vector.broadcast %cst_28 : f32 to vector<32x64xf32>
    %61 = arith.select %58, %60, %59 : vector<32x64xi1>, vector<32x64xf32>
    %c31_i32 = arith.constant 31 : i32
    %62 = vector.broadcast %c31_i32 : i32 to vector<32x64xi32>
    %63 = arith.cmpi eq, %56, %62 : vector<32x64xi32>
    %c31_i32_29 = arith.constant 31 : i32
    %64 = tpu.dynamic_rotate %53 by %c31_i32_29 dim 0 : vector<32x64xf32>, i32 -> vector<32x64xf32>
    %cst_30 = arith.constant 0.000000e+00 : f32
    %65 = vector.broadcast %cst_30 : f32 to vector<32x64xf32>
    %66 = arith.select %63, %65, %64 : vector<32x64xi1>, vector<32x64xf32>
    %67 = tpu.concatenate %61, %53, %66 in 1 : vector<32x64xf32>, vector<32x64xf32>, vector<32x64xf32> -> vector<32x192xf32>
    %cst_31 = arith.constant dense<0.000000e+00> : vector<32x128xf32>
    %68 = tpu.matmul %67, %54, %cst_31 {dimension_numbers = #tpu.dot_dimension_numbers<[1], [0], [0], [1], [0, 0, 1, 1], [], []>} : vector<32x192xf32>, vector<192x128xf32>, vector<32x128xf32> -> vector<32x128xf32>
    %69 = vector.broadcast %55 : vector<1x128xf32> to vector<32x128xf32>
    %70 = arith.addf %68, %69 : vector<32x128xf32>
    %cst_32 = arith.constant 0.000000e+00 : f32
    %71 = vector.broadcast %cst_32 : f32 to vector<32x128xf32>
    %72 = arith.maximumf %70, %71 : vector<32x128xf32>
    %c0_33 = arith.constant 0 : index
    %c0_34 = arith.constant 0 : index
    %73 = vector.load %arg8[%c0_33, %c0_34] : memref<384x128xf32, #tpu.memory_space<vmem>>, vector<384x128xf32>
    %c0_35 = arith.constant 0 : index
    %c0_36 = arith.constant 0 : index
    %74 = vector.load %arg9[%c0_35, %c0_36] : memref<1x128xf32, #tpu.memory_space<vmem>>, vector<1x128xf32>
    %75 = tpu.iota {dimensions = array<i32: 0>} : vector<32x128xi32>
    %c0_i32_37 = arith.constant 0 : i32
    %76 = vector.broadcast %c0_i32_37 : i32 to vector<32x128xi32>
    %77 = arith.cmpi eq, %75, %76 : vector<32x128xi32>
    %c1_i32_38 = arith.constant 1 : i32
    %78 = tpu.dynamic_rotate %72 by %c1_i32_38 dim 0 : vector<32x128xf32>, i32 -> vector<32x128xf32>
    %cst_39 = arith.constant 0.000000e+00 : f32
    %79 = vector.broadcast %cst_39 : f32 to vector<32x128xf32>
    %80 = arith.select %77, %79, %78 : vector<32x128xi1>, vector<32x128xf32>
    %c31_i32_40 = arith.constant 31 : i32
    %81 = vector.broadcast %c31_i32_40 : i32 to vector<32x128xi32>
    %82 = arith.cmpi eq, %75, %81 : vector<32x128xi32>
    %c31_i32_41 = arith.constant 31 : i32
    %83 = tpu.dynamic_rotate %72 by %c31_i32_41 dim 0 : vector<32x128xf32>, i32 -> vector<32x128xf32>
    %cst_42 = arith.constant 0.000000e+00 : f32
    %84 = vector.broadcast %cst_42 : f32 to vector<32x128xf32>
    %85 = arith.select %82, %84, %83 : vector<32x128xi1>, vector<32x128xf32>
    %86 = tpu.concatenate %80, %72, %85 in 1 : vector<32x128xf32>, vector<32x128xf32>, vector<32x128xf32> -> vector<32x384xf32>
    %cst_43 = arith.constant dense<0.000000e+00> : vector<32x128xf32>
    %87 = tpu.matmul %86, %73, %cst_43 {dimension_numbers = #tpu.dot_dimension_numbers<[1], [0], [0], [1], [0, 0, 1, 1], [], []>} : vector<32x384xf32>, vector<384x128xf32>, vector<32x128xf32> -> vector<32x128xf32>
    %88 = vector.broadcast %74 : vector<1x128xf32> to vector<32x128xf32>
    %89 = arith.addf %87, %88 : vector<32x128xf32>
    %cst_44 = arith.constant 0.000000e+00 : f32
    %90 = vector.broadcast %cst_44 : f32 to vector<32x128xf32>
    %91 = arith.maximumf %89, %90 : vector<32x128xf32>
    %92 = vector.shape_cast %91 : vector<32x128xf32> to vector<16x2x128xf32>
    %cst_45 = arith.constant dense<0xFF800000> : vector<16x128xf32>
    %93 = vector.multi_reduction <maximumf>, %92, %cst_45 [1] : vector<16x2x128xf32> to vector<16x128xf32>
    %c0_46 = arith.constant 0 : index
    %c0_47 = arith.constant 0 : index
    %94 = vector.load %arg10[%c0_46, %c0_47] : memref<384x256xf32, #tpu.memory_space<vmem>>, vector<384x256xf32>
    %c0_48 = arith.constant 0 : index
    %c0_49 = arith.constant 0 : index
    %95 = vector.load %arg11[%c0_48, %c0_49] : memref<1x256xf32, #tpu.memory_space<vmem>>, vector<1x256xf32>
    %96 = tpu.iota {dimensions = array<i32: 0>} : vector<16x128xi32>
    %c0_i32_50 = arith.constant 0 : i32
    %97 = vector.broadcast %c0_i32_50 : i32 to vector<16x128xi32>
    %98 = arith.cmpi eq, %96, %97 : vector<16x128xi32>
    %c1_i32_51 = arith.constant 1 : i32
    %99 = tpu.dynamic_rotate %93 by %c1_i32_51 dim 0 : vector<16x128xf32>, i32 -> vector<16x128xf32>
    %cst_52 = arith.constant 0.000000e+00 : f32
    %100 = vector.broadcast %cst_52 : f32 to vector<16x128xf32>
    %101 = arith.select %98, %100, %99 : vector<16x128xi1>, vector<16x128xf32>
    %c15_i32 = arith.constant 15 : i32
    %102 = vector.broadcast %c15_i32 : i32 to vector<16x128xi32>
    %103 = arith.cmpi eq, %96, %102 : vector<16x128xi32>
    %c15_i32_53 = arith.constant 15 : i32
    %104 = tpu.dynamic_rotate %93 by %c15_i32_53 dim 0 : vector<16x128xf32>, i32 -> vector<16x128xf32>
    %cst_54 = arith.constant 0.000000e+00 : f32
    %105 = vector.broadcast %cst_54 : f32 to vector<16x128xf32>
    %106 = arith.select %103, %105, %104 : vector<16x128xi1>, vector<16x128xf32>
    %107 = tpu.concatenate %101, %93, %106 in 1 : vector<16x128xf32>, vector<16x128xf32>, vector<16x128xf32> -> vector<16x384xf32>
    %cst_55 = arith.constant dense<0.000000e+00> : vector<16x256xf32>
    %108 = tpu.matmul %107, %94, %cst_55 {dimension_numbers = #tpu.dot_dimension_numbers<[1], [0], [0], [1], [0, 0, 1, 1], [], []>} : vector<16x384xf32>, vector<384x256xf32>, vector<16x256xf32> -> vector<16x256xf32>
    %109 = vector.broadcast %95 : vector<1x256xf32> to vector<16x256xf32>
    %110 = arith.addf %108, %109 : vector<16x256xf32>
    %cst_56 = arith.constant 0.000000e+00 : f32
    %111 = vector.broadcast %cst_56 : f32 to vector<16x256xf32>
    %112 = arith.maximumf %110, %111 : vector<16x256xf32>
    %c0_57 = arith.constant 0 : index
    %c0_58 = arith.constant 0 : index
    %113 = vector.load %arg12[%c0_57, %c0_58] : memref<768x256xf32, #tpu.memory_space<vmem>>, vector<768x256xf32>
    %c0_59 = arith.constant 0 : index
    %c0_60 = arith.constant 0 : index
    %114 = vector.load %arg13[%c0_59, %c0_60] : memref<1x256xf32, #tpu.memory_space<vmem>>, vector<1x256xf32>
    %115 = tpu.iota {dimensions = array<i32: 0>} : vector<16x256xi32>
    %c0_i32_61 = arith.constant 0 : i32
    %116 = vector.broadcast %c0_i32_61 : i32 to vector<16x256xi32>
    %117 = arith.cmpi eq, %115, %116 : vector<16x256xi32>
    %c1_i32_62 = arith.constant 1 : i32
    %118 = tpu.dynamic_rotate %112 by %c1_i32_62 dim 0 : vector<16x256xf32>, i32 -> vector<16x256xf32>
    %cst_63 = arith.constant 0.000000e+00 : f32
    %119 = vector.broadcast %cst_63 : f32 to vector<16x256xf32>
    %120 = arith.select %117, %119, %118 : vector<16x256xi1>, vector<16x256xf32>
    %c15_i32_64 = arith.constant 15 : i32
    %121 = vector.broadcast %c15_i32_64 : i32 to vector<16x256xi32>
    %122 = arith.cmpi eq, %115, %121 : vector<16x256xi32>
    %c15_i32_65 = arith.constant 15 : i32
    %123 = tpu.dynamic_rotate %112 by %c15_i32_65 dim 0 : vector<16x256xf32>, i32 -> vector<16x256xf32>
    %cst_66 = arith.constant 0.000000e+00 : f32
    %124 = vector.broadcast %cst_66 : f32 to vector<16x256xf32>
    %125 = arith.select %122, %124, %123 : vector<16x256xi1>, vector<16x256xf32>
    %126 = tpu.concatenate %120, %112, %125 in 1 : vector<16x256xf32>, vector<16x256xf32>, vector<16x256xf32> -> vector<16x768xf32>
    %cst_67 = arith.constant dense<0.000000e+00> : vector<16x256xf32>
    %127 = tpu.matmul %126, %113, %cst_67 {dimension_numbers = #tpu.dot_dimension_numbers<[1], [0], [0], [1], [0, 0, 1, 1], [], []>} : vector<16x768xf32>, vector<768x256xf32>, vector<16x256xf32> -> vector<16x256xf32>
    %128 = vector.broadcast %114 : vector<1x256xf32> to vector<16x256xf32>
    %129 = arith.addf %127, %128 : vector<16x256xf32>
    %cst_68 = arith.constant 0.000000e+00 : f32
    %130 = vector.broadcast %cst_68 : f32 to vector<16x256xf32>
    %131 = arith.maximumf %129, %130 : vector<16x256xf32>
    %c0_69 = arith.constant 0 : index
    %c0_70 = arith.constant 0 : index
    %c0_71 = arith.constant 0 : index
    %132 = vector.load %arg14[%c0_69, %c0_70, %c0_71] : memref<1x16x256xf32, #tpu.memory_space<vmem>>, vector<1x16x256xf32>
    %133 = vector.shape_cast %132 : vector<1x16x256xf32> to vector<16x256xf32>
    %134 = vector.shape_cast %131 : vector<16x256xf32> to vector<1x16x256xf32>
    tpu.vector_store %arg14[%c0_69, %c0_70, %c0_71], %134 {strides = array<i32>} : memref<1x16x256xf32, #tpu.memory_space<vmem>>, vector<1x16x256xf32>,
    return
  }
  func.func @transform_0(%arg0: i32) -> (i32, i32, i32) {
    %c0_i32 = arith.constant 0 : i32
    %c0_i32_0 = arith.constant 0 : i32
    %c0_i32_1 = arith.constant 0 : i32
    return %arg0, %c0_i32, %c0_i32_0 : i32, i32, i32
  }
  func.func @transform_1(%arg0: i32) -> (i32, i32) {
    %c0_i32 = arith.constant 0 : i32
    %c0_i32_0 = arith.constant 0 : i32
    %c0_i32_1 = arith.constant 0 : i32
    return %c0_i32, %c0_i32_0 : i32, i32
  }
  func.func @transform_2(%arg0: i32) -> (i32, i32) {
    %c0_i32 = arith.constant 0 : i32
    %c0_i32_0 = arith.constant 0 : i32
    %c0_i32_1 = arith.constant 0 : i32
    return %c0_i32, %c0_i32_0 : i32, i32
  }
  func.func @transform_3(%arg0: i32) -> (i32, i32) {
    %c0_i32 = arith.constant 0 : i32
    %c0_i32_0 = arith.constant 0 : i32
    %c0_i32_1 = arith.constant 0 : i32
    return %c0_i32, %c0_i32_0 : i32, i32
  }
  func.func @transform_4(%arg0: i32) -> (i32, i32) {
    %c0_i32 = arith.constant 0 : i32
    %c0_i32_0 = arith.constant 0 : i32
    %c0_i32_1 = arith.constant 0 : i32
    return %c0_i32, %c0_i32_0 : i32, i32
  }
  func.func @transform_5(%arg0: i32) -> (i32, i32) {
    %c0_i32 = arith.constant 0 : i32
    %c0_i32_0 = arith.constant 0 : i32
    %c0_i32_1 = arith.constant 0 : i32
    return %c0_i32, %c0_i32_0 : i32, i32
  }
  func.func @transform_6(%arg0: i32) -> (i32, i32) {
    %c0_i32 = arith.constant 0 : i32
    %c0_i32_0 = arith.constant 0 : i32
    %c0_i32_1 = arith.constant 0 : i32
    return %c0_i32, %c0_i32_0 : i32, i32
  }
  func.func @transform_7(%arg0: i32) -> (i32, i32) {
    %c0_i32 = arith.constant 0 : i32
    %c0_i32_0 = arith.constant 0 : i32
    %c0_i32_1 = arith.constant 0 : i32
    return %c0_i32, %c0_i32_0 : i32, i32
  }
  func.func @transform_8(%arg0: i32) -> (i32, i32) {
    %c0_i32 = arith.constant 0 : i32
    %c0_i32_0 = arith.constant 0 : i32
    %c0_i32_1 = arith.constant 0 : i32
    return %c0_i32, %c0_i32_0 : i32, i32
  }
  func.func @transform_9(%arg0: i32) -> (i32, i32) {
    %c0_i32 = arith.constant 0 : i32
    %c0_i32_0 = arith.constant 0 : i32
    %c0_i32_1 = arith.constant 0 : i32
    return %c0_i32, %c0_i32_0 : i32, i32
  }
  func.func @transform_10(%arg0: i32) -> (i32, i32) {
    %c0_i32 = arith.constant 0 : i32
    %c0_i32_0 = arith.constant 0 : i32
    %c0_i32_1 = arith.constant 0 : i32
    return %c0_i32, %c0_i32_0 : i32, i32
  }
  func.func @transform_11(%arg0: i32) -> (i32, i32) {
    %c0_i32 = arith.constant 0 : i32
    %c0_i32_0 = arith.constant 0 : i32
    %c0_i32_1 = arith.constant 0 : i32
    return %c0_i32, %c0_i32_0 : i32, i32
  }
  func.func @transform_12(%arg0: i32) -> (i32, i32) {
    %c0_i32 = arith.constant 0 : i32
    %c0_i32_0 = arith.constant 0 : i32
    %c0_i32_1 = arith.constant 0 : i32
    return %c0_i32, %c0_i32_0 : i32, i32
  }
  func.func @transform_13(%arg0: i32) -> (i32, i32, i32) {
    %c0_i32 = arith.constant 0 : i32
    %c0_i32_0 = arith.constant 0 : i32
    %c0_i32_1 = arith.constant 0 : i32
    return %arg0, %c0_i32, %c0_i32_0 : i32, i32, i32
  }
}

</mosaic_0001>

<bundles_post_ra>
// kernel: tpu_custom_call.1
= control target key start
LH: loop header
LB: loop body
LE: loop exit
PB: predicated region body
PF: predicated region fallthrough
CT: control target
= control target key end

     0   :  { %s4984_s0 = inlined_call_operand.vmem [shape: f32[2,64,1], index: 0, kind: input, shape index: {}]   ;;  %s4985_s1 = inlined_call_operand.vmem [shape: f32[3,64], index: 1, kind: input, shape index: {}]   ;;  %s4986_s2 = inlined_call_operand.vmem [shape: f32[1,64], index: 2, kind: input, shape index: {}]   ;;  %s4987_s3 = inlined_call_operand.vmem [shape: f32[192,64], index: 3, kind: input, shape index: {}]   ;;  %s4988_s4 = inlined_call_operand.vmem [shape: f32[1,64], index: 4, kind: input, shape index: {}]   ;;  %s4989_s5 = inlined_call_operand.hbm [shape: f32[192,128], index: 5, kind: input, shape index: {}]   ;;  %s4990_s6 = inlined_call_operand.vmem [shape: f32[1,128], index: 6, kind: input, shape index: {}]   ;;  %s4991_s7 = inlined_call_operand.vmem [shape: f32[384,128], index: 7, kind: input, shape index: {}]   ;;  %s4992_s8 = inlined_call_operand.vmem [shape: f32[1,128], index: 8, kind: input, shape index: {}]   ;;  %s4993_s9 = inlined_call_operand.hbm [shape: f32[384,256], index: 9, kind: input, shape index: {}]   ;;  %s4994_s10 = inlined_call_operand.vmem [shape: f32[1,256], index: 10, kind: input, shape index: {}]   ;;  %s4995_s11 = inlined_call_operand.hbm [shape: f32[768,256], index: 11, kind: input, shape index: {}]   ;;  %s4996_s12 = inlined_call_operand.vmem [shape: f32[1,256], index: 12, kind: input, shape index: {}]   ;;  %s4997_s13 = inlined_call_operand.hbm [shape: f32[2,16,256], index: 13, kind: output, shape index: {}]  }
   0x1   :  { %5012 = sst [smem:[#allocation19_spill]] %s4993_s9 }
   0x2   :  { %5013 = sst [smem:[#allocation20_spill]] %s4997_s13 }
   0x3   :  { %18 = vsyncpa [#allocation3], 0 }
   0x4   :  { %19 = vsyncpa [#allocation6], 0 }
   0x5   :  { %20 = vsyncpa [#allocation4], 0 }
   0x6   :  { %22 = vsyncpa [#allocation4 + $0x1], 0  ;;  %s3930_s25 = smov 0   ;;  %s3932_s26 = smov 0  }
   0x7   :  { %s3934_s27 = smov 0   ;;  %s3936_s28 = smov 0  }
   0x8 LB: > { %5014 = sst [smem:[#allocation12_spill]] %s3831_s25  ;;  %s3951_s29 = sadd.s32 4294967295, %s3843_s28   ;;  %s3843_s28 = sphi %s3936_s28, %s5043_s28   ;;  %s3839_s27 = sphi %s3934_s27, %s5045_s27   ;;  %s3835_s26 = sphi %s3932_s26, %s5047_s26   ;;  %s3831_s25 = sphi %s3930_s25, %s5046_s25  }
   0x9   : > { %5015 = sst [smem:[#allocation13_spill]] %s3839_s27  ;;  %s3007_s30 = sadd.s32 4294967294, %s3843_s28  }
   0xa   : > { %5016 = sst [smem:[#allocation14_spill]] %s3843_s28  ;;  %s3955_s14 = sadd.s32 1, %s3843_s28  }
   0xb   : > { %5017 = sst [smem:[#allocation15_spill]] %s3955_s14  ;;  %s313_s15 = sadd.s32 1, %s3839_s27 }
   0xc   : > { %s310_s16 = ssub.s32 %s3843_s28, %s3955_s14  ;;  %p323_p0 = scmp.ne.s32.totalorder %s3839_s27, %s3835_s26 }
   0xd   : > { %p311_p1 = scmp.eq.s32.totalorder %s310_s16, 0  ;;  %p324_p2 = scmp.eq.s32.totalorder %s3951_s29, 1 }
   0xe   : > { %p329_p3 = scmp.ne.s32.totalorder %s3835_s26, %s3831_s25  ;;  %p330_p4 = scmp.eq.s32.totalorder %s3007_s30, 1 }
   0xf   : > { %s3966_s17 = scalar_select %p311_p1, %s3839_s27, %s313_s15  }
  0x10   : > { %p3968_p5 = por %p324_p2, %p323_p0  ;;  %p3972_p6 = por %p330_p4, %p329_p3 }
  0x11   : > { %5018 = sst [smem:[#allocation16_spill]] %s3966_s17  ;;  %p3008_p7 = scmp.ge.s32.totalorder %s3843_s28, 1 }
  0x12   : > { %s5019_s18 = scalar_select %p3968_p5, 1, 0 }
  0x13   : > { %s5021_s19 = scalar_select %p3972_p6, 1, 0 }
  0x14   : > { %5020 = sst [smem:[#allocation17_spill]] %s5019_s18  ;;  %p337_p8 = scmp.lt.s32.totalorder %s3843_s28, 3 }
  0x15   : > { %5022 = sst [smem:[#allocation18_spill]] %s5021_s19  ;;  %p5002_p9 = scmp.eq.s32.totalorder %s3951_s29, 0 }
  0x16   : > { %p3979_p10 = pnand %p3008_p7, %p337_p8  ;;  %s3845_s21 = smov [#allocation5]  }
  0x17   : > { %s383_s22 = sshll.u32 %s3845_s21, 4  ;;  %s3846_s24 = smov [#allocation2]   ;;  %s384_s22 = int_to_ptr.vmem [resolvable:$true] %s383_s22 }
  0x18   : > { %s5023_s20 = scalar_select %p3979_p10, 1, 0 }
  0x19   : > { %p3620_p11 = pneg %p3979_p10  ;;  %s361_s30 = sshll.u32 %s3846_s24, 4  ;;  %s3991_s30 = int_to_ptr.vmem [resolvable:$true] %s361_s30 }
  0x1a   : > { %s5025_s9 = sld [smem:[#allocation19_spill]] }
  0x1b   : > { %p3987_p12 = pnand %p5002_p9, %p3620_p11 }
  0x1d   : > { %p4001_p0 = pneg %p3987_p12 }
  0x20   : > { %s3689_s17 = scalar_lea.hbm %s5025_s9, 12288 }
  0x21   : > { %p3690_p13 = scmp.ne.s32.totalorder %s5025_s9, %s3689_s17  ;;  %p3696_p3 = scmp.lt.u32.totalorder %s3689_s17, %s5025_s9 }
  0x23   : > { %p3692_p1 = pnand %p4001_p0, %p3690_p13 }
  0x25   : > { %p3693_p2 = pneg %p3692_p1 }
  0x27   : > { %p3698_p4 = pnand %p3696_p3, %p3693_p2 }
  0x29   : > { %3701 = shalt.err (!%p3698_p4)
}
  0x2a   : > { %s3702_s15 = scalar_lea.vmem %s384_s22, 12288  ;;  %p3710_p9 = scmp.lt.s32.totalorder %s384_s22, %s384_s22 }
  0x2b   : > { %p3703_p7 = scmp.ne.s32.totalorder %s384_s22, %s3702_s15  ;;  %p3711_p6 = scmp.lt.s32.totalorder %s3702_s15, %s3702_s15 }
  0x2d   : > { %p3705_p8 = pnand %p3703_p7, %p4001_p0  ;;  %p3712_p5 = por %p3711_p6, %p3710_p9 }
  0x2f   : > { %p3706_p11 = pneg %p3705_p8 }
  0x31   : > { %p3713_p10 = pnand %p3712_p5, %p3706_p11 }
  0x33   : > { %3716 = shalt.err (!%p3713_p10)
}
  0x34   : > { %s5010_s27 = smov 256   ;;  %s5011_s14 = smov 16  }
  0x35   : > { %3626 = dma.hbm_to_vmem [thread:$0]  (!%p3987_p12), %s5025_s9, 12288, %s384_s22, [#allocation6], %s5010_s27, %s5010_s27, %s5011_s14  }
  0x36   : > { %s3717_s25 = scalar_lea.hbm %s4989_s5, 3072 }
  0x37   : > { %p3718_p5 = scmp.ne.s32.totalorder %s4989_s5, %s3717_s25  ;;  %p3724_p10 = scmp.lt.u32.totalorder %s3717_s25, %s4989_s5 }
  0x39   : > { %p3720_p6 = pnand %p3718_p5, %p4001_p0 }
  0x3b   : > { %p3721_p9 = pneg %p3720_p6 }
  0x3d   : > { %p3726_p13 = pnand %p3724_p10, %p3721_p9 }
  0x3f   : > { %3729 = shalt.err (!%p3726_p13)
}
  0x40   : > { %s3730_s22 = scalar_lea.vmem %s3991_s30, 3072  ;;  %p3738_p4 = scmp.lt.s32.totalorder %s3991_s30, %s3991_s30 }
  0x41   : > { %p3731_p1 = scmp.ne.s32.totalorder %s3991_s30, %s3730_s22  ;;  %p3739_p7 = scmp.lt.s32.totalorder %s3730_s22, %s3730_s22 }
  0x43   : > { %p3733_p2 = pnand %p3731_p1, %p4001_p0  ;;  %p3740_p8 = por %p3739_p7, %p3738_p4 }
  0x45   : > { %p3734_p3 = pneg %p3733_p2 }
  0x47   : > { %p3741_p11 = pnand %p3740_p8, %p3734_p3 }
  0x49   : > { %3744 = shalt.err (!%p3741_p11)
}
  0x4a   : > { %s3849_s28 = smov 128   ;;  %s3850_s13 = smov 8  }
  0x4b   : > { %3623 = dma.hbm_to_vmem [thread:$0]  (!%p3987_p12), %s4989_s5, 3072, %s3991_s30, [#allocation3], %s3849_s28, %s3849_s28, %s3850_s13  }
  0x4c   : > { %s3851_s17 = smov [#allocation7]   ;;  %s3745_s15 = scalar_lea.hbm %s4995_s11, 24576 }
  0x4d   : > { %s399_s19 = sshll.u32 %s3851_s17, 4  ;;  %p3746_p5 = scmp.ne.s32.totalorder %s4995_s11, %s3745_s15  ;;  %s400_s19 = int_to_ptr.vmem [resolvable:$true] %s399_s19 }
  0x4e   : > { %p3752_p10 = scmp.lt.u32.totalorder %s3745_s15, %s4995_s11 }
  0x4f   : > { %p3748_p6 = pnand %p3746_p5, %p4001_p0 }
  0x51   : > { %p3749_p9 = pneg %p3748_p6 }
  0x53   : > { %p3754_p13 = pnand %p3752_p10, %p3749_p9 }
  0x55   : > { %3757 = shalt.err (!%p3754_p13)
}
  0x56   : > { %s3758_s30 = scalar_lea.vmem %s400_s19, 24576  ;;  %p3766_p4 = scmp.lt.s32.totalorder %s400_s19, %s400_s19 }
  0x57   : > { %p3759_p1 = scmp.ne.s32.totalorder %s400_s19, %s3758_s30  ;;  %p3767_p7 = scmp.lt.s32.totalorder %s3758_s30, %s3758_s30 }
  0x59   : > { %p3761_p2 = pnand %p3759_p1, %p4001_p0  ;;  %p3768_p8 = por %p3767_p7, %p3766_p4 }
  0x5b   : > { %p3762_p3 = pneg %p3761_p2 }
  0x5d   : > { %p3769_p11 = pnand %p3768_p8, %p3762_p3 }
  0x5f   : > { %3772 = shalt.err (!%p3769_p11)
}
  0x60   : > { %s5027_s27 = smov 16   ;;  %s5028_s28 = smov 256  }
  0x61   : > { %3629 = dma.hbm_to_vmem [thread:$0]  (!%p3987_p12), %s4995_s11, 24576, %s400_s19, [#allocation6], %s5028_s28, %s5028_s28, %s5027_s27  }
  0x62   : > { %p5029_p5 = scmp.ne.s32.totalorder %s5023_s20, 0 }
  0x63   : > { %p5030_p0 = scmp.eq.s32.totalorder (!%p5029_p5), %s3951_s29, 0 }
  0x64   : > { %426 = sbr.rel (%p5029_p5) target bundleno = 1912 (0x778), region = 72 }
  0x6b   : > { %3818 = dma.done.wait (%p5030_p0), [#allocation3], 3072   ;;  %p5031_p6 = pmov %p5030_p0 }
  0x6c   : > { %p5032_p9 = pmov %p5030_p0 }
  0x6d   : > { %3820 = vsyncadd (%p5031_p6), [#allocation3], 4294964224 }
  0x6e   : > { %3822 = dma.done.wait (%p5032_p9), [#allocation6], 36864   ;;  %p5033_p10 = pmov %p5030_p0 }
  0x6f   : > { %p478_p13 = scmp.lt.s32.totalorder %s3951_s29, 1  ;;  %v493_v0 = vlaneseq  ;;  %v3852_v1 = vmov 0   ;;  %v762_v46 = vld [vmem:[%s4987_s3] sm:$0xff]  ;;  %v763_v47 = vld [vmem:[%s4987_s3 + $0x8] sm:$0xff]  ;;  %v764_v48 = vld [vmem:[%s4987_s3 + $0x10] sm:$0xff]  ;;  %v3853_v49 = vmov 0.0|0.0  }
  0x70   : > { %3824 = vsyncadd (%p5033_p10), [#allocation6], 4294930432  ;;  %3687 = vset.pattern.permute.xlu0 %v3852_v1  ;;  %3688 = vset.pattern.permute.xlu1 %v3852_v1  ;;  %v3163_v50 = vpack.c.bf16 %v763_v47, %v762_v46  ;;  %v765_v51 = vld [vmem:[%s4987_s3 + $0x18] sm:$0xff]  ;;  %v766_v53 = vld [vmem:[%s4987_s3 + $0x20] sm:$0xff]  ;;  %s3854_s17 = smov 64   ;;  %vm867_vm4 = vcmask 523264  }
  0x71   : > { %s479_s20 = scalar_select %p478_p13, %s3951_s29, 1  ;;  %v4076_v2 = vshrl.u32 %v493_v0, 7  ;;  %3162 = vmatprep.subr.bf16.mxu0 %v3853_v49  ;;  %v3166_v52 = vpack.c.bf16 %v765_v51, %v764_v48  ;;  %v767_v54 = vld [vmem:[%s4987_s3 + $0x28] sm:$0xff]  ;;  %v768_v56 = vld [vmem:[%s4987_s3 + $0x30] sm:$0xff]  ;;  %v769_v57 = vld [vmem:[%s4987_s3 + $0x38] sm:$0xff]  ;;  %vm1195_vm5 = vcmask 517120  }
  0x72   : > { %3164 = vmatpush1.bf16.msra.mxu0 %v3163_v50  ;;  %v3169_v55 = vpack.c.bf16 %v767_v54, %v766_v53  ;;  %v3172_v58 = vpack.c.bf16 %v769_v57, %v768_v56  ;;  %v770_v59 = vld [vmem:[%s4987_s3 + $0x40] sm:$0xff]  ;;  %v771_v60 = vld [vmem:[%s4987_s3 + $0x48] sm:$0xff]  ;;  %v772_v62 = vld [vmem:[%s4987_s3 + $0x50] sm:$0xff]  ;;  %vm1477_vm6 = vcmask 1041409   ;;  %vm1479_vm7 = vcmask 1042434   ;;  %s475_s22 = sand.u32 1, %s3835_s26  }
  0x73   : > { %s3057_s23 = sshll.u32 %s479_s20, 6  ;;  %vm551_vm0 = vcmp.lt.s32.totalorder %v4076_v2, 7  ;;  %vm518_vm1 = vcmp.lt.s32.totalorder %v4076_v2, 1  ;;  %vm502_vm2 = vcmp.eq.s32.totalorder %v4076_v2, 0  ;;  %v4130_v42 = vadd.s32 56, %v4076_v2  ;;  %3165 = vmatprep.subr.bf16.mxu0 %v3853_v49  ;;  %v773_v63 = vld [vmem:[%s4987_s3 + $0x58] sm:$0xff] }
  0x74   : > { %s4081_s25 = scalar_lea.vmem %s4984_s0, %s3057_s23  ;;  %v3175_v61 = vpack.c.bf16 %v771_v60, %v770_v59  ;;  %v3178_v0 = vpack.c.bf16 %v773_v63, %v772_v62  ;;  %v774_v1 = vld [vmem:[%s4987_s3 + $0x60] sm:$0xff]  ;;  %vm1481_vm8 = vcmask 1043459   ;;  %vm1483_vm9 = vcmask 1044484   ;;  %vm4763_vm14 = vmneg %vm502_vm2  ;;  %s3017_s30 = sshll.u32 %s475_s22, 5 }
  0x75   : > { %v4084_v3 = vld [vmem:[%s4081_s25] sm:$0xff]  ;;  %v484_v4 = vld [vmem:[%s4081_s25 + $0x8] sm:$0xff]  ;;  %v485_v5 = vld [vmem:[%s4081_s25 + $0x10] sm:$0xff]  ;;  %vm542_vm3 = vcmp.eq.s32.totalorder %v4130_v42, 63  ;;  %vm1485_vm10 = vcmask 1045509   ;;  %vm1487_vm11 = vcmask 1046534  }
  0x76   : > { %622 = vperm.xlu0 %3687, %v4084_v3   ;;  %v510_v6 = vrot.slane %v4084_v3, 7  ;;  %v543_v7 = vrot.slane %v4084_v3, 1  ;;  %v544_v8 = vrot.slane %v484_v4, 1  ;;  %v511_v9 = vrot.slane %v484_v4, 7  ;;  %v490_v10 = vld [vmem:[%s4081_s25 + $0x38] sm:$0xff]  ;;  %v487_v24 = vld [vmem:[%s4081_s25 + $0x20] sm:$0xff]  ;;  %3167 = vmatpush1.bf16.msra.mxu0 %v3166_v52 }
  0x77   : > { %v512_v11 = vrot.slane %v485_v5, 7  ;;  %v517_v13 = vrot.slane %v490_v10, 7  ;;  %v545_v15 = vrot.slane %v485_v5, 1  ;;  %v486_v18 = vld [vmem:[%s4081_s25 + $0x18] sm:$0xff]  ;;  %v547_v26 = vrot.slane %v487_v24, 1  ;;  %v488_v28 = vld [vmem:[%s4081_s25 + $0x28] sm:$0xff]  ;;  %3168 = vmatprep.subr.bf16.mxu0 %v3853_v49 }
  0x78   : > { %v558_v12 = vsel %vm551_vm0, %v543_v7, %v544_v8  ;;  %v525_v14 = vsel %vm518_vm1, %v510_v6, %v511_v9  ;;  %v546_v21 = vrot.slane %v486_v18, 1  ;;  %v513_v22 = vrot.slane %v486_v18, 7  ;;  %v489_v34 = vld [vmem:[%s4081_s25 + $0x30] sm:$0xff]  ;;  %v775_v3 = vld [vmem:[%s4987_s3 + $0x68] sm:$0xff]  ;;  %s477_s27 = scalar_lea.vmem [#allocation8], %s3017_s30  ;;  %s5036_s9 = sld [smem:[#allocation17_spill]] }
  0x79   : > { %682 = vperm.xlu1 %3688, %v558_v12   ;;  %v524_v16 = vsel %vm518_vm1, %v511_v9, %v512_v11  ;;  %v526_v17 = vsel %vm518_vm1, %v517_v13, %v510_v6  ;;  %v557_v19 = vsel %vm551_vm0, %v544_v8, %v545_v15  ;;  %v514_v27 = vrot.slane %v487_v24, 7  ;;  %v777_v6 = vld [vmem:[%s4987_s3 + $0x78] sm:$0xff]  ;;  %v778_v8 = vld [vmem:[%s4987_s3 + $0x80] sm:$0xff]  ;;  %v779_v9 = vld [vmem:[%s4987_s3 + $0x88] sm:$0xff]  ;;  %s2914_s28 = sshll.u32 %s477_s27, 4  ;;  %s3058_s14 = sshll.u32 %s3951_s29, 9  ;;  %s4936_s28 = int_to_ptr.vmem [resolvable:$true] %s2914_s28 }
  0x7a   : > { %627 = vperm.xlu0 %3687, %v484_v4   ;;  %v527_v20 = vsel %vm502_vm2, 0.0, %v526_v17  ;;  %v556_v23 = vsel %vm551_vm0, %v545_v15, %v546_v21  ;;  %v523_v25 = vsel %vm518_vm1, %v512_v11, %v513_v22  ;;  %v555_v29 = vsel %vm551_vm0, %v546_v21, %v547_v26  ;;  %3170 = vmatpush1.bf16.msra.mxu0 %v3169_v55  ;;  %v780_v11 = vld [vmem:[%s4987_s3 + $0x90] sm:$0xff]  ;;  %v781_v12 = vld [vmem:[%s4987_s3 + $0x98] sm:$0xff]  ;;  %v783_v15 = vld [vmem:[%s4987_s3 + $0xa8] sm:$0xff]  ;;  %s5037_s21 = sld [smem:[#allocation20_spill]]  ;;  %s4943_s25 = scalar_lea.sflag [#allocation4], %s475_s22 }
  0x7b   : > { %v522_v30 = vsel %vm518_vm1, %v513_v22, %v514_v27  ;;  %v548_v31 = vrot.slane %v488_v28, 1  ;;  %v515_v32 = vrot.slane %v488_v28, 7  ;;  %v549_v36 = vrot.slane %v489_v34, 1  ;;  %3171 = vmatprep.subr.bf16.mxu0 %v3853_v49  ;;  %s3773_s18 = scalar_lea.vmem %s4936_s28, 512  ;;  %s3857_s29 = smov [#allocation8]  }
  0x7c   : > { %v516_v37 = vrot.slane %v489_v34, 7  ;;  %v550_v40 = vrot.slane %v490_v10, 1  ;;  %v3181_v4 = vpack.c.bf16 %v775_v3, %v774_v1  ;;  %v4224_v21 = vsub.s32 1, %v4076_v2  ;;  %p3774_p12 = scmp.ne.s32.totalorder %s4936_s28, %s3773_s18 }
  0x7d   : > { %575 = vperm.xlu1 %3688, %v525_v14   ;;  %v554_v33 = vsel %vm551_vm0, %v547_v26, %v548_v31  ;;  %v521_v35 = vsel %vm518_vm1, %v514_v27, %v515_v32  ;;  %v553_v38 = vsel %vm551_vm0, %v548_v31, %v549_v36  ;;  %v782_v14 = vld [vmem:[%s4987_s3 + $0xa0] sm:$0xff]  ;;  %v722_v26 = vsub.s32 2, %v4076_v2 }
  0x7e   : > { %580 = vperm.xlu0 %3687, %v524_v16   ;;  %v520_v39 = vsel %vm518_vm1, %v515_v32, %v516_v37  ;;  %v552_v41 = vsel %vm551_vm0, %v549_v36, %v550_v40  ;;  %v519_v43 = vsel %vm518_vm1, %v516_v37, %v517_v13  ;;  %v559_v44 = vsel %vm551_vm0, %v550_v40, %v543_v7  ;;  %v4250_v40 = vld [vmem:[%s4986_s2] ss:$0 sm:$0xff]  ;;  %p5038_p1 = scmp.ne.s32.totalorder %s5036_s9, 0 }
  0x7f   : > { %v567_v45 = vsel %vm542_vm3, 0.0, %v559_v44  ;;  %3173 = vmatpush1.bf16.msra.mxu0 %v3172_v58  ;;  %v3190_v13 = vpack.c.bf16 %v781_v12, %v780_v11  ;;  %v3193_v16 = vpack.c.bf16 %v783_v15, %v782_v14  ;;  %vm1489_vm12 = vcmask 1047559  }
  0x80   : > { %3174 = vmatprep.subr.bf16.mxu0 %v3853_v49  ;;  %s4941_s13 = scalar_lea.hbm %s5037_s21, %s3058_s14  ;;  %p3775_p2 = pnand %p3774_p12, %p5038_p1 }
  0x81   : > { %687 = vperm.xlu1 %3688, %v557_v19   ;;  %v491_v19 = vld [vmem:[%s4985_s1] sm:$0x7] }
  0x82   : > { %570 = vperm.xlu0 %3687, %v527_v20   ;;  %v4241_v32 = vrot.slane %v491_v19, %v722_v26  ;;  %p3776_p3 = pneg %p3775_p2 }
  0x83   : > { %3176 = vmatpush1.bf16.msra.mxu0 %v3175_v61 }
  0x84   : > { %3177 = vmatprep.subr.bf16.mxu0 %v3853_v49 }
  0x85   : > { %632 = vperm.xlu1 %3688, %v485_v5   ;;  %v776_v5 = vld [vmem:[%s4987_s3 + $0x70] sm:$0xff] }
  0x86   : > { %692 = vperm.xlu0 %3687, %v556_v23   ;;  %v3184_v7 = vpack.c.bf16 %v777_v6, %v776_v5 }
  0x87   : > { %3179 = vmatpush1.bf16.msra.mxu0 %v3178_v0 }
  0x88   : > { %3180 = vmatprep.subr.bf16.mxu0 %v3853_v49 }
  0x89   : > { %585 = vperm.xlu1 %3688, %v523_v25   ;;  %v785_v25 = vld [vmem:[%s4987_s3 + $0xb8] sm:$0xff] }
  0x8a   : > { %637 = vperm.xlu0 %3687, %v486_v18   ;;  %v4218_v18 = vsub.s32 0, %v4076_v2 }
  0x8b   : > { %3182 = vmatpush1.bf16.msra.mxu0 %v3181_v4 }
  0x8c   : > { %3183 = vmatprep.subr.bf16.mxu0 %v3853_v49  ;;  %v4227_v23 = vrot.slane %v491_v19, %v4218_v18 }
  0x8d   : > { %697 = vperm.xlu1 %3688, %v555_v29   ;;  %v4237_v29 = vrot.slane %v491_v19, %v4224_v21 }
  0x8e   : > { %590 = vperm.xlu0 %3687, %v522_v30  }
  0x8f   : > { %3185 = vmatpush1.bf16.msra.mxu0 %v3184_v7 }
  0x90   : > { %3186 = vmatprep.subr.bf16.mxu0 %v3853_v49 }
  0x91   : > { %642 = vperm.xlu1 %3688, %v487_v24   ;;  %v784_v24 = vld [vmem:[%s4987_s3 + $0xb0] sm:$0xff] }
  0x92   : > { %702 = vperm.xlu0 %3687, %v554_v33   ;;  %v3196_v27 = vpack.c.bf16 %v785_v25, %v784_v24 }
  0x95   : > { %595 = vperm.xlu1 %3688, %v521_v35  }
  0x96   : > { %647 = vperm.xlu0 %3687, %v488_v28  }
  0x99   : > { %707 = vperm.xlu1 %3688, %v553_v38  }
  0x9a   : > { %600 = vperm.xlu0 %3687, %v520_v39  }
  0x9d   : > { %652 = vperm.xlu1 %3688, %v489_v34  }
  0x9e   : > { %712 = vperm.xlu0 %3687, %v552_v41  }
  0xa1   : > { %605 = vperm.xlu1 %3688, %v519_v43  }
  0xa2   : > { %657 = vperm.xlu0 %3687, %v490_v10   ;;  %v3187_v10 = vpack.c.bf16 %v779_v9, %v778_v8 }
  0xa4   : > { %3188 = vmatpush1.bf16.msra.mxu0 %v3187_v10 }
  0xa5   : > { %717 = vperm.xlu1 %3688, %v567_v45   ;;  %3189 = vmatprep.subr.bf16.mxu0 %v3853_v49 }
  0xa8   : > { %3191 = vmatpush1.bf16.msra.mxu0 %v3190_v13 }
  0xa9   : > { %3192 = vmatprep.subr.bf16.mxu0 %v3853_v49 }
  0xac   : > { %3194 = vmatpush1.bf16.msra.mxu0 %v3193_v16 }
  0xad   : > { %3195 = vmatprep.subr.bf16.mxu0 %v3853_v49 }
  0xb0   : > { %3197 = vmatpush1.bf16.msra.mxu0 %v3196_v27 }
  0xb1   : > { %3198 = vmatprep.subr.bf16.mxu0 %v3853_v49 }
  0xf5   : > { %v623_v17 = vpop.permute.xlu0 %622 }
  0xf6   : > { %v664_v38 = vmul.f32 %v4237_v29, %v623_v17 }
  0xf8   : > { %v683_v20 = vpop.permute.xlu1 %682 }
  0xf9   : > { %v628_v22 = vpop.permute.xlu0 %627  ;;  %v724_v43 = vmul.f32 %v4241_v32, %v683_v20 }
  0xfa   : > { %v665_v33 = vmul.f32 %v4237_v29, %v628_v22 }
  0xfc   : > { %v576_v28 = vpop.permute.xlu1 %575 }
  0xfd   : > { %v613_v30 = vmul.f32 %v4227_v23, %v576_v28  ;;  %v581_v31 = vpop.permute.xlu0 %580 }
  0xfe   : > { %v614_v46 = vmul.f32 %v4227_v23, %v581_v31 }
  0xff   : > { %v673_v35 = vadd.f32 %v665_v33, %v613_v30 }
 0x100   : > { %v688_v34 = vpop.permute.xlu1 %687 }
 0x101   : > { %v725_v36 = vmul.f32 %v4241_v32, %v688_v34  ;;  %v571_v37 = vpop.permute.xlu0 %570 }
 0x102   : > { %v612_v39 = vmul.f32 %v4227_v23, %v571_v37 }
 0x103   : > { %v733_v41 = vadd.f32 %v725_v36, %v673_v35 }
 0x104   : > { %v672_v44 = vadd.f32 %v664_v38, %v612_v39  ;;  %v633_v45 = vpop.permute.xlu1 %632 }
 0x105   : > { %v666_v47 = vmul.f32 %v4237_v29, %v633_v45  ;;  %v693_v48 = vpop.permute.xlu0 %692  ;;  %v747_v50 = vadd.f32 %v4250_v40, %v733_v41 }
 0x106   : > { %v732_v51 = vadd.f32 %v724_v43, %v672_v44  ;;  %v726_v52 = vmul.f32 %v4241_v32, %v693_v48 }
 0x107   : > { %v674_v53 = vadd.f32 %v666_v47, %v614_v46  ;;  %v755_v54 = vmax.f32 %v747_v50, 0.0 }
 0x108   : > { %v586_v55 = vpop.permute.xlu1 %585  ;;  %v746_v56 = vadd.f32 %v4250_v40, %v732_v51 }
 0x109   : > { %v734_v57 = vadd.f32 %v726_v52, %v674_v53  ;;  %v615_v58 = vmul.f32 %v4227_v23, %v586_v55  ;;  %v638_v59 = vpop.permute.xlu0 %637  ;;  %845 = vrot.lane.b32.xlu1 %v755_v54, %s3854_s17  ;;  %v812_v62 = vrot.slane %v755_v54, 1  ;;  %v788_v5 = vrot.slane %v755_v54, 7 }
 0x10a   : > { %v667_v60 = vmul.f32 %v4237_v29, %v638_v59  ;;  %v4261_v61 = vmax.f32 %v746_v56, 0.0 }
 0x10b   : > { %v748_v63 = vadd.f32 %v4250_v40, %v734_v57 }
 0x10c   : > { %v675_v0 = vadd.f32 %v667_v60, %v615_v58  ;;  %843 = vrot.lane.b32.xlu0 %v4261_v61, %s3854_s17  ;;  %v787_v1 = vrot.slane %v4261_v61, 7  ;;  %v698_v3 = vpop.permute.xlu1 %697  ;;  %v811_v4 = vrot.slane %v4261_v61, 1 }
 0x10d   : > { %v727_v6 = vmul.f32 %v4241_v32, %v698_v3  ;;  %v591_v7 = vpop.permute.xlu0 %590  ;;  %v756_v8 = vmax.f32 %v748_v63, 0.0 }
 0x10e   : > { %v825_v9 = vsel %vm551_vm0, %v811_v4, %v812_v62  ;;  %v4277_v10 = vsel %vm518_vm1, %v787_v1, %v788_v5  ;;  %v616_v14 = vmul.f32 %v4227_v23, %v591_v7 }
 0x10f   : > { %v735_v11 = vadd.f32 %v727_v6, %v675_v0  ;;  %3022 = vmatprep.mubr.msk.f32.mxu0 %vm867_vm4, %v825_v9  ;;  %v813_v12 = vrot.slane %v756_v8, 1  ;;  %v789_v13 = vrot.slane %v756_v8, 7 }
 0x110   : > { %847 = vrot.lane.b32.xlu0 %v756_v8, %s3854_s17  ;;  %v643_v15 = vpop.permute.xlu1 %642 }
 0x111   : > { %v668_v16 = vmul.f32 %v4237_v29, %v643_v15  ;;  %v703_v17 = vpop.permute.xlu0 %702  ;;  %v749_v19 = vadd.f32 %v4250_v40, %v735_v11  ;;  %v4286_v20 = vsel %vm551_vm0, %v812_v62, %v813_v12  ;;  %v4290_v22 = vsel %vm518_vm1, %v788_v5, %v789_v13 }
 0x112   : > { %v728_v24 = vmul.f32 %v4241_v32, %v703_v17 }
 0x113   : > { %v676_v25 = vadd.f32 %v668_v16, %v616_v14  ;;  %v757_v26 = vmax.f32 %v749_v19, 0.0 }
 0x114   : > { %v596_v27 = vpop.permute.xlu1 %595 }
 0x115   : > { %v736_v28 = vadd.f32 %v728_v24, %v676_v25  ;;  %v617_v30 = vmul.f32 %v4227_v23, %v596_v27  ;;  %v648_v31 = vpop.permute.xlu0 %647  ;;  %849 = vrot.lane.b32.xlu1 %v757_v26, %s3854_s17  ;;  %v814_v33 = vrot.slane %v757_v26, 1  ;;  %v790_v34 = vrot.slane %v757_v26, 7 }
 0x116   : > { %v669_v35 = vmul.f32 %v4237_v29, %v648_v31 }
 0x117   : > { %v750_v36 = vadd.f32 %v4250_v40, %v736_v28  ;;  %v823_v37 = vsel %vm551_vm0, %v813_v12, %v814_v33  ;;  %v4301_v38 = vsel %vm518_vm1, %v789_v13, %v790_v34 }
 0x118   : > { %v677_v39 = vadd.f32 %v669_v35, %v617_v30  ;;  %v708_v41 = vpop.permute.xlu1 %707 }
 0x119   : > { %v729_v43 = vmul.f32 %v4241_v32, %v708_v41  ;;  %v601_v44 = vpop.permute.xlu0 %600  ;;  %v758_v45 = vmax.f32 %v750_v36, 0.0 }
 0x11a   : > { %v618_v50 = vmul.f32 %v4227_v23, %v601_v44 }
 0x11b   : > { %v737_v46 = vadd.f32 %v729_v43, %v677_v39  ;;  %851 = vrot.lane.b32.xlu0 %v758_v45, %s3854_s17  ;;  %v815_v47 = vrot.slane %v758_v45, 1  ;;  %v791_v48 = vrot.slane %v758_v45, 7  ;;  %v1420_v45 = vld [vmem:[#allocation2] sm:$0xff] }
 0x11c   : > { %v653_v51 = vpop.permute.xlu1 %652 }
 0x11d   : > { %v670_v52 = vmul.f32 %v4237_v29, %v653_v51  ;;  %v713_v53 = vpop.permute.xlu0 %712  ;;  %v751_v54 = vadd.f32 %v4250_v40, %v737_v46  ;;  %v822_v55 = vsel %vm551_vm0, %v814_v33, %v815_v47  ;;  %v798_v56 = vsel %vm518_vm1, %v790_v34, %v791_v48  ;;  %v1421_v46 = vld [vmem:[#allocation2 + $0x8] sm:$0xff] }
 0x11e   : > { %v730_v57 = vmul.f32 %v4241_v32, %v713_v53  ;;  %v1425_v53 = vld [vmem:[#allocation2 + $0x28] sm:$0xff] }
 0x11f   : > { %v678_v58 = vadd.f32 %v670_v52, %v618_v50  ;;  %v759_v59 = vmax.f32 %v751_v54, 0.0  ;;  %v1423_v50 = vld [vmem:[#allocation2 + $0x18] sm:$0xff]  ;;  %v1424_v52 = vld [vmem:[#allocation2 + $0x20] sm:$0xff]  ;;  %v1426_v54 = vld [vmem:[#allocation2 + $0x30] sm:$0xff] }
 0x120   : > { %v606_v60 = vpop.permute.xlu1 %605  ;;  %v3205_v42 = vpack.c.bf16 %v1425_v53, %v1424_v52 }
 0x121   : > { %v738_v62 = vadd.f32 %v730_v57, %v678_v58  ;;  %v619_v63 = vmul.f32 %v4227_v23, %v606_v60  ;;  %v658_v0 = vpop.permute.xlu0 %657  ;;  %853 = vrot.lane.b32.xlu1 %v759_v59, %s3854_s17  ;;  %v816_v3 = vrot.slane %v759_v59, 1  ;;  %v792_v5 = vrot.slane %v759_v59, 7  ;;  %v1428_v57 = vld [vmem:[#allocation2 + $0x40] sm:$0xff]  ;;  %v1429_v58 = vld [vmem:[#allocation2 + $0x48] sm:$0xff]  ;;  %v1430_v60 = vld [vmem:[#allocation2 + $0x50] sm:$0xff] }
 0x122   : > { %v671_v6 = vmul.f32 %v4237_v29, %v658_v0  ;;  %v3211_v59 = vpack.c.bf16 %v1429_v58, %v1428_v57  ;;  %v1432_v0 = vld [vmem:[#allocation2 + $0x60] sm:$0xff] }
 0x123   : > { %v752_v7 = vadd.f32 %v4250_v40, %v738_v62  ;;  %v821_v8 = vsel %vm551_vm0, %v815_v47, %v816_v3  ;;  %v797_v9 = vsel %vm518_vm1, %v791_v48, %v792_v5  ;;  %v1422_v47 = vld [vmem:[#allocation2 + $0x10] sm:$0xff]  ;;  %v3199_v48 = vpack.c.bf16 %v1421_v46, %v1420_v45  ;;  %v1431_v62 = vld [vmem:[#allocation2 + $0x58] sm:$0xff] }
 0x124   : > { %v679_v11 = vadd.f32 %v671_v6, %v619_v63  ;;  %v718_v12 = vpop.permute.xlu1 %717  ;;  %v3202_v51 = vpack.c.bf16 %v1423_v50, %v1422_v47  ;;  %v3214_v63 = vpack.c.bf16 %v1431_v62, %v1430_v60  ;;  %v1434_v6 = vld [vmem:[#allocation2 + $0x70] sm:$0xff] }
 0x125   : > { %v731_v13 = vmul.f32 %v4241_v32, %v718_v12  ;;  %v760_v23 = vmax.f32 %v752_v7, 0.0  ;;  %v1435_v7 = vld [vmem:[#allocation2 + $0x78] sm:$0xff] }
 0x127   : > { %v739_v14 = vadd.f32 %v731_v13, %v679_v11  ;;  %855 = vrot.lane.b32.xlu0 %v760_v23, %s3854_s17  ;;  %v817_v15 = vrot.slane %v760_v23, 1  ;;  %v793_v16 = vrot.slane %v760_v23, 7  ;;  %v1437_v11 = vld [vmem:[#allocation2 + $0x88] sm:$0xff]  ;;  %v3855_v13 = vmov 1983009808  }
 0x128   : > { %v1029_v23 = vunpack.c.l.s4 %v3855_v13 }
 0x129   : > { %v753_v29 = vadd.f32 %v4250_v40, %v739_v14  ;;  %v820_v17 = vsel %vm551_vm0, %v816_v3, %v817_v15  ;;  %v796_v19 = vsel %vm518_vm1, %v792_v5, %v793_v16  ;;  %v1433_v3 = vld [vmem:[#allocation2 + $0x68] sm:$0xff]  ;;  %v1438_v14 = vld [vmem:[#allocation2 + $0x90] sm:$0xff] }
 0x12a   : > { %v3217_v5 = vpack.c.bf16 %v1433_v3, %v1432_v0 }
 0x12b   : > { %v761_v24 = vmax.f32 %v753_v29, 0.0  ;;  %v1030_v29 = vunpack.c.0.s8 %v1029_v23 }
 0x12d   : > { %857 = vrot.lane.b32.xlu1 %v761_v24, %s3854_s17  ;;  %v794_v25 = vrot.slane %v761_v24, 7  ;;  %v818_v26 = vrot.slane %v761_v24, 1  ;;  %v4376_v24 = vld [vmem:[%s4988_s4] ss:$0 sm:$0xff] }
 0x12f   : > { %v802_v32 = vsel %vm518_vm1, %v794_v25, %v787_v1  ;;  %v819_v27 = vsel %vm551_vm0, %v817_v15, %v818_v26  ;;  %v826_v40 = vsel %vm551_vm0, %v818_v26, %v811_v4  ;;  %v795_v28 = vsel %vm518_vm1, %v793_v16, %v794_v25  ;;  %v1439_v15 = vld [vmem:[#allocation2 + $0x98] sm:$0xff] }
 0x130   : > { %v803_v31 = vsel %vm502_vm2, 0.0, %v802_v32  ;;  %v3226_v16 = vpack.c.bf16 %v1439_v15, %v1438_v14 }
 0x17b   : > { %v846_v34 = vpop.permute.xlu1 %845 }
 0x17c   : > { %v869_v61 = vsel %vm867_vm4, %v4277_v10, %v846_v34 }
 0x17e   : > { %v844_v30 = vpop.permute.xlu0 %843 }
 0x17f   : > { %v868_v33 = vsel %vm867_vm4, %v803_v31, %v844_v30  ;;  %v1443_v30 = vld [vmem:[#allocation2 + $0xb8] sm:$0xff] }
 0x180   : > { %971 = vmatmul.mubr.f32.vlgmr.msra.gmra.mrb[0].mxu0 %v868_v33 }
 0x181   : > { %3023 = vmatprep.mubr.msk.f32.mxu0 %vm867_vm4, %v4286_v20  ;;  %3200 = vmatpush1.bf16.msra.mxu0 %v3199_v48 }
 0x182   : > { %v848_v1 = vpop.permute.xlu0 %847  ;;  %3201 = vmatprep.subr.bf16.mxu0 %v3853_v49 }
 0x183   : > { %v870_v4 = vsel %vm867_vm4, %v4290_v22, %v848_v1 }
 0x184   : > { %976 = vmatmul.mubr.f32.gmra.mrb[2].mxu0 %v869_v61 }
 0x185   : > { %3024 = vmatprep.mubr.msk.f32.mxu0 %vm867_vm4, %v823_v37  ;;  %3203 = vmatpush1.bf16.msra.mxu0 %v3202_v51 }
 0x186   : > { %3204 = vmatprep.subr.bf16.mxu0 %v3853_v49 }
 0x187   : > { %v850_v35 = vpop.permute.xlu1 %849 }
 0x188   : > { %981 = vmatmul.mubr.f32.gmra.mrb[4].mxu0 %v870_v4  ;;  %v871_v36 = vsel %vm867_vm4, %v4301_v38, %v850_v35  ;;  %v834_v38 = vsel %vm542_vm3, 0.0, %v826_v40 }
 0x189   : > { %3025 = vmatprep.mubr.msk.f32.mxu0 %vm867_vm4, %v822_v55  ;;  %v1427_v55 = vld [vmem:[#allocation2 + $0x38] sm:$0xff]  ;;  %3206 = vmatpush1.bf16.msra.mxu0 %v3205_v42 }
 0x18a   : > { %3207 = vmatprep.subr.bf16.mxu0 %v3853_v49 }
 0x18c   : > { %986 = vmatmul.mubr.f32.gmra.mrb[6].mxu0 %v871_v36 }
 0x18d   : > { %v852_v39 = vpop.permute.xlu0 %851  ;;  %3026 = vmatprep.mubr.msk.f32.mxu0 %vm867_vm4, %v821_v8  ;;  %v3220_v8 = vpack.c.bf16 %v1435_v7, %v1434_v6 }
 0x18e   : > { %v872_v10 = vsel %vm867_vm4, %v798_v56, %v852_v39  ;;  %v3208_v56 = vpack.c.bf16 %v1427_v55, %v1426_v54 }
 0x190   : > { %991 = vmatmul.mubr.f32.gmra.mrb[8].mxu0 %v872_v10 }
 0x191   : > { %3027 = vmatprep.mubr.msk.f32.mxu0 %vm867_vm4, %v820_v17  ;;  %3209 = vmatpush1.bf16.msra.mxu0 %v3208_v56  ;;  %v1440_v17 = vld [vmem:[#allocation2 + $0xa0] sm:$0xff] }
 0x192   : > { %3210 = vmatprep.subr.bf16.mxu0 %v3853_v49 }
 0x193   : > { %v854_v20 = vpop.permute.xlu1 %853 }
 0x194   : > { %v873_v37 = vsel %vm867_vm4, %v797_v9, %v854_v20  ;;  %v1436_v9 = vld [vmem:[#allocation2 + $0x80] sm:$0xff] }
 0x195   : > { %996 = vmatmul.mubr.f32.gmra.mrb[10].mxu0 %v873_v37  ;;  %v3223_v12 = vpack.c.bf16 %v1437_v11, %v1436_v9 }
 0x196   : > { %3028 = vmatprep.mubr.msk.f32.mxu0 %vm867_vm4, %v819_v27  ;;  %3212 = vmatpush1.bf16.msra.mxu0 %v3211_v59  ;;  %v4380_v27 = vsub.s32 %v1030_v29, %v4076_v2 }
 0x197   : > { %3213 = vmatprep.subr.bf16.mxu0 %v3853_v49 }
 0x199   : > { %v856_v22 = vpop.permute.xlu0 %855 }
 0x19a   : > { %v874_v41 = vsel %vm867_vm4, %v796_v19, %v856_v22  ;;  %3215 = vmatpush1.bf16.msra.mxu0 %v3214_v63  ;;  %v1441_v19 = vld [vmem:[#allocation2 + $0xa8] sm:$0xff] }
 0x19b   : > { %1001 = vmatmul.mubr.f32.gmra.mrb[12].mxu0 %v874_v41  ;;  %3216 = vmatprep.subr.bf16.mxu0 %v3853_v49  ;;  %v3229_v26 = vpack.c.bf16 %v1441_v19, %v1440_v17 }
 0x19c   : > { %3029 = vmatprep.mubr.msk.f32.mxu0 %vm867_vm4, %v834_v38 }
 0x19e   : > { %3218 = vmatpush1.bf16.msra.mxu0 %v3217_v5 }
 0x19f   : > { %v858_v43 = vpop.permute.xlu1 %857  ;;  %3219 = vmatprep.subr.bf16.mxu0 %v3853_v49 }
 0x1a0   : > { %v875_v44 = vsel %vm867_vm4, %v795_v28, %v858_v43  ;;  %v1442_v28 = vld [vmem:[#allocation2 + $0xb0] sm:$0xff] }
 0x1a1   : > { %1006 = vmatmul.mubr.f32.gmra.mrb[14].mxu0 %v875_v44  ;;  %v3232_v34 = vpack.c.bf16 %v1443_v30, %v1442_v28 }
 0x1a2   : > { %3221 = vmatpush1.bf16.msra.mxu0 %v3220_v8 }
 0x1a3   : > { %3222 = vmatprep.subr.bf16.mxu0 %v3853_v49 }
 0x1a6   : > { %3224 = vmatpush1.bf16.msra.mxu0 %v3223_v12 }
 0x1a7   : > { %3225 = vmatprep.subr.bf16.mxu0 %v3853_v49 }
 0x1aa   : > { %3227 = vmatpush1.bf16.msra.mxu0 %v3226_v16 }
 0x1ab   : > { %3228 = vmatprep.subr.bf16.mxu0 %v3853_v49 }
 0x1ae   : > { %3230 = vmatpush1.bf16.msra.mxu0 %v3229_v26 }
 0x1af   : > { %3231 = vmatprep.subr.bf16.mxu0 %v3853_v49 }
 0x1b2   : > { %3233 = vmatpush1.bf16.msra.mxu0 %v3232_v34 }
 0x253   : > { %v972_v25 = vpop.f32.mrb[0].mxu0 }
 0x254   : > { %v973_v32 = vadd.f32 %v4376_v24, %v972_v25  ;;  %v974_v40 = vpop.f32.mrb[1].mxu0 }
 0x256   : > { %v1011_v31 = vmax.f32 %v973_v32, 0.0 }
 0x257   : > { %v977_v33 = vpop.f32.mrb[2].mxu0 }
 0x258   : > { %v1027_v61 = vcombine.high %v1011_v31, %v1011_v31  ;;  %v1034_v1 = vrot.slane %v1011_v31, %v4380_v27  ;;  %v978_v4 = vadd.f32 %v4376_v24, %v977_v33  ;;  %v979_v35 = vpop.f32.mrb[3].mxu0 }
 0x25a   : > { %v1041_v36 = vrot.slane %v1027_v61, %v4380_v27  ;;  %v1042_v39 = vcombine.high %v1034_v1, %v1034_v1  ;;  %v1196_v10 = vsel %vm1195_vm5, %v1034_v1, -inf  ;;  %v1012_v20 = vmax.f32 %v978_v4, 0.0 }
 0x25b   : > { %v1197_v37 = vrot.slane %v1196_v10, 4  ;;  %v982_v22 = vpop.f32.mrb[4].mxu0 }
 0x25c   : > { %v1043_v41 = vcombine.high %v1041_v36, %v1041_v36  ;;  %v1203_v38 = vsel %vm1195_vm5, %v1042_v39, -inf  ;;  %v1210_v43 = vsel %vm1195_vm5, %v1041_v36, -inf  ;;  %v1044_v44 = vcombine.high %v1012_v20, %v1012_v20  ;;  %v984_v45 = vpop.f32.mrb[5].mxu0 }
 0x25d   : > { %v1198_v46 = vmax.f32 %v1196_v10, %v1197_v37  ;;  %v1204_v47 = vrot.slane %v1203_v38, 4  ;;  %v1211_v48 = vrot.slane %v1210_v43, 4  ;;  %v1051_v49 = vrot.slane %v1012_v20, %v4380_v27 }
 0x25e   : > { %v1217_v50 = vsel %vm1195_vm5, %v1043_v41, -inf  ;;  %v1058_v51 = vrot.slane %v1044_v44, %v4380_v27  ;;  %v983_v52 = vadd.f32 %v4376_v24, %v982_v22 }
 0x25f   : > { %v1199_v53 = vrot.slane %v1198_v46, 2  ;;  %v1205_v42 = vmax.f32 %v1203_v38, %v1204_v47  ;;  %v1212_v54 = vmax.f32 %v1210_v43, %v1211_v48  ;;  %v1218_v55 = vrot.slane %v1217_v50, 4  ;;  %v987_v56 = vpop.f32.mrb[6].mxu0 }
 0x260   : > { %v1059_v57 = vcombine.high %v1051_v49, %v1051_v49  ;;  %v1060_v58 = vcombine.high %v1058_v51, %v1058_v51  ;;  %v1224_v59 = vsel %vm1195_vm5, %v1051_v49, -inf  ;;  %v1238_v60 = vsel %vm1195_vm5, %v1058_v51, -inf  ;;  %v989_v62 = vpop.f32.mrb[7].mxu0 }
 0x261   : > { %v1200_v63 = vmax.f32 %v1198_v46, %v1199_v53  ;;  %v1206_v0 = vrot.slane %v1205_v42, 2  ;;  %v1213_v3 = vrot.slane %v1212_v54, 2  ;;  %v1219_v5 = vmax.f32 %v1217_v50, %v1218_v55 }
 0x262   : > { %v1225_v6 = vrot.slane %v1224_v59, 4  ;;  %v1231_v7 = vsel %vm1195_vm5, %v1059_v57, -inf  ;;  %v1239_v8 = vrot.slane %v1238_v60, 4  ;;  %v1245_v9 = vsel %vm1195_vm5, %v1060_v58, -inf }
 0x263   : > { %v1201_v11 = vrot.slane %v1200_v63, 1  ;;  %v1207_v12 = vmax.f32 %v1205_v42, %v1206_v0  ;;  %v1214_v13 = vmax.f32 %v1212_v54, %v1213_v3  ;;  %v1220_v23 = vrot.slane %v1219_v5, 2  ;;  %v992_v14 = vpop.f32.mrb[8].mxu0 }
 0x264   : > { %v1226_v15 = vmax.f32 %v1224_v59, %v1225_v6  ;;  %v1232_v16 = vrot.slane %v1231_v7, 4  ;;  %v1240_v29 = vmax.f32 %v1238_v60, %v1239_v8  ;;  %v1246_v17 = vrot.slane %v1245_v9, 4  ;;  %v994_v19 = vpop.f32.mrb[9].mxu0 }
 0x265   : > { %v1202_v25 = vmax.f32 %v1200_v63, %v1201_v11  ;;  %v1208_v26 = vrot.slane %v1207_v12, 1  ;;  %v1215_v32 = vrot.slane %v1214_v13, 1  ;;  %v1221_v40 = vmax.f32 %v1219_v5, %v1220_v23 }
 0x266   : > { %v1227_v28 = vrot.slane %v1226_v15, 2  ;;  %v1233_v30 = vmax.f32 %v1231_v7, %v1232_v16  ;;  %v1241_v31 = vrot.slane %v1240_v29, 2  ;;  %v4398_v33 = vmax.f32 %v1245_v9, %v1246_v17 }
 0x267   : > { %v1209_v34 = vmax.f32 %v1207_v12, %v1208_v26  ;;  %v4400_v61 = vmax.f32 %v1214_v13, %v1215_v32  ;;  %v1222_v1 = vrot.slane %v1221_v40, 1  ;;  %v1013_v4 = vmax.f32 %v983_v52, 0.0 }
 0x268   : > { %v1228_v35 = vmax.f32 %v1226_v15, %v1227_v28  ;;  %v1234_v36 = vrot.slane %v1233_v30, 2  ;;  %v4402_v39 = vmax.f32 %v1240_v29, %v1241_v31  ;;  %v988_v10 = vadd.f32 %v4376_v24, %v987_v56  ;;  %v997_v20 = vpop.f32.mrb[10].mxu0 }
 0x269   : > { %v4405_v37 = vmax.f32 %v1221_v40, %v1222_v1  ;;  %v4408_v22 = vsel %vm1477_vm6, %v1209_v34, %v1202_v25  ;;  %v1061_v41 = vcombine.high %v1013_v4, %v1013_v4  ;;  %v1068_v38 = vrot.slane %v1013_v4, %v4380_v27  ;;  %v999_v43 = vpop.f32.mrb[11].mxu0 }
 0x26a   : > { %v1229_v44 = vrot.slane %v1228_v35, 1  ;;  %v4411_v45 = vmax.f32 %v1233_v30, %v1234_v36  ;;  %v1014_v46 = vmax.f32 %v988_v10, 0.0  ;;  %v993_v47 = vadd.f32 %v4376_v24, %v992_v14 }
 0x26b   : > { %v1075_v48 = vrot.slane %v1061_v41, %v4380_v27  ;;  %v1076_v49 = vcombine.high %v1068_v38, %v1068_v38  ;;  %v1252_v50 = vsel %vm1195_vm5, %v1068_v38, -inf  ;;  %v4417_v51 = vadd.f32 %v4376_v24, %v997_v20 }
 0x26c   : > { %v4419_v52 = vmax.f32 %v1228_v35, %v1229_v44  ;;  %v1236_v53 = vrot.slane %v4411_v45, 1  ;;  %v1253_v42 = vrot.slane %v1252_v50, 4  ;;  %v1078_v54 = vcombine.high %v1014_v46, %v1014_v46 }
 0x26d   : > { %v1077_v55 = vcombine.high %v1075_v48, %v1075_v48  ;;  %v1259_v56 = vsel %vm1195_vm5, %v1076_v49, -inf  ;;  %v1266_v57 = vsel %vm1195_vm5, %v1075_v48, -inf  ;;  %v1085_v58 = vrot.slane %v1014_v46, %v4380_v27 }
 0x26e   : > { %v1254_v59 = vmax.f32 %v1252_v50, %v1253_v42  ;;  %v1260_v60 = vrot.slane %v1259_v56, 4  ;;  %v1267_v62 = vrot.slane %v1266_v57, 4  ;;  %v1092_v63 = vrot.slane %v1078_v54, %v4380_v27  ;;  %v4426_v0 = vpop.f32.mrb[12].mxu0 }
 0x26f   : > { %v1273_v3 = vsel %vm1195_vm5, %v1077_v55, -inf  ;;  %v1093_v5 = vcombine.high %v1085_v58, %v1085_v58  ;;  %v1280_v6 = vsel %vm1195_vm5, %v1085_v58, -inf  ;;  %v1015_v7 = vmax.f32 %v993_v47, 0.0  ;;  %v1004_v8 = vpop.f32.mrb[13].mxu0 }
 0x270   : > { %v1255_v9 = vrot.slane %v1254_v59, 2  ;;  %v1261_v11 = vmax.f32 %v1259_v56, %v1260_v60  ;;  %v1268_v12 = vmax.f32 %v1266_v57, %v1267_v62  ;;  %v1274_v13 = vrot.slane %v1273_v3, 4 }
 0x271   : > { %v1094_v23 = vcombine.high %v1092_v63, %v1092_v63  ;;  %v1281_v14 = vrot.slane %v1280_v6, 4  ;;  %v1287_v15 = vsel %vm1195_vm5, %v1093_v5, -inf  ;;  %v1294_v16 = vsel %vm1195_vm5, %v1092_v63, -inf }
 0x272   : > { %v1256_v29 = vmax.f32 %v1254_v59, %v1255_v9  ;;  %v1262_v17 = vrot.slane %v1261_v11, 2  ;;  %v1269_v19 = vrot.slane %v1268_v12, 2  ;;  %v1275_v25 = vmax.f32 %v1273_v3, %v1274_v13 }
 0x273   : > { %v1282_v26 = vmax.f32 %v1280_v6, %v1281_v14  ;;  %v1288_v32 = vrot.slane %v1287_v15, 4  ;;  %v1295_v40 = vrot.slane %v1294_v16, 4  ;;  %v1301_v28 = vsel %vm1195_vm5, %v1094_v23, -inf }
 0x274   : > { %v1257_v30 = vrot.slane %v1256_v29, 1  ;;  %v1263_v31 = vmax.f32 %v1261_v11, %v1262_v17  ;;  %v1270_v34 = vmax.f32 %v1268_v12, %v1269_v19  ;;  %v1276_v1 = vrot.slane %v1275_v25, 2  ;;  %v4433_v4 = vpop.f32.mrb[14].mxu0 }
 0x275   : > { %v1283_v35 = vrot.slane %v1282_v26, 2  ;;  %v1289_v36 = vmax.f32 %v1287_v15, %v1288_v32  ;;  %v1296_v10 = vmax.f32 %v1294_v16, %v1295_v40  ;;  %v1302_v20 = vrot.slane %v1301_v28, 4  ;;  %v1009_v41 = vpop.f32.mrb[15].mxu0 }
 0x276   : > { %v1258_v38 = vmax.f32 %v1256_v29, %v1257_v30  ;;  %v1264_v43 = vrot.slane %v1263_v31, 1  ;;  %v1271_v44 = vrot.slane %v1270_v34, 1  ;;  %v1277_v46 = vmax.f32 %v1275_v25, %v1276_v1 }
 0x277   : > { %v1284_v47 = vmax.f32 %v1282_v26, %v1283_v35  ;;  %v1290_v48 = vrot.slane %v1289_v36, 2  ;;  %v1297_v49 = vrot.slane %v1296_v10, 2  ;;  %v4435_v50 = vmax.f32 %v1301_v28, %v1302_v20 }
 0x278   : > { %v1265_v42 = vmax.f32 %v1263_v31, %v1264_v43  ;;  %v4437_v54 = vmax.f32 %v1270_v34, %v1271_v44  ;;  %v1278_v55 = vrot.slane %v1277_v46, 1  ;;  %v1095_v56 = vcombine.high %v1015_v7, %v1015_v7 }
 0x279   : > { %v1285_v57 = vrot.slane %v1284_v47, 1  ;;  %v4439_v58 = vmax.f32 %v1289_v36, %v1290_v48  ;;  %v4441_v59 = vmax.f32 %v1296_v10, %v1297_v49  ;;  %v1102_v60 = vrot.slane %v1015_v7, %v4380_v27 }
 0x27a   : > { %v4444_v62 = vmax.f32 %v1277_v46, %v1278_v55  ;;  %v4447_v63 = vsel %vm1477_vm6, %v1265_v42, %v1258_v38  ;;  %v1109_v3 = vrot.slane %v1095_v56, %v4380_v27  ;;  %v1016_v5 = vmax.f32 %v4417_v51, 0.0 }
 0x27b   : > { %v4451_v6 = vmax.f32 %v1284_v47, %v1285_v57  ;;  %v1292_v8 = vrot.slane %v4439_v58, 1  ;;  %v1110_v9 = vcombine.high %v1102_v60, %v1102_v60  ;;  %v1308_v11 = vsel %vm1195_vm5, %v1102_v60, -inf }
 0x27c   : > { %v1111_v12 = vcombine.high %v1109_v3, %v1109_v3  ;;  %v1309_v13 = vrot.slane %v1308_v11, 4  ;;  %v1322_v7 = vsel %vm1195_vm5, %v1109_v3, -inf  ;;  %v1112_v23 = vcombine.high %v1016_v5, %v1016_v5 }
 0x27d   : > { %v1315_v14 = vsel %vm1195_vm5, %v1110_v9, -inf  ;;  %v1323_v15 = vrot.slane %v1322_v7, 4  ;;  %v1119_v16 = vrot.slane %v1016_v5, %v4380_v27  ;;  %v1003_v51 = vadd.f32 %v4376_v24, %v4426_v0 }
 0x27e   : > { %v1310_v29 = vmax.f32 %v1308_v11, %v1309_v13  ;;  %v1316_v17 = vrot.slane %v1315_v14, 4  ;;  %v1329_v19 = vsel %vm1195_vm5, %v1111_v12, -inf  ;;  %v1126_v25 = vrot.slane %v1112_v23, %v4380_v27 }
 0x27f   : > { %v1324_v26 = vmax.f32 %v1322_v7, %v1323_v15  ;;  %v1330_v32 = vrot.slane %v1329_v19, 4  ;;  %v1127_v40 = vcombine.high %v1119_v16, %v1119_v16  ;;  %v1336_v28 = vsel %vm1195_vm5, %v1119_v16, -inf }
 0x280   : > { %v1311_v30 = vrot.slane %v1310_v29, 2  ;;  %v1317_v31 = vmax.f32 %v1315_v14, %v1316_v17  ;;  %v1128_v34 = vcombine.high %v1126_v25, %v1126_v25  ;;  %v1337_v1 = vrot.slane %v1336_v28, 4 }
 0x281   : > { %v1325_v35 = vrot.slane %v1324_v26, 2  ;;  %v1331_v36 = vmax.f32 %v1329_v19, %v1330_v32  ;;  %v1343_v0 = vsel %vm1195_vm5, %v1127_v40, -inf  ;;  %v1350_v10 = vsel %vm1195_vm5, %v1126_v25, -inf }
 0x282   : > { %v1312_v20 = vmax.f32 %v1310_v29, %v1311_v30  ;;  %v1318_v41 = vrot.slane %v1317_v31, 2  ;;  %v1338_v38 = vmax.f32 %v1336_v28, %v1337_v1  ;;  %v1344_v43 = vrot.slane %v1343_v0, 4 }
 0x283   : > { %v1326_v44 = vmax.f32 %v1324_v26, %v1325_v35  ;;  %v1332_v46 = vrot.slane %v1331_v36, 2  ;;  %v1351_v47 = vrot.slane %v1350_v10, 4  ;;  %v1357_v48 = vsel %vm1195_vm5, %v1128_v34, -inf }
 0x284   : > { %v1313_v49 = vrot.slane %v1312_v20, 1  ;;  %v1319_v42 = vmax.f32 %v1317_v31, %v1318_v41  ;;  %v1339_v55 = vrot.slane %v1338_v38, 2  ;;  %v1345_v56 = vmax.f32 %v1343_v0, %v1344_v43 }
 0x285   : > { %v1327_v57 = vrot.slane %v1326_v44, 1  ;;  %v1333_v60 = vmax.f32 %v1331_v36, %v1332_v46  ;;  %v1352_v3 = vmax.f32 %v1350_v10, %v1351_v47  ;;  %v1358_v5 = vrot.slane %v1357_v48, 4 }
 0x286   : > { %v1314_v9 = vmax.f32 %v1312_v20, %v1313_v49  ;;  %v1320_v11 = vrot.slane %v1319_v42, 1  ;;  %v1340_v12 = vmax.f32 %v1338_v38, %v1339_v55  ;;  %v1346_v13 = vrot.slane %v1345_v56, 2 }
 0x287   : > { %v4466_v7 = vmax.f32 %v1326_v44, %v1327_v57  ;;  %v1334_v23 = vrot.slane %v1333_v60, 1  ;;  %v1353_v14 = vrot.slane %v1352_v3, 2  ;;  %v4468_v15 = vmax.f32 %v1357_v48, %v1358_v5 }
 0x288   : > { %v1321_v16 = vmax.f32 %v1319_v42, %v1320_v11  ;;  %v1341_v29 = vrot.slane %v1340_v12, 1  ;;  %v4470_v17 = vmax.f32 %v1345_v56, %v1346_v13  ;;  %v1017_v19 = vmax.f32 %v1003_v51, 0.0 }
 0x289   : > { %v4472_v25 = vmax.f32 %v1333_v60, %v1334_v23  ;;  %v4474_v26 = vmax.f32 %v1352_v3, %v1353_v14  ;;  %v1237_v32 = vmax.f32 %v4411_v45, %v1236_v53  ;;  %v1243_v40 = vrot.slane %v4402_v39, 1 }
 0x28a   : > { %v4481_v28 = vsel %vm1477_vm6, %v1321_v16, %v1314_v9  ;;  %v4483_v30 = vmax.f32 %v1340_v12, %v1341_v29  ;;  %v1348_v31 = vrot.slane %v4470_v17, 1  ;;  %v1129_v34 = vcombine.high %v1017_v19, %v1017_v19 }
 0x28b   : > { %v1136_v51 = vrot.slane %v1017_v19, %v4380_v27  ;;  %v1244_v1 = vmax.f32 %v4402_v39, %v1243_v40  ;;  %v1248_v35 = vrot.slane %v4398_v33, 2  ;;  %v1480_v45 = vsel %vm1479_vm7, %v4400_v61, %v4408_v22 }
 0x28c   : > { %v1143_v53 = vrot.slane %v1129_v34, %v4380_v27  ;;  %v1482_v36 = vsel %vm1481_vm8, %v4405_v37, %v1480_v45  ;;  %v1008_v0 = vadd.f32 %v4376_v24, %v4433_v4  ;;  %v4500_v10 = vmax.f32 %v4439_v58, %v1292_v8 }
 0x28d   : > { %v1144_v39 = vcombine.high %v1136_v51, %v1136_v51  ;;  %v1364_v20 = vsel %vm1195_vm5, %v1136_v51, -inf  ;;  %v1249_v41 = vmax.f32 %v4398_v33, %v1248_v35  ;;  %v1484_v61 = vsel %vm1483_vm9, %v4419_v52, %v1482_v36 }
 0x28e   : > { %v1145_v22 = vcombine.high %v1143_v53, %v1143_v53  ;;  %v1365_v38 = vrot.slane %v1364_v20, 4  ;;  %v1378_v37 = vsel %vm1195_vm5, %v1143_v53, -inf  ;;  %v1486_v43 = vsel %vm1485_vm10, %v1237_v32, %v1484_v61 }
 0x28f   : > { %v1371_v24 = vsel %vm1195_vm5, %v1144_v39, -inf  ;;  %v1379_v4 = vrot.slane %v1378_v37, 4  ;;  %v1250_v44 = vrot.slane %v1249_v41, 1  ;;  %v1488_v58 = vsel %vm1487_vm11, %v1244_v1, %v1486_v43 }
 0x290   : > { %v1366_v8 = vmax.f32 %v1364_v20, %v1365_v38  ;;  %v1372_v46 = vrot.slane %v1371_v24, 4  ;;  %v1385_v47 = vsel %vm1195_vm5, %v1145_v22, -inf  ;;  %v1018_v33 = vmax.f32 %v1008_v0, 0.0 }
 0x291   : > { %v1380_v48 = vmax.f32 %v1378_v37, %v1379_v4  ;;  %v1386_v49 = vrot.slane %v1385_v47, 4  ;;  %v1251_v52 = vmax.f32 %v1249_v41, %v1250_v44  ;;  %v1299_v42 = vrot.slane %v4441_v59, 1 }
 0x292   : > { %v1367_v55 = vrot.slane %v1366_v8, 2  ;;  %v1373_v56 = vmax.f32 %v1371_v24, %v1372_v46  ;;  %v1146_v57 = vcombine.high %v1018_v33, %v1018_v33  ;;  %v1153_v60 = vrot.slane %v1018_v33, %v4380_v27 }
 0x293   : > { %v1381_v3 = vrot.slane %v1380_v48, 2  ;;  %v1387_v5 = vmax.f32 %v1385_v47, %v1386_v49  ;;  %v4514_v9 = vsel %vm1489_vm12, %v1251_v52, %v1488_v58  ;;  %v1300_v11 = vmax.f32 %v4441_v59, %v1299_v42 }
 0x294   : > { %v1368_v12 = vmax.f32 %v1366_v8, %v1367_v55  ;;  %v1374_v13 = vrot.slane %v1373_v56, 2  ;;  %1544 = vrot.lane.b32.xlu0 %v4514_v9, %s3854_s17  ;;  %v1516_v23 = vrot.slane %v4514_v9, 7  ;;  %v1532_v14 = vrot.slane %v4514_v9, 1 }
 0x295   : > { %v1382_v16 = vmax.f32 %v1380_v48, %v1381_v3  ;;  %v1388_v29 = vrot.slane %v1387_v5, 2  ;;  %v1160_v19 = vrot.slane %v1146_v57, %v4380_v27  ;;  %v1161_v32 = vcombine.high %v1153_v60, %v1153_v60 }
 0x296   : > { %v1369_v40 = vrot.slane %v1368_v12, 1  ;;  %v1375_v34 = vmax.f32 %v1373_v56, %v1374_v13  ;;  %v1392_v51 = vsel %vm1195_vm5, %v1153_v60, -inf  ;;  %v1304_v59 = vrot.slane %v4435_v50, 2 }
 0x297   : > { %v1383_v1 = vrot.slane %v1382_v16, 1  ;;  %v1389_v35 = vmax.f32 %v1387_v5, %v1388_v29  ;;  %v1162_v45 = vcombine.high %v1160_v19, %v1160_v19  ;;  %v1393_v53 = vrot.slane %v1392_v51, 4 }
 0x298   : > { %v1370_v36 = vmax.f32 %v1368_v12, %v1369_v40  ;;  %v1376_v0 = vrot.slane %v1375_v34, 1  ;;  %v1399_v39 = vsel %vm1195_vm5, %v1161_v32, -inf  ;;  %v1406_v20 = vsel %vm1195_vm5, %v1160_v19, -inf }
 0x299   : > { %v1384_v41 = vmax.f32 %v1382_v16, %v1383_v1  ;;  %v1390_v61 = vrot.slane %v1389_v35, 1  ;;  %v1394_v22 = vmax.f32 %v1392_v51, %v1393_v53  ;;  %v1400_v38 = vrot.slane %v1399_v39, 4 }
 0x29a   : > { %v1377_v37 = vmax.f32 %v1375_v34, %v1376_v0  ;;  %v1407_v43 = vrot.slane %v1406_v20, 4  ;;  %v1413_v24 = vsel %vm1195_vm5, %v1162_v45, -inf  ;;  %v1305_v4 = vmax.f32 %v4435_v50, %v1304_v59  ;;  %v1699_v59 = vld [vmem:[%s4991_s7 + $0x100] sm:$0xff]  ;;  %v1702_v45 = vld [vmem:[%s4991_s7 + $0x118] sm:$0xff] }
 0x29b   : > { %v1391_v44 = vmax.f32 %v1389_v35, %v1390_v61  ;;  %v1395_v58 = vrot.slane %v1394_v22, 2  ;;  %v1401_v8 = vmax.f32 %v1399_v39, %v1400_v38  ;;  %v1414_v46 = vrot.slane %v1413_v24, 4  ;;  %v1701_v35 = vld [vmem:[%s4991_s7 + $0x110] sm:$0xff] }
 0x29c   : > { %v1505_v47 = vsel %vm1477_vm6, %v1377_v37, %v1370_v36  ;;  %v1408_v33 = vmax.f32 %v1406_v20, %v1407_v43  ;;  %v1306_v48 = vrot.slane %v1305_v4, 1  ;;  %v1492_v49 = vsel %vm1479_vm7, %v4437_v54, %v4447_v63 }
 0x29d   : > { %v1396_v52 = vmax.f32 %v1394_v22, %v1395_v58  ;;  %v1402_v42 = vrot.slane %v1401_v8, 2  ;;  %v1415_v55 = vmax.f32 %v1413_v24, %v1414_v46  ;;  %v1493_v56 = vsel %vm1481_vm8, %v4444_v62, %v1492_v49 }
 0x29e   : > { %v1409_v57 = vrot.slane %v1408_v33, 2  ;;  %v1307_v50 = vmax.f32 %v1305_v4, %v1306_v48  ;;  %v1494_v60 = vsel %vm1483_vm9, %v4451_v6, %v1493_v56  ;;  %v1349_v3 = vmax.f32 %v4470_v17, %v1348_v31 }
 0x29f   : > { %v1397_v5 = vrot.slane %v1396_v52, 1  ;;  %v1403_v12 = vmax.f32 %v1401_v8, %v1402_v42  ;;  %v1495_v54 = vsel %vm1485_vm10, %v4500_v10, %v1494_v60  ;;  %v1355_v63 = vrot.slane %v4474_v26, 1 }
 0x2a0   : > { %v1410_v13 = vmax.f32 %v1408_v33, %v1409_v57  ;;  %v1496_v16 = vsel %vm1487_vm11, %v1300_v11, %v1495_v54  ;;  %v1360_v62 = vrot.slane %v4468_v15, 2  ;;  %v1499_v6 = vsel %vm1479_vm7, %v4466_v7, %v4481_v28 }
 0x2a1   : > { %v1398_v29 = vmax.f32 %v1396_v52, %v1397_v5  ;;  %v1404_v19 = vrot.slane %v1403_v12, 1  ;;  %v1497_v17 = vsel %vm1489_vm12, %v1307_v50, %v1496_v16  ;;  %v1356_v31 = vmax.f32 %v4474_v26, %v1355_v63  ;;  %v1700_v26 = vld [vmem:[%s4991_s7 + $0x108] sm:$0xff] }
 0x2a2   : > { %1546 = vrot.lane.b32.xlu1 %v1497_v17, %s3854_s17  ;;  %v1517_v10 = vrot.slane %v1497_v17, 7  ;;  %v1533_v32 = vrot.slane %v1497_v17, 1  ;;  %v1361_v40 = vmax.f32 %v4468_v15, %v1360_v62  ;;  %v1500_v11 = vsel %vm1481_vm8, %v4472_v25, %v1499_v6  ;;  %v1704_v16 = vld [vmem:[%s4991_s7 + $0x128] sm:$0xff]  ;;  %v1683_v62 = vld [vmem:[%s4991_s7 + $0x80] sm:$0xff]  ;;  %v1706_v17 = vld [vmem:[%s4991_s7 + $0x138] sm:$0xff] }
 0x2a3   : > { %v1501_v34 = vsel %vm1483_vm9, %v4483_v30, %v1500_v11  ;;  %v1405_v51 = vmax.f32 %v1403_v12, %v1404_v19  ;;  %v1411_v7 = vrot.slane %v1410_v13, 1  ;;  %v1416_v28 = vrot.slane %v1415_v55, 2  ;;  %v1705_v19 = vld [vmem:[%s4991_s7 + $0x130] sm:$0xff] }
 0x2a4   : > { %v1538_v15 = vsel %vm551_vm0, %v1532_v14, %v1533_v32  ;;  %v1362_v25 = vrot.slane %v1361_v40, 1  ;;  %v1502_v1 = vsel %vm1485_vm10, %v1349_v3, %v1501_v34  ;;  %v1506_v30 = vsel %vm1479_vm7, %v1384_v41, %v1505_v47  ;;  %v1685_v34 = vld [vmem:[%s4991_s7 + $0x90] sm:$0xff] }
 0x2a5   : > { %3031 = vmatprep.mubr.msk.f32.mxu0 %vm867_vm4, %v1538_v15  ;;  %v1503_v53 = vsel %vm1487_vm11, %v1356_v31, %v1502_v1  ;;  %v1412_v36 = vmax.f32 %v1410_v13, %v1411_v7  ;;  %v1417_v0 = vmax.f32 %v1415_v55, %v1416_v28  ;;  %v1507_v39 = vsel %vm1481_vm8, %v1391_v44, %v1506_v30  ;;  %v1703_v13 = vld [vmem:[%s4991_s7 + $0x120] sm:$0xff]  ;;  %v1670_v15 = vld [vmem:[%s4991_s7 + $0x18] sm:$0xff] }
 0x2a6   : > { %v1363_v20 = vmax.f32 %v1361_v40, %v1362_v25  ;;  %v1508_v61 = vsel %vm1483_vm9, %v1398_v29, %v1507_v39  ;;  %v1522_v41 = vsel %vm518_vm1, %v1516_v23, %v1517_v10  ;;  %v3266_v22 = vpack.c.bf16 %v1700_v26, %v1699_v59  ;;  %v1684_v29 = vld [vmem:[%s4991_s7 + $0x88] sm:$0xff]  ;;  %v1707_v7 = vld [vmem:[%s4991_s7 + $0x140] sm:$0xff]  ;;  %v1669_v26 = vld [vmem:[%s4991_s7 + $0x10] sm:$0xff] }
 0x2a7   : > { %v1418_v38 = vrot.slane %v1417_v0, 1  ;;  %v1509_v37 = vsel %vm1485_vm10, %v1405_v51, %v1508_v61  ;;  %v3270_v43 = vpack.c.bf16 %v1702_v45, %v1701_v35  ;;  %v4609_v9 = vadd.s32 24, %v4076_v2  ;;  %v1668_v40 = vld [vmem:[%s4991_s7 + $0x8] sm:$0xff]  ;;  %v1686_v51 = vld [vmem:[%s4991_s7 + $0x98] sm:$0xff]  ;;  %v1687_v30 = vld [vmem:[%s4991_s7 + $0xa0] sm:$0xff] }
 0x2a8   : > { %v1504_v24 = vsel %vm1489_vm12, %v1363_v20, %v1503_v53  ;;  %v1510_v4 = vsel %vm1487_vm11, %v1412_v36, %v1509_v37  ;;  %3267 = vmatprep.subr.bf16.mxu1 %v3266_v22  ;;  %v3274_v6 = vpack.c.bf16 %v1704_v16, %v1703_v13  ;;  %v3234_v31 = vpack.c.bf16 %v1684_v29, %v1683_v62  ;;  %v1708_v59 = vld [vmem:[%s4991_s7 + $0x148] sm:$0xff]  ;;  %v1709_v45 = vld [vmem:[%s4991_s7 + $0x150] sm:$0xff]  ;;  %v1710_v36 = vld [vmem:[%s4991_s7 + $0x158] sm:$0xff] }
 0x2a9   : > { %1548 = vrot.lane.b32.xlu0 %v1504_v24, %s3854_s17  ;;  %v1518_v44 = vrot.slane %v1504_v24, 7  ;;  %v1534_v58 = vrot.slane %v1504_v24, 1  ;;  %v1419_v8 = vmax.f32 %v1417_v0, %v1418_v38  ;;  %3269 = vmatpush3.bf16.msra.mxu1 %v3266_v22  ;;  %vm1531_vm13 = vcmp.eq.s32.totalorder %v4609_v9, 31  ;;  %v1688_v35 = vld [vmem:[%s4991_s7 + $0xa8] sm:$0xff]  ;;  %v1671_v0 = vld [vmem:[%s4991_s7 + $0x20] sm:$0xff]  ;;  %v1690_v22 = vld [vmem:[%s4991_s7 + $0xb8] sm:$0xff] }
 0x2aa   : > { %3271 = vmatprep.subr.bf16.mxu1 %v3270_v43  ;;  %3235 = vmatprep.subr.bf16.mxu0 %v3234_v31  ;;  %v3238_v28 = vpack.c.bf16 %v1686_v51, %v1685_v34  ;;  %v3282_v25 = vpack.c.bf16 %v1708_v59, %v1707_v7  ;;  %v3240_v1 = vpack.c.bf16 %v1670_v15, %v1669_v26  ;;  %v1672_v39 = vld [vmem:[%s4991_s7 + $0x28] sm:$0xff]  ;;  %v1711_v38 = vld [vmem:[%s4991_s7 + $0x160] sm:$0xff]  ;;  %v1673_v24 = vld [vmem:[%s4991_s7 + $0x30] sm:$0xff] }
 0x2ab   : > { %v1511_v46 = vsel %vm1489_vm12, %v1419_v8, %v1510_v4  ;;  %v1537_v47 = vsel %vm551_vm0, %v1533_v32, %v1534_v58  ;;  %v1521_v33 = vsel %vm518_vm1, %v1517_v10, %v1518_v44  ;;  %v3278_v10 = vpack.c.bf16 %v1706_v17, %v1705_v19  ;;  %v1667_v32 = vld [vmem:[%s4991_s7] sm:$0xff]  ;;  %v1674_v4 = vld [vmem:[%s4991_s7 + $0x38] sm:$0xff]  ;;  %v1697_v13 = vld [vmem:[%s4991_s7 + $0xf0] sm:$0xff] }
 0x2ac   : > { %1550 = vrot.lane.b32.xlu1 %v1511_v46, %s3854_s17  ;;  %v1519_v48 = vrot.slane %v1511_v46, 7  ;;  %v1535_v49 = vrot.slane %v1511_v46, 1  ;;  %v3236_v11 = vpack.c.bf16 %v1668_v40, %v1667_v32  ;;  %v3242_v53 = vpack.c.bf16 %v1688_v35, %v1687_v30  ;;  %v1691_v8 = vld [vmem:[%s4991_s7 + $0xc0] sm:$0xff]  ;;  %v1692_v46 = vld [vmem:[%s4991_s7 + $0xc8] sm:$0xff]  ;;  %v1698_v16 = vld [vmem:[%s4991_s7 + $0xf8] sm:$0xff]  ;;  %s3777_s17 = sshll.u32 %s3857_s29, 4  ;;  %s3778_s17 = int_to_ptr.vmem [resolvable:$false] %s3777_s17 }
 0x2ad   : > { %3273 = vmatpush3.bf16.msra.mxu1 %v3270_v43  ;;  %v3286_v20 = vpack.c.bf16 %v1710_v36, %v1709_v45  ;;  %v3244_v61 = vpack.c.bf16 %v1672_v39, %v1671_v0  ;;  %v1712_v43 = vld [vmem:[%s4991_s7 + $0x168] sm:$0xff]  ;;  %v1681_v29 = vld [vmem:[%s4991_s7 + $0x70] sm:$0xff]  ;;  %v1682_v19 = vld [vmem:[%s4991_s7 + $0x78] sm:$0xff]  ;;  %s3779_s19 = scalar_lea.vmem %s3778_s17, 1024  ;;  %p3780_p4 = scmp.lt.s32.totalorder %s4936_s28, %s3778_s17 }
 0x2ae   : > { %v1523_v52 = vsel %vm518_vm1, %v1519_v48, %v1516_v23  ;;  %v1536_v42 = vsel %vm551_vm0, %v1534_v58, %v1535_v49  ;;  %v1539_v55 = vsel %vm551_vm0, %v1535_v49, %v1532_v14  ;;  %v1520_v56 = vsel %vm518_vm1, %v1518_v44, %v1519_v48  ;;  %3275 = vmatprep.subr.bf16.mxu1 %v3274_v6  ;;  %v1714_v48 = vld [vmem:[%s4991_s7 + $0x178] sm:$0xff]  ;;  %v1675_v49 = vld [vmem:[%s4991_s7 + $0x40] sm:$0xff]  ;;  %v2122_v31 = vld [vmem:[#allocation5 + $0x8] sm:$0xff]  ;;  %p3781_p7 = scmp.lt.s32.totalorder %s3779_s19, %s3773_s18 }
 0x2af   : > { %v1524_v50 = vsel %vm502_vm2, 0.0, %v1523_v52  ;;  %v1543_v12 = vsel %vm1531_vm13, 0.0, %v1539_v55  ;;  %v3290_v44 = vpack.c.bf16 %v1712_v43, %v1711_v38  ;;  %v3248_v58 = vpack.c.bf16 %v1674_v4, %v1673_v24  ;;  %v1676_v52 = vld [vmem:[%s4991_s7 + $0x48] sm:$0xff]  ;;  %v3030_v40 = vld [vmem:[%s4990_s6] ss:$0 sm:$0xff]  ;;  %vm3038_vm15 = vmneg %vm1531_vm13 }
 0x2b0   : > { %v3252_v55 = vpack.c.bf16 %v1676_v52, %v1675_v49  ;;  %v3264_v17 = vpack.c.bf16 %v1682_v19, %v1681_v29  ;;  %v2121_v43 = vld [vmem:[#allocation5] sm:$0xff]  ;;  %v2138_v29 = vld [vmem:[#allocation5 + $0x88] sm:$0xff]  ;;  %v2140_v19 = vld [vmem:[#allocation5 + $0x98] sm:$0xff]  ;;  %vm2008_vm2 = vcmask 1041408   ;;  %p3782_p8 = por %p3781_p7, %p3780_p4 }
 0x2b1   : > { %3277 = vmatpush3.bf16.msra.mxu1 %v3274_v6  ;;  %v3262_v6 = vpack.c.bf16 %v1698_v16, %v1697_v13  ;;  %v2136_v13 = vld [vmem:[#allocation5 + $0x78] sm:$0xff]  ;;  %v2133_v16 = vld [vmem:[#allocation5 + $0x60] sm:$0xff] }
 0x2b2   : > { %3279 = vmatprep.subr.bf16.mxu1 %v3278_v10  ;;  %p3783_p11 = pnand %p3782_p8, %p3776_p3 }
 0x2b5   : > { %3281 = vmatpush3.bf16.msra.mxu1 %v3278_v10  ;;  %v2124_v10 = vld [vmem:[#allocation5 + $0x18] sm:$0xff] }
 0x2b6   : > { %3283 = vmatprep.subr.bf16.mxu1 %v3282_v25  ;;  %v3298_v32 = vpack.c.bf16 %v2124_v10, %v2122_v31  ;;  %v3314_v31 = vpack.c.bf16 %v2140_v19, %v2138_v29  ;;  %v2137_v10 = vld [vmem:[#allocation5 + $0x80] sm:$0xff]  ;;  %v2175_v29 = vld [vmem:[#allocation5 + $0x1b0] sm:$0xff] }
 0x2b9   : > { %3285 = vmatpush3.bf16.msra.mxu1 %v3282_v25 }
 0x2ba   : > { %3287 = vmatprep.subr.bf16.mxu1 %v3286_v20 }
 0x2bd   : > { %3289 = vmatpush3.bf16.msra.mxu1 %v3286_v20 }
 0x2be   : > { %3291 = vmatprep.subr.bf16.mxu1 %v3290_v44 }
 0x2c1   : > { %3293 = vmatpush3.bf16.msra.mxu1 %v3290_v44 }
 0x306   : > { %v1545_v57 = vpop.permute.xlu0 %1544 }
 0x307   : > { %v1556_v60 = vsel %vm867_vm4, %v1524_v50, %v1545_v57  ;;  %v1694_v57 = vld [vmem:[%s4991_s7 + $0xd8] sm:$0xff] }
 0x308   : > { %1643 = vmatmul.mubr.f32.vlgmr.msra.gmra.mrb[16].mxu0 %v1556_v60  ;;  %v1677_v60 = vld [vmem:[%s4991_s7 + $0x50] sm:$0xff] }
 0x309   : > { %3032 = vmatprep.mubr.msk.f32.mxu0 %vm867_vm4, %v1537_v47  ;;  %3237 = vmatpush3.bf16.msra.mxu0 %v3236_v11  ;;  %v1713_v47 = vld [vmem:[%s4991_s7 + $0x170] sm:$0xff] }
 0x30a   : > { %3239 = vmatprep.subr.bf16.mxu0 %v3238_v28 }
 0x30d   : > { %3241 = vmatpush3.bf16.msra.mxu0 %v3240_v1 }
 0x30e   : > { %3243 = vmatprep.subr.bf16.mxu0 %v3242_v53 }
 0x311   : > { %3245 = vmatpush3.bf16.msra.mxu0 %v3244_v61 }
 0x314   : > { %v1547_v23 = vpop.permute.xlu1 %1546 }
 0x315   : > { %v1557_v3 = vsel %vm867_vm4, %v1522_v41, %v1547_v23  ;;  %v1689_v41 = vld [vmem:[%s4991_s7 + $0xb0] sm:$0xff]  ;;  %v1678_v23 = vld [vmem:[%s4991_s7 + $0x58] sm:$0xff] }
 0x316   : > { %1648 = vmatmul.mubr.f32.gmra.mrb[18].mxu0 %v1557_v3  ;;  %v3246_v37 = vpack.c.bf16 %v1690_v22, %v1689_v41  ;;  %v3256_v3 = vpack.c.bf16 %v1678_v23, %v1677_v60  ;;  %v2127_v60 = vld [vmem:[#allocation5 + $0x30] sm:$0xff]  ;;  %v2130_v23 = vld [vmem:[#allocation5 + $0x48] sm:$0xff] }
 0x317   : > { %3033 = vmatprep.mubr.msk.f32.mxu0 %vm867_vm4, %v1536_v42  ;;  %v3294_v42 = vpack.c.bf16 %v1714_v48, %v1713_v47 }
 0x318   : > { %3247 = vmatprep.subr.bf16.mxu0 %v3246_v37 }
 0x319   : > { %3249 = vmatpush3.bf16.msra.mxu0 %v3248_v58  ;;  %3295 = vmatprep.subr.bf16.mxu1 %v3294_v42  ;;  %v2123_v58 = vld [vmem:[#allocation5 + $0x10] sm:$0xff] }
 0x31a   : > { %3297 = vmatpush3.bf16.msra.mxu1 %v3294_v42  ;;  %v3300_v49 = vpack.c.bf16 %v2123_v58, %v2121_v43  ;;  %v2157_v58 = vld [vmem:[#allocation5 + $0x120] sm:$0xff] }
 0x31b   : > { %v1549_v14 = vpop.permute.xlu0 %1548 }
 0x31c   : > { %v1558_v5 = vsel %vm867_vm4, %v1521_v33, %v1549_v14  ;;  %v3250_v33 = vpack.c.bf16 %v1692_v46, %v1691_v8  ;;  %v1695_v14 = vld [vmem:[%s4991_s7 + $0xe0] sm:$0xff]  ;;  %v2126_v8 = vld [vmem:[#allocation5 + $0x28] sm:$0xff]  ;;  %v2128_v46 = vld [vmem:[#allocation5 + $0x38] sm:$0xff] }
 0x31d   : > { %1653 = vmatmul.mubr.f32.gmra.mrb[20].mxu0 %v1558_v5  ;;  %v1696_v5 = vld [vmem:[%s4991_s7 + $0xe8] sm:$0xff]  ;;  %v3302_v52 = vpack.c.bf16 %v2128_v46, %v2126_v8  ;;  %v2159_v8 = vld [vmem:[#allocation5 + $0x130] sm:$0xff] }
 0x31e   : > { %3034 = vmatprep.mubr.msk.f32.mxu0 %vm867_vm4, %v1543_v12  ;;  %v1551_v54 = vpop.permute.xlu1 %1550  ;;  %3251 = vmatprep.subr.bf16.mxu0 %v3250_v33  ;;  %v3258_v12 = vpack.c.bf16 %v1696_v5, %v1695_v14  ;;  %v2129_v5 = vld [vmem:[#allocation5 + $0x40] sm:$0xff]  ;;  %v3336_v46 = vpack.c.bf16 %v2159_v8, %v2157_v58  ;;  %v2446_v58 = vld [vmem:[#allocation7 + $0x68] sm:$0xff]  ;;  %v2448_v8 = vld [vmem:[#allocation7 + $0x78] sm:$0xff] }
 0x31f   : > { %v1559_v63 = vsel %vm867_vm4, %v1520_v56, %v1551_v54  ;;  %v1693_v56 = vld [vmem:[%s4991_s7 + $0xd0] sm:$0xff]  ;;  %3253 = vmatpush3.bf16.msra.mxu0 %v3252_v55  ;;  %v1679_v54 = vld [vmem:[%s4991_s7 + $0x60] sm:$0xff] }
 0x320   : > { %v3254_v50 = vpack.c.bf16 %v1694_v57, %v1693_v56 }
 0x321   : > { %1658 = vmatmul.mubr.f32.gmra.mrb[22].mxu0 %v1559_v63  ;;  %v1680_v63 = vld [vmem:[%s4991_s7 + $0x68] sm:$0xff] }
 0x322   : > { %3255 = vmatprep.subr.bf16.mxu0 %v3254_v50  ;;  %v3260_v62 = vpack.c.bf16 %v1680_v63, %v1679_v54  ;;  %v2125_v50 = vld [vmem:[#allocation5 + $0x20] sm:$0xff]  ;;  %v2134_v54 = vld [vmem:[#allocation5 + $0x68] sm:$0xff] }
 0x323   : > { %3257 = vmatpush3.bf16.msra.mxu0 %v3256_v3  ;;  %v3304_v9 = vpack.c.bf16 %v2127_v60, %v2125_v50  ;;  %v2132_v3 = vld [vmem:[#allocation5 + $0x58] sm:$0xff]  ;;  %v2165_v60 = vld [vmem:[#allocation5 + $0x160] sm:$0xff] }
 0x324   : > { %3259 = vmatprep.subr.bf16.mxu0 %v3258_v12  ;;  %v3306_v14 = vpack.c.bf16 %v2132_v3, %v2130_v23  ;;  %v2131_v12 = vld [vmem:[#allocation5 + $0x50] sm:$0xff]  ;;  %v2170_v3 = vld [vmem:[#allocation5 + $0x188] sm:$0xff] }
 0x325   : > { %v3308_v63 = vpack.c.bf16 %v2131_v12, %v2129_v5  ;;  %v2169_v12 = vld [vmem:[#allocation5 + $0x180] sm:$0xff] }
 0x327   : > { %3261 = vmatpush3.bf16.msra.mxu0 %v3260_v62  ;;  %v2135_v62 = vld [vmem:[#allocation5 + $0x70] sm:$0xff] }
 0x328   : > { %3263 = vmatprep.subr.bf16.mxu0 %v3262_v6  ;;  %v3310_v6 = vpack.c.bf16 %v2136_v13, %v2134_v54  ;;  %v2171_v54 = vld [vmem:[#allocation5 + $0x190] sm:$0xff]  ;;  %v2174_v13 = vld [vmem:[#allocation5 + $0x1a8] sm:$0xff] }
 0x32b   : > { %3265 = vmatpush3.bf16.msra.mxu0 %v3264_v17  ;;  %v3312_v17 = vpack.c.bf16 %v2135_v62, %v2133_v16  ;;  %v2176_v16 = vld [vmem:[#allocation5 + $0x1b8] sm:$0xff] }
 0x32c   : > { %3299 = vmatprep.subr.bf16.mxu0 %v3298_v32  ;;  %v2139_v32 = vld [vmem:[#allocation5 + $0x90] sm:$0xff]  ;;  %v3350_v62 = vpack.c.bf16 %v2176_v16, %v2174_v13  ;;  %v2457_v16 = vld [vmem:[#allocation7 + $0xc0] sm:$0xff] }
 0x3db   : > { %v1644_v11 = vpop.f32.mrb[16].mxu0 }
 0x3dc   : > { %v1645_v34 = vadd.f32 %v3030_v40, %v1644_v11  ;;  %v1646_v51 = vpop.f32.mrb[17].mxu0  ;;  %v2144_v11 = vld [vmem:[#allocation5 + $0xb8] sm:$0xff] }
 0x3de   : > { %v1663_v7 = vmax.f32 %v1645_v34, 0.0  ;;  %v3316_v34 = vpack.c.bf16 %v2139_v32, %v2137_v10  ;;  %v2177_v32 = vld [vmem:[#allocation5 + $0x1c0] sm:$0xff] }
 0x3e0   : > { %1810 = vmatprep.mubr.f32.mxu0 %v1663_v7  ;;  %v1716_v25 = vrot.slane %v1663_v7, 7  ;;  %v1728_v30 = vrot.slane %v1663_v7, 1  ;;  %v2141_v7 = vld [vmem:[#allocation5 + $0xa0] sm:$0xff] }
 0x3e9   : > { %v1649_v28 = vpop.f32.mrb[18].mxu0 }
 0x3ea   : > { %v1650_v59 = vadd.f32 %v3030_v40, %v1649_v28  ;;  %v1651_v26 = vpop.f32.mrb[19].mxu0  ;;  %v2143_v28 = vld [vmem:[#allocation5 + $0xb0] sm:$0xff] }
 0x3eb   : > { %v2146_v26 = vld [vmem:[#allocation5 + $0xc8] sm:$0xff] }
 0x3ec   : > { %v1664_v15 = vmax.f32 %v1650_v59, 0.0  ;;  %v3320_v59 = vpack.c.bf16 %v2143_v28, %v2141_v7  ;;  %v2181_v7 = vld [vmem:[#allocation5 + $0x1e0] sm:$0xff]  ;;  %v2183_v28 = vld [vmem:[#allocation5 + $0x1f0] sm:$0xff] }
 0x3ee   : > { %v1717_v1 = vrot.slane %v1664_v15, 7  ;;  %v1729_v35 = vrot.slane %v1664_v15, 1 }
 0x3f0   : > { %v1734_v45 = vsel %vm551_vm0, %v1728_v30, %v1729_v35  ;;  %v1654_v53 = vpop.f32.mrb[20].mxu0  ;;  %v1722_v36 = vsel %vm518_vm1, %v1716_v25, %v1717_v1 }
 0x3f1   : > { %3156 = vmatprep.mubr.f32.mxu1 %v1734_v45  ;;  %v1655_v0 = vadd.f32 %v3030_v40, %v1654_v53  ;;  %v1656_v39 = vpop.f32.mrb[21].mxu0  ;;  %v2150_v45 = vld [vmem:[#allocation5 + $0xe8] sm:$0xff]  ;;  %v2152_v53 = vld [vmem:[#allocation5 + $0xf8] sm:$0xff] }
 0x3f2   : > { %v2151_v39 = vld [vmem:[#allocation5 + $0xf0] sm:$0xff] }
 0x3f3   : > { %v1665_v20 = vmax.f32 %v1655_v0, 0.0  ;;  %v2149_v0 = vld [vmem:[#allocation5 + $0xe0] sm:$0xff] }
 0x3f4   : > { %v1659_v61 = vpop.f32.mrb[22].mxu0 }
 0x3f5   : > { %v1718_v41 = vrot.slane %v1665_v20, 7  ;;  %v1730_v22 = vrot.slane %v1665_v20, 1  ;;  %v1660_v38 = vadd.f32 %v3030_v40, %v1659_v61  ;;  %v1661_v37 = vpop.f32.mrb[23].mxu0  ;;  %v2142_v40 = vld [vmem:[#allocation5 + $0xa8] sm:$0xff] }
 0x3f6   : > { %v3318_v51 = vpack.c.bf16 %v2144_v11, %v2142_v40  ;;  %v2154_v61 = vld [vmem:[#allocation5 + $0x108] sm:$0xff]  ;;  %v2155_v37 = vld [vmem:[#allocation5 + $0x110] sm:$0xff] }
 0x3f7   : > { %v1733_v24 = vsel %vm551_vm0, %v1729_v35, %v1730_v22  ;;  %v1666_v4 = vmax.f32 %v1660_v38, 0.0  ;;  %v1721_v44 = vsel %vm518_vm1, %v1717_v1, %v1718_v41  ;;  %v2145_v1 = vld [vmem:[#allocation5 + $0xc0] sm:$0xff]  ;;  %v2179_v40 = vld [vmem:[#allocation5 + $0x1d0] sm:$0xff]  ;;  %v2182_v11 = vld [vmem:[#allocation5 + $0x1e8] sm:$0xff] }
 0x3f8   : > { %3157 = vmatmul.mubr.f32.vlgmr.msra.gmra.mrb[0].mxu1 %v1733_v24  ;;  %v2153_v38 = vld [vmem:[#allocation5 + $0x100] sm:$0xff]  ;;  %v2158_v24 = vld [vmem:[#allocation5 + $0x128] sm:$0xff] }
 0x3f9   : > { %v1719_v47 = vrot.slane %v1666_v4, 7  ;;  %v1731_v33 = vrot.slane %v1666_v4, 1  ;;  %v3332_v43 = vpack.c.bf16 %v2155_v37, %v2153_v38  ;;  %v2442_v38 = vld [vmem:[#allocation7 + $0x48] sm:$0xff]  ;;  %v2444_v37 = vld [vmem:[#allocation7 + $0x58] sm:$0xff] }
 0x3fb   : > { %v1723_v42 = vsel %vm518_vm1, %v1719_v47, %v1716_v25  ;;  %v1732_v55 = vsel %vm551_vm0, %v1730_v22, %v1731_v33  ;;  %v1735_v56 = vsel %vm551_vm0, %v1731_v33, %v1728_v30  ;;  %v1720_v57 = vsel %vm518_vm1, %v1718_v41, %v1719_v47  ;;  %v2147_v30 = vld [vmem:[#allocation5 + $0xd0] sm:$0xff]  ;;  %v2156_v41 = vld [vmem:[#allocation5 + $0x118] sm:$0xff]  ;;  %v2162_v47 = vld [vmem:[#allocation5 + $0x148] sm:$0xff] }
 0x3fc   : > { %3037 = vmatmul.mubr.msk.f32.vlgmr.msra.gmra.mrb[24].mxu0 %vm4763_vm14, %v1723_v42  ;;  %3159 = vmatprep.mubr.f32.mxu1 %v1732_v55  ;;  %v3324_v35 = vpack.c.bf16 %v2147_v30, %v2145_v1  ;;  %v3330_v22 = vpack.c.bf16 %v2156_v41, %v2154_v61  ;;  %v2164_v33 = vld [vmem:[#allocation5 + $0x158] sm:$0xff]  ;;  %v2163_v42 = vld [vmem:[#allocation5 + $0x150] sm:$0xff]  ;;  %v2434_v30 = vld [vmem:[#allocation7 + $0x8] sm:$0xff] }
 0x3fd   : > { %1815 = vmatprep.mubr.f32.mxu0 %v1664_v15  ;;  %3160 = vmatmul.mubr.msk.f32.gmra.mrb[2].mxu1 %vm3038_vm15, %v1735_v56  ;;  %v2148_v15 = vld [vmem:[#allocation5 + $0xd8] sm:$0xff]  ;;  %v2166_v56 = vld [vmem:[#allocation5 + $0x168] sm:$0xff]  ;;  %v2437_v41 = vld [vmem:[#allocation7 + $0x20] sm:$0xff] }
 0x3fe   : > { %3301 = vmatpush1.bf16.msra.mxu0 %v3300_v49  ;;  %v3322_v25 = vpack.c.bf16 %v2148_v15, %v2146_v26  ;;  %v3338_v49 = vpack.c.bf16 %v2164_v33, %v2162_v47  ;;  %v2186_v26 = vld [vmem:[#allocation5 + $0x208] sm:$0xff]  ;;  %v2188_v15 = vld [vmem:[#allocation5 + $0x218] sm:$0xff]  ;;  %v3406_v47 = vpack.c.bf16 %v2448_v8, %v2446_v58  ;;  %v2445_v33 = vld [vmem:[#allocation7 + $0x60] sm:$0xff] }
 0x3ff   : > { %3303 = vmatprep.subr.bf16.mxu0 %v3302_v52  ;;  %v2161_v52 = vld [vmem:[#allocation5 + $0x140] sm:$0xff]  ;;  %v3362_v1 = vpack.c.bf16 %v2188_v15, %v2186_v26  ;;  %v2470_v26 = vld [vmem:[#allocation7 + $0x128] sm:$0xff]  ;;  %v2472_v15 = vld [vmem:[#allocation7 + $0x138] sm:$0xff] }
 0x400   : > { %1816 = vmatmul.mubr.f32.gmra.mrb[26].mxu0 %v1722_v36  ;;  %v3326_v36 = vpack.c.bf16 %v2152_v53, %v2150_v45  ;;  %v3340_v55 = vpack.c.bf16 %v2163_v42, %v2161_v52  ;;  %v2433_v45 = vld [vmem:[#allocation7] sm:$0xff]  ;;  %v2450_v52 = vld [vmem:[#allocation7 + $0x88] sm:$0xff]  ;;  %v2452_v42 = vld [vmem:[#allocation7 + $0x98] sm:$0xff] }
 0x401   : > { %1820 = vmatprep.mubr.f32.mxu0 %v1665_v20  ;;  %v3328_v20 = vpack.c.bf16 %v2151_v39, %v2149_v0  ;;  %v2438_v0 = vld [vmem:[#allocation7 + $0x28] sm:$0xff]  ;;  %v2440_v39 = vld [vmem:[#allocation7 + $0x38] sm:$0xff] }
 0x402   : > { %3305 = vmatpush1.bf16.msra.mxu0 %v3304_v9  ;;  %v2167_v9 = vld [vmem:[#allocation5 + $0x170] sm:$0xff]  ;;  %v3398_v61 = vpack.c.bf16 %v2440_v39, %v2438_v0 }
 0x403   : > { %3307 = vmatprep.subr.bf16.mxu0 %v3306_v14  ;;  %v3344_v23 = vpack.c.bf16 %v2167_v9, %v2165_v60  ;;  %v2172_v14 = vld [vmem:[#allocation5 + $0x198] sm:$0xff]  ;;  %v2454_v60 = vld [vmem:[#allocation7 + $0xa8] sm:$0xff]  ;;  %v2471_v0 = vld [vmem:[#allocation7 + $0x130] sm:$0xff] }
 0x404   : > { %1821 = vmatmul.mubr.f32.gmra.mrb[28].mxu0 %v1721_v44  ;;  %v3346_v5 = vpack.c.bf16 %v2172_v14, %v2170_v3  ;;  %v2456_v9 = vld [vmem:[#allocation7 + $0xb8] sm:$0xff]  ;;  %v2453_v14 = vld [vmem:[#allocation7 + $0xa0] sm:$0xff] }
 0x405   : > { %1825 = vmatprep.mubr.f32.mxu0 %v1666_v4  ;;  %v2160_v4 = vld [vmem:[#allocation5 + $0x138] sm:$0xff]  ;;  %v3414_v3 = vpack.c.bf16 %v2456_v9, %v2454_v60  ;;  %v2482_v60 = vld [vmem:[#allocation7 + $0x188] sm:$0xff] }
 0x406   : > { %3309 = vmatpush1.bf16.msra.mxu0 %v3308_v63  ;;  %v3334_v44 = vpack.c.bf16 %v2160_v4, %v2158_v24  ;;  %v3348_v63 = vpack.c.bf16 %v2171_v54, %v2169_v12  ;;  %v3402_v24 = vpack.c.bf16 %v2444_v37, %v2442_v38  ;;  %v2441_v4 = vld [vmem:[#allocation7 + $0x40] sm:$0xff]  ;;  %v2458_v12 = vld [vmem:[#allocation7 + $0xc8] sm:$0xff]  ;;  %v2460_v54 = vld [vmem:[#allocation7 + $0xd8] sm:$0xff] }
 0x407   : > { %3311 = vmatprep.subr.bf16.mxu0 %v3310_v6  ;;  %v2173_v6 = vld [vmem:[#allocation5 + $0x1a0] sm:$0xff]  ;;  %v3418_v13 = vpack.c.bf16 %v2460_v54, %v2458_v12  ;;  %v2483_v54 = vld [vmem:[#allocation7 + $0x190] sm:$0xff] }
 0x408   : > { %1826 = vmatmul.mubr.f32.gmra.mrb[30].mxu0 %v1720_v57  ;;  %v2168_v57 = vld [vmem:[#allocation5 + $0x178] sm:$0xff]  ;;  %v3352_v19 = vpack.c.bf16 %v2175_v29, %v2173_v6  ;;  %v2462_v6 = vld [vmem:[#allocation7 + $0xe8] sm:$0xff]  ;;  %v2481_v12 = vld [vmem:[#allocation7 + $0x180] sm:$0xff] }
 0x409   : > { %v3342_v50 = vpack.c.bf16 %v2168_v57, %v2166_v56  ;;  %v3410_v56 = vpack.c.bf16 %v2452_v42, %v2450_v52  ;;  %v2449_v57 = vld [vmem:[#allocation7 + $0x80] sm:$0xff]  ;;  %v2464_v29 = vld [vmem:[#allocation7 + $0xf8] sm:$0xff] }
 0x40a   : > { %3313 = vmatpush1.bf16.msra.mxu0 %v3312_v17  ;;  %v2178_v17 = vld [vmem:[#allocation5 + $0x1c8] sm:$0xff] }
 0x40b   : > { %3315 = vmatprep.subr.bf16.mxu0 %v3314_v31  ;;  %v2180_v31 = vld [vmem:[#allocation5 + $0x1d8] sm:$0xff] }
 0x40c   : > { %v3354_v10 = vpack.c.bf16 %v2180_v31, %v2178_v17  ;;  %v3422_v17 = vpack.c.bf16 %v2464_v29, %v2462_v6  ;;  %v2461_v31 = vld [vmem:[#allocation7 + $0xe0] sm:$0xff] }
 0x40e   : > { %3317 = vmatpush1.bf16.msra.mxu0 %v3316_v34  ;;  %v3356_v34 = vpack.c.bf16 %v2179_v40, %v2177_v32  ;;  %v2466_v32 = vld [vmem:[#allocation7 + $0x108] sm:$0xff]  ;;  %v2468_v40 = vld [vmem:[#allocation7 + $0x118] sm:$0xff] }
 0x40f   : > { %3319 = vmatprep.subr.bf16.mxu0 %v3318_v51  ;;  %v2184_v51 = vld [vmem:[#allocation5 + $0x1f8] sm:$0xff] }
 0x412   : > { %3321 = vmatpush1.bf16.msra.mxu0 %v3320_v59  ;;  %v3358_v59 = vpack.c.bf16 %v2184_v51, %v2182_v11 }
 0x413   : > { %3323 = vmatprep.subr.bf16.mxu0 %v3322_v25  ;;  %v3360_v25 = vpack.c.bf16 %v2183_v28, %v2181_v7  ;;  %v3426_v7 = vpack.c.bf16 %v2468_v40, %v2466_v32  ;;  %v2465_v28 = vld [vmem:[#allocation7 + $0x100] sm:$0xff]  ;;  %v3444_v32 = vpack.c.bf16 %v2483_v54, %v2481_v12 }
 0x416   : > { %3325 = vmatpush1.bf16.msra.mxu0 %v3324_v35  ;;  %v2436_v35 = vld [vmem:[#allocation7 + $0x18] sm:$0xff] }
 0x417   : > { %3327 = vmatprep.subr.bf16.mxu0 %v3326_v36  ;;  %v3394_v53 = vpack.c.bf16 %v2436_v35, %v2434_v30  ;;  %v2435_v36 = vld [vmem:[#allocation7 + $0x10] sm:$0xff]  ;;  %v4782_v30 = vld [vmem:[%s4992_s8] ss:$0 sm:$0xff] }
 0x419   : > { %3395 = vmatprep.subr.bf16.mxu1 %v3394_v53  ;;  %v3430_v53 = vpack.c.bf16 %v2472_v15, %v2470_v26 }
 0x41a   : > { %3329 = vmatpush1.bf16.msra.mxu0 %v3328_v20  ;;  %v3396_v20 = vpack.c.bf16 %v2435_v36, %v2433_v45  ;;  %v2469_v36 = vld [vmem:[#allocation7 + $0x120] sm:$0xff] }
 0x41b   : > { %3331 = vmatprep.subr.bf16.mxu0 %v3330_v22  ;;  %v2439_v22 = vld [vmem:[#allocation7 + $0x30] sm:$0xff]  ;;  %v3432_v37 = vpack.c.bf16 %v2471_v0, %v2469_v36 }
 0x41c   : > { %3397 = vmatpush1.bf16.msra.mxu1 %v3396_v20 }
 0x41d   : > { %3399 = vmatprep.subr.bf16.mxu1 %v3398_v61  ;;  %v2474_v61 = vld [vmem:[#allocation7 + $0x148] sm:$0xff] }
 0x41e   : > { %3333 = vmatpush1.bf16.msra.mxu0 %v3332_v43  ;;  %v3400_v43 = vpack.c.bf16 %v2439_v22, %v2437_v41  ;;  %v2476_v41 = vld [vmem:[#allocation7 + $0x158] sm:$0xff] }
 0x41f   : > { %3335 = vmatprep.subr.bf16.mxu0 %v3334_v44  ;;  %v2443_v44 = vld [vmem:[#allocation7 + $0x50] sm:$0xff] }
 0x420   : > { %3401 = vmatpush1.bf16.msra.mxu1 %v3400_v43 }
 0x421   : > { %3403 = vmatprep.subr.bf16.mxu1 %v3402_v24  ;;  %v3434_v24 = vpack.c.bf16 %v2476_v41, %v2474_v61 }
 0x422   : > { %3337 = vmatpush1.bf16.msra.mxu0 %v3336_v46  ;;  %v3404_v46 = vpack.c.bf16 %v2443_v44, %v2441_v4  ;;  %v2473_v4 = vld [vmem:[#allocation7 + $0x140] sm:$0xff]  ;;  %v2475_v44 = vld [vmem:[#allocation7 + $0x150] sm:$0xff] }
 0x423   : > { %3339 = vmatprep.subr.bf16.mxu0 %v3338_v49  ;;  %v2447_v49 = vld [vmem:[#allocation7 + $0x70] sm:$0xff]  ;;  %v3436_v42 = vpack.c.bf16 %v2475_v44, %v2473_v4 }
 0x424   : > { %3405 = vmatpush1.bf16.msra.mxu1 %v3404_v46  ;;  %v2478_v46 = vld [vmem:[#allocation7 + $0x168] sm:$0xff] }
 0x425   : > { %3407 = vmatprep.subr.bf16.mxu1 %v3406_v47  ;;  %v2480_v47 = vld [vmem:[#allocation7 + $0x178] sm:$0xff] }
 0x426   : > { %3341 = vmatpush1.bf16.msra.mxu0 %v3340_v55  ;;  %v3408_v55 = vpack.c.bf16 %v2447_v49, %v2445_v33 }
 0x427   : > { %3343 = vmatprep.subr.bf16.mxu0 %v3342_v50  ;;  %v2451_v50 = vld [vmem:[#allocation7 + $0x90] sm:$0xff] }
 0x428   : > { %3409 = vmatpush1.bf16.msra.mxu1 %v3408_v55  ;;  %v2477_v55 = vld [vmem:[#allocation7 + $0x160] sm:$0xff] }
 0x429   : > { %3411 = vmatprep.subr.bf16.mxu1 %v3410_v56  ;;  %v2479_v56 = vld [vmem:[#allocation7 + $0x170] sm:$0xff] }
 0x42a   : > { %3345 = vmatpush1.bf16.msra.mxu0 %v3344_v23  ;;  %v3412_v23 = vpack.c.bf16 %v2451_v50, %v2449_v57  ;;  %v3438_v50 = vpack.c.bf16 %v2480_v47, %v2478_v46 }
 0x42b   : > { %3347 = vmatprep.subr.bf16.mxu0 %v3346_v5  ;;  %v2455_v5 = vld [vmem:[#allocation7 + $0xb0] sm:$0xff] }
 0x42c   : > { %3413 = vmatpush1.bf16.msra.mxu1 %v3412_v23 }
 0x42d   : > { %3415 = vmatprep.subr.bf16.mxu1 %v3414_v3 }
 0x42e   : > { %3349 = vmatpush1.bf16.msra.mxu0 %v3348_v63  ;;  %v3416_v63 = vpack.c.bf16 %v2455_v5, %v2453_v14  ;;  %v2484_v5 = vld [vmem:[#allocation7 + $0x198] sm:$0xff] }
 0x42f   : > { %3351 = vmatprep.subr.bf16.mxu0 %v3350_v62  ;;  %v2459_v62 = vld [vmem:[#allocation7 + $0xd0] sm:$0xff] }
 0x430   : > { %3417 = vmatpush1.bf16.msra.mxu1 %v3416_v63  ;;  %v3440_v63 = vpack.c.bf16 %v2479_v56, %v2477_v55 }
 0x431   : > { %3419 = vmatprep.subr.bf16.mxu1 %v3418_v13 }
 0x432   : > { %3353 = vmatpush1.bf16.msra.mxu0 %v3352_v19  ;;  %v3420_v19 = vpack.c.bf16 %v2459_v62, %v2457_v16 }
 0x433   : > { %3355 = vmatprep.subr.bf16.mxu0 %v3354_v10  ;;  %v2463_v10 = vld [vmem:[#allocation7 + $0xf0] sm:$0xff] }
 0x434   : > { %3421 = vmatpush1.bf16.msra.mxu1 %v3420_v19 }
 0x435   : > { %3423 = vmatprep.subr.bf16.mxu1 %v3422_v17 }
 0x436   : > { %3357 = vmatpush1.bf16.msra.mxu0 %v3356_v34  ;;  %v3424_v34 = vpack.c.bf16 %v2463_v10, %v2461_v31  ;;  %v3442_v10 = vpack.c.bf16 %v2484_v5, %v2482_v60 }
 0x437   : > { %3359 = vmatprep.subr.bf16.mxu0 %v3358_v59  ;;  %v2467_v59 = vld [vmem:[#allocation7 + $0x110] sm:$0xff] }
 0x438   : > { %3425 = vmatpush1.bf16.msra.mxu1 %v3424_v34 }
 0x439   : > { %3427 = vmatprep.subr.bf16.mxu1 %v3426_v7 }
 0x43a   : > { %3361 = vmatpush1.bf16.msra.mxu0 %v3360_v25 }
 0x43b   : > { %3363 = vmatprep.subr.bf16.mxu0 %v3362_v1  ;;  %v3428_v1 = vpack.c.bf16 %v2467_v59, %v2465_v28 }
 0x43d   : > { %3429 = vmatpush1.bf16.msra.mxu1 %v3428_v1 }
 0x43e   : > { %3431 = vmatprep.subr.bf16.mxu1 %v3430_v53 }
 0x441   : > { %3433 = vmatpush1.bf16.msra.mxu1 %v3432_v37 }
 0x442   : > { %3435 = vmatprep.subr.bf16.mxu1 %v3434_v24 }
 0x445   : > { %3437 = vmatpush1.bf16.msra.mxu1 %v3436_v42 }
 0x446   : > { %3439 = vmatprep.subr.bf16.mxu1 %v3438_v50 }
 0x449   : > { %3441 = vmatpush1.bf16.msra.mxu1 %v3440_v63 }
 0x44a   : > { %3443 = vmatprep.subr.bf16.mxu1 %v3442_v10 }
 0x44d   : > { %3445 = vmatpush1.bf16.msra.mxu1 %v3444_v32 }
 0x4cb   : > { %v3158_v11 = vpop.f32.mrb[0].mxu1 }
 0x4cc   : > { %v1897_v51 = vpop.f32.mrb[1].mxu1 }
 0x4cf   : > { %v3092_v25 = vpop.f32.mrb[24].mxu0 }
 0x4d0   : > { %v3093_v35 = vpop.f32.mrb[25].mxu0  ;;  %v4784_v45 = vpop.f32.mrb[2].mxu1 }
 0x4d1   : > { %v3094_v39 = vadd.f32 %v3093_v35, %v3092_v25  ;;  %v1907_v20 = vpop.f32.mrb[3].mxu1 }
 0x4d3   : > { %v1813_v22 = vadd.f32 %v3094_v39, %v4782_v30  ;;  %v3095_v38 = vpop.f32.mrb[26].mxu0 }
 0x4d4   : > { %v3096_v43 = vpop.f32.mrb[27].mxu0 }
 0x4d5   : > { %v1898_v58 = vadd.f32 %v1897_v51, %v1813_v22  ;;  %v3097_v8 = vadd.f32 %v3096_v43, %v3095_v38 }
 0x4d7   : > { %v1916_v33 = vmax.f32 %v1898_v58, 0.0  ;;  %v1818_v49 = vadd.f32 %v3097_v8, %v4782_v30  ;;  %v3098_v52 = vpop.f32.mrb[28].mxu0 }
 0x4d8   : > { %v3099_v57 = vpop.f32.mrb[29].mxu0 }
 0x4d9   : > { %v1924_v9 = vcombine.high %v1916_v33, %v1916_v33  ;;  %v1931_v23 = vrot.slane %v1916_v33, %v4380_v27  ;;  %v1903_v3 = vadd.f32 %v3158_v11, %v1818_v49  ;;  %v3100_v14 = vadd.f32 %v3099_v57, %v3098_v52 }
 0x4db   : > { %v1938_v13 = vrot.slane %v1924_v9, %v4380_v27  ;;  %v1939_v16 = vcombine.high %v1931_v23, %v1931_v23  ;;  %v2009_v62 = vsel %vm2008_vm2, %v1931_v23, -inf  ;;  %v1917_v6 = vmax.f32 %v1903_v3, 0.0  ;;  %v3101_v29 = vpop.f32.mrb[30].mxu0 }
 0x4dc   : > { %v2010_v19 = vrot.slane %v2009_v62, 4  ;;  %v1823_v17 = vadd.f32 %v3100_v14, %v4782_v30  ;;  %v3102_v31 = vpop.f32.mrb[31].mxu0 }
 0x4dd   : > { %v1940_v40 = vcombine.high %v1938_v13, %v1938_v13  ;;  %v2016_v11 = vsel %vm2008_vm2, %v1939_v16, -inf  ;;  %v2023_v34 = vsel %vm2008_vm2, %v1938_v13, -inf  ;;  %v1941_v51 = vcombine.high %v1917_v6, %v1917_v6 }
 0x4de   : > { %v2011_v7 = vmax.f32 %v2009_v62, %v2010_v19  ;;  %v2017_v28 = vrot.slane %v2016_v11, 4  ;;  %v2024_v59 = vrot.slane %v2023_v34, 4  ;;  %v1948_v26 = vrot.slane %v1917_v6, %v4380_v27 }
 0x4df   : > { %v2030_v15 = vsel %vm2008_vm2, %v1940_v40, -inf  ;;  %v4797_v25 = vrot.slane %v1941_v51, %v4380_v27  ;;  %v1908_v1 = vadd.f32 %v1907_v20, %v1823_v17  ;;  %v3103_v35 = vadd.f32 %v3102_v31, %v3101_v29 }
 0x4e0   : > { %v2012_v53 = vrot.slane %v2011_v7, 2  ;;  %v2018_v36 = vmax.f32 %v2016_v11, %v2017_v28  ;;  %v2025_v0 = vmax.f32 %v2023_v34, %v2024_v59  ;;  %v2031_v39 = vrot.slane %v2030_v15, 4 }
 0x4e1   : > { %v1956_v61 = vcombine.high %v1948_v26, %v1948_v26  ;;  %v1957_v41 = vcombine.high %v4797_v25, %v4797_v25  ;;  %v2037_v22 = vsel %vm2008_vm2, %v1948_v26, -inf  ;;  %v2051_v38 = vsel %vm2008_vm2, %v4797_v25, -inf }
 0x4e2   : > { %v2013_v37 = vmax.f32 %v2011_v7, %v2012_v53  ;;  %v2019_v43 = vrot.slane %v2018_v36, 2  ;;  %v2026_v24 = vrot.slane %v2025_v0, 2  ;;  %v2032_v20 = vmax.f32 %v2030_v15, %v2031_v39 }
 0x4e3   : > { %v2038_v4 = vrot.slane %v2037_v22, 4  ;;  %v2044_v44 = vsel %vm2008_vm2, %v1956_v61, -inf  ;;  %v2052_v58 = vrot.slane %v2051_v38, 4  ;;  %v1918_v8 = vmax.f32 %v1908_v1, 0.0 }
 0x4e4   : > { %v2014_v46 = vrot.slane %v2013_v37, 1  ;;  %v2020_v47 = vmax.f32 %v2018_v36, %v2019_v43  ;;  %v2027_v33 = vmax.f32 %v2025_v0, %v2026_v24  ;;  %v2033_v49 = vrot.slane %v2032_v20, 2 }
 0x4e5   : > { %v2039_v52 = vmax.f32 %v2037_v22, %v2038_v4  ;;  %v2045_v42 = vrot.slane %v2044_v44, 4  ;;  %v4805_v55 = vmax.f32 %v2051_v38, %v2052_v58  ;;  %v1958_v56 = vcombine.high %v1918_v8, %v1918_v8 }
 0x4e6   : > { %v4807_v57 = vmax.f32 %v2013_v37, %v2014_v46  ;;  %v2021_v50 = vrot.slane %v2020_v47, 1  ;;  %v2028_v60 = vrot.slane %v2027_v33, 1  ;;  %v2034_v9 = vmax.f32 %v2032_v20, %v2033_v49 }
 0x4e7   : > { %v2040_v23 = vrot.slane %v2039_v52, 2  ;;  %v2046_v3 = vmax.f32 %v2044_v44, %v2045_v42  ;;  %v1965_v14 = vrot.slane %v1918_v8, %v4380_v27  ;;  %v1972_v5 = vrot.slane %v1958_v56, %v4380_v27 }
 0x4e8   : > { %v4811_v12 = vmax.f32 %v2020_v47, %v2021_v50  ;;  %v4813_v54 = vmax.f32 %v2027_v33, %v2028_v60  ;;  %v1828_v63 = vadd.f32 %v3103_v35, %v4782_v30  ;;  %v2035_v13 = vrot.slane %v2034_v9, 1 }
 0x4e9   : > { %v2041_v16 = vmax.f32 %v2039_v52, %v2040_v23  ;;  %v2047_v62 = vrot.slane %v2046_v3, 2  ;;  %v1973_v6 = vcombine.high %v1965_v14, %v1965_v14  ;;  %v1974_v29 = vcombine.high %v1972_v5, %v1972_v5 }
 0x4ea   : > { %v2065_v19 = vsel %vm2008_vm2, %v1965_v14, -inf  ;;  %v2079_v17 = vsel %vm2008_vm2, %v1972_v5, -inf  ;;  %v1913_v31 = vadd.f32 %v4784_v45, %v1828_v63  ;;  %v4819_v10 = vmax.f32 %v2034_v9, %v2035_v13 }
 0x4eb   : > { %v2042_v32 = vrot.slane %v2041_v16, 1  ;;  %v2066_v40 = vrot.slane %v2065_v19, 4  ;;  %v2072_v11 = vsel %vm2008_vm2, %v1973_v6, -inf  ;;  %v2080_v34 = vrot.slane %v2079_v17, 4 }
 0x4ec   : > { %v2073_v51 = vrot.slane %v2072_v11, 4  ;;  %v2086_v30 = vsel %vm2008_vm2, %v1974_v29, -inf  ;;  %v1919_v7 = vmax.f32 %v1913_v31, 0.0  ;;  %v2048_v28 = vmax.f32 %v2046_v3, %v2047_v62 }
 0x4ed   : > { %v2067_v59 = vmax.f32 %v2065_v19, %v2066_v40  ;;  %v2081_v26 = vmax.f32 %v2079_v17, %v2080_v34  ;;  %v2087_v15 = vrot.slane %v2086_v30, 4  ;;  %v4823_v1 = vmax.f32 %v2041_v16, %v2042_v32 }
 0x4ee   : > { %v2074_v35 = vmax.f32 %v2072_v11, %v2073_v51  ;;  %v1975_v53 = vcombine.high %v1919_v7, %v1919_v7  ;;  %v1982_v45 = vrot.slane %v1919_v7, %v4380_v27  ;;  %v2049_v36 = vrot.slane %v2048_v28, 1 }
 0x4ef   : > { %v2068_v0 = vrot.slane %v2067_v59, 2  ;;  %v2082_v39 = vrot.slane %v2081_v26, 2  ;;  %v2088_v61 = vmax.f32 %v2086_v30, %v2087_v15  ;;  %v2054_v22 = vrot.slane %v4805_v55, 2 }
 0x4f0   : > { %v2075_v38 = vrot.slane %v2074_v35, 2  ;;  %v1989_v37 = vrot.slane %v1975_v53, %v4380_v27  ;;  %v1990_v43 = vcombine.high %v1982_v45, %v1982_v45  ;;  %v2093_v24 = vsel %vm2008_vm2, %v1982_v45, -inf }
 0x4f1   : > { %v2069_v20 = vmax.f32 %v2067_v59, %v2068_v0  ;;  %v2083_v4 = vmax.f32 %v2081_v26, %v2082_v39  ;;  %v2089_v44 = vrot.slane %v2088_v61, 2  ;;  %v2094_v58 = vrot.slane %v2093_v24, 4 }
 0x4f2   : > { %v2076_v8 = vmax.f32 %v2074_v35, %v2075_v38  ;;  %v1991_v46 = vcombine.high %v1989_v37, %v1989_v37  ;;  %v2100_v47 = vsel %vm2008_vm2, %v1990_v43, -inf  ;;  %v2107_v33 = vsel %vm2008_vm2, %v1989_v37, -inf }
 0x4f3   : > { %v2070_v49 = vrot.slane %v2069_v20, 1  ;;  %v2084_v52 = vrot.slane %v2083_v4, 1  ;;  %v2090_v42 = vmax.f32 %v2088_v61, %v2089_v44  ;;  %v2095_v56 = vmax.f32 %v2093_v24, %v2094_v58 }
 0x4f4   : > { %v2077_v50 = vrot.slane %v2076_v8, 1  ;;  %v2101_v60 = vrot.slane %v2100_v47, 4  ;;  %v2108_v27 = vrot.slane %v2107_v33, 4  ;;  %v2114_v9 = vsel %vm2008_vm2, %v1991_v46, -inf }
 0x4f5   : > { %v2071_v23 = vmax.f32 %v2069_v20, %v2070_v49  ;;  %v2085_v3 = vmax.f32 %v2083_v4, %v2084_v52  ;;  %v2091_v14 = vrot.slane %v2090_v42, 1  ;;  %v2096_v5 = vrot.slane %v2095_v56, 2  ;;  %v2190_v52 = vld [vmem:[#allocation5 + $0x228] sm:$0xff] }
 0x4f6   : > { %v2078_v63 = vmax.f32 %v2076_v8, %v2077_v50  ;;  %v2102_v13 = vmax.f32 %v2100_v47, %v2101_v60  ;;  %v2109_v16 = vmax.f32 %v2107_v33, %v2108_v27  ;;  %v2115_v62 = vrot.slane %v2114_v9, 4  ;;  %v2185_v47 = vld [vmem:[#allocation5 + $0x200] sm:$0xff]  ;;  %v2187_v33 = vld [vmem:[#allocation5 + $0x210] sm:$0xff] }
 0x4f7   : > { %v2092_v6 = vmax.f32 %v2090_v42, %v2091_v14  ;;  %v2097_v29 = vmax.f32 %v2095_v56, %v2096_v5  ;;  %v2050_v19 = vmax.f32 %v2048_v28, %v2049_v36  ;;  %v2055_v17 = vmax.f32 %v4805_v55, %v2054_v22 }
 0x4f8   : > { %v2241_v31 = vsel %vm1477_vm6, %v2078_v63, %v2071_v23  ;;  %v2103_v32 = vrot.slane %v2102_v13, 2  ;;  %v2110_v40 = vrot.slane %v2109_v16, 2  ;;  %v2116_v11 = vmax.f32 %v2114_v9, %v2115_v62  ;;  %v2189_v23 = vld [vmem:[#allocation5 + $0x220] sm:$0xff]  ;;  %v2194_v63 = vld [vmem:[#allocation5 + $0x248] sm:$0xff] }
 0x4f9   : > { %v2242_v34 = vsel %vm1479_vm7, %v2085_v3, %v2241_v31  ;;  %v2098_v51 = vrot.slane %v2097_v29, 1  ;;  %v2056_v30 = vrot.slane %v2055_v17, 1  ;;  %v2058_v7 = vsel %vm2008_vm2, %v1957_v41, -inf  ;;  %v2191_v3 = vld [vmem:[#allocation5 + $0x230] sm:$0xff]  ;;  %v2198_v31 = vld [vmem:[#allocation5 + $0x268] sm:$0xff] }
 0x4fa   : > { %v2104_v59 = vmax.f32 %v2102_v13, %v2103_v32  ;;  %v2111_v26 = vmax.f32 %v2109_v16, %v2110_v40  ;;  %v2117_v15 = vrot.slane %v2116_v11, 2  ;;  %v2243_v28 = vsel %vm1481_vm8, %v2092_v6, %v2242_v34  ;;  %v2196_v13 = vld [vmem:[#allocation5 + $0x258] sm:$0xff] }
 0x4fb   : > { %v2099_v55 = vmax.f32 %v2097_v29, %v2098_v51  ;;  %v2057_v35 = vmax.f32 %v2055_v17, %v2056_v30  ;;  %v2059_v53 = vrot.slane %v2058_v7, 4  ;;  %v2234_v45 = vsel %vm1477_vm6, %v4811_v12, %v4807_v57  ;;  %v2195_v17 = vld [vmem:[#allocation5 + $0x250] sm:$0xff]  ;;  %v2200_v32 = vld [vmem:[#allocation5 + $0x278] sm:$0xff]  ;;  %v2197_v51 = vld [vmem:[#allocation5 + $0x260] sm:$0xff] }
 0x4fc   : > { %v2105_v36 = vrot.slane %v2104_v59, 1  ;;  %v2112_v0 = vrot.slane %v2111_v26, 1  ;;  %v2118_v39 = vmax.f32 %v2116_v11, %v2117_v15  ;;  %v2235_v25 = vsel %vm1479_vm7, %v4813_v54, %v2234_v45  ;;  %v2199_v30 = vld [vmem:[#allocation5 + $0x270] sm:$0xff] }
 0x4fd   : > { %v2244_v41 = vsel %vm1483_vm9, %v2099_v55, %v2243_v28  ;;  %v2060_v61 = vmax.f32 %v2058_v7, %v2059_v53  ;;  %v2236_v22 = vsel %vm1481_vm8, %v4819_v10, %v2235_v25  ;;  %v3364_v27 = vpack.c.bf16 %v2187_v33, %v2185_v47  ;;  %v2202_v7 = vld [vmem:[#allocation5 + $0x288] sm:$0xff]  ;;  %v2201_v28 = vld [vmem:[#allocation5 + $0x280] sm:$0xff]  ;;  %v2203_v55 = vld [vmem:[#allocation5 + $0x290] sm:$0xff] }
 0x4fe   : > { %v2106_v38 = vmax.f32 %v2104_v59, %v2105_v36  ;;  %v2113_v37 = vmax.f32 %v2111_v26, %v2112_v0  ;;  %v2119_v43 = vrot.slane %v2118_v39, 1  ;;  %v2237_v24 = vsel %vm1483_vm9, %v4823_v1, %v2236_v22  ;;  %v2192_v1 = vld [vmem:[#allocation5 + $0x238] sm:$0xff]  ;;  %v2205_v0 = vld [vmem:[#allocation5 + $0x2a0] sm:$0xff]  ;;  %v2210_v25 = vld [vmem:[#allocation5 + $0x2c8] sm:$0xff] }
 0x4ff   : > { %v2061_v20 = vrot.slane %v2060_v61, 2  ;;  %v2238_v57 = vsel %vm1485_vm10, %v2050_v19, %v2237_v24  ;;  %v3366_v9 = vpack.c.bf16 %v2192_v1, %v2190_v52  ;;  %v3368_v6 = vpack.c.bf16 %v2191_v3, %v2189_v23  ;;  %v2193_v19 = vld [vmem:[#allocation5 + $0x240] sm:$0xff]  ;;  %v2204_v59 = vld [vmem:[#allocation5 + $0x298] sm:$0xff]  ;;  %v2487_v47 = vld [vmem:[#allocation7 + $0x1b0] sm:$0xff] }
 0x500   : > { %v2120_v12 = vmax.f32 %v2118_v39, %v2119_v43  ;;  %v2239_v4 = vsel %vm1487_vm11, %v2057_v35, %v2238_v57  ;;  %v2245_v54 = vsel %vm1485_vm10, %v2106_v38, %v2244_v41  ;;  %v3370_v29 = vpack.c.bf16 %v2196_v13, %v2194_v63  ;;  %v2206_v35 = vld [vmem:[#allocation5 + $0x2a8] sm:$0xff]  ;;  %v2208_v53 = vld [vmem:[#allocation5 + $0x2b8] sm:$0xff]  ;;  %v2207_v39 = vld [vmem:[#allocation5 + $0x2b0] sm:$0xff] }
 0x501   : > { %v2062_v44 = vmax.f32 %v2060_v61, %v2061_v20  ;;  %v2246_v58 = vsel %vm1487_vm11, %v2113_v37, %v2245_v54  ;;  %v3372_v40 = vpack.c.bf16 %v2195_v17, %v2193_v19  ;;  %v3856_v11 = vmov 0.0   ;;  %v2212_v41 = vld [vmem:[#allocation5 + $0x2d8] sm:$0xff]  ;;  %v2209_v38 = vld [vmem:[#allocation5 + $0x2c0] sm:$0xff]  ;;  %v2211_v37 = vld [vmem:[#allocation5 + $0x2d0] sm:$0xff] }
 0x502   : > { %v2247_v8 = vsel %vm1489_vm12, %v2120_v12, %v2246_v58  ;;  %v3374_v34 = vpack.c.bf16 %v2200_v32, %v2198_v31  ;;  %v3376_v26 = vpack.c.bf16 %v2199_v30, %v2197_v51  ;;  %v3378_v15 = vpack.c.bf16 %v2204_v59, %v2202_v7  ;;  %v2214_v43 = vld [vmem:[#allocation5 + $0x2e8] sm:$0xff]  ;;  %v2216_v24 = vld [vmem:[#allocation5 + $0x2f8] sm:$0xff]  ;;  %v2213_v12 = vld [vmem:[#allocation5 + $0x2e0] sm:$0xff] }
 0x503   : > { %v2063_v10 = vrot.slane %v2062_v44, 1  ;;  %v2251_v49 = vrot.slane %v2247_v8, 7  ;;  %v2259_v42 = vrot.slane %v2247_v8, 1  ;;  %v3380_v45 = vpack.c.bf16 %v2203_v55, %v2201_v28  ;;  %v2486_v58 = vld [vmem:[#allocation7 + $0x1a8] sm:$0xff]  ;;  %v2492_v52 = vld [vmem:[#allocation7 + $0x1d8] sm:$0xff]  ;;  %v2495_v23 = vld [vmem:[#allocation7 + $0x1f0] sm:$0xff] }
 0x504   : > { %v3382_v36 = vpack.c.bf16 %v2208_v53, %v2206_v35  ;;  %v3384_v61 = vpack.c.bf16 %v2207_v39, %v2205_v0  ;;  %v3386_v22 = vpack.c.bf16 %v2212_v41, %v2210_v25  ;;  %v3388_v20 = vpack.c.bf16 %v2211_v37, %v2209_v38  ;;  %v2500_v63 = vld [vmem:[#allocation7 + $0x218] sm:$0xff]  ;;  %v2502_v55 = vld [vmem:[#allocation7 + $0x228] sm:$0xff]  ;;  %v2501_v41 = vld [vmem:[#allocation7 + $0x220] sm:$0xff] }
 0x505   : > { %v2064_v46 = vmax.f32 %v2062_v44, %v2063_v10  ;;  %v3390_v57 = vpack.c.bf16 %v2216_v24, %v2214_v43  ;;  %v4867_v44 = vadd.s32 8, %v4076_v2  ;;  %v2504_v35 = vld [vmem:[#allocation7 + $0x238] sm:$0xff]  ;;  %v2506_v38 = vld [vmem:[#allocation7 + $0x248] sm:$0xff] }
 0x506   : > { %v3462_v25 = vpack.c.bf16 %v2504_v35, %v2502_v55  ;;  %v2508_v37 = vld [vmem:[#allocation7 + $0x258] sm:$0xff] }
 0x507   : > { %v2240_v56 = vsel %vm1489_vm12, %v2064_v46, %v2239_v4  ;;  %v2215_v4 = vld [vmem:[#allocation5 + $0x2f0] sm:$0xff]  ;;  %vm3059_vm3 = vcmp.ne.s32.totalorder %v4867_v44, 15  ;;  %v2485_v46 = vld [vmem:[#allocation7 + $0x1a0] sm:$0xff]  ;;  %v2536_v55 = vld [vmem:[#allocation7 + $0x338] sm:$0xff] }
 0x508   : > { %v2250_v50 = vrot.slane %v2240_v56, 7  ;;  %v2258_v60 = vrot.slane %v2240_v56, 1  ;;  %2339 = vmatprep.mubr.f32.mxu0 %v2240_v56  ;;  %v3392_v54 = vpack.c.bf16 %v2215_v4, %v2213_v12  ;;  %v3448_v33 = vpack.c.bf16 %v2487_v47, %v2485_v46  ;;  %v2491_v56 = vld [vmem:[#allocation7 + $0x1d0] sm:$0xff]  ;;  %v2514_v47 = vld [vmem:[#allocation7 + $0x288] sm:$0xff] }
 0x509   : > { %v2507_v12 = vld [vmem:[#allocation7 + $0x250] sm:$0xff] }
 0x50a   : > { %v2253_v14 = vsel %vm518_vm1, %v2251_v49, %v2250_v50  ;;  %v2252_v5 = vsel %vm518_vm1, %v2250_v50, %v2251_v49  ;;  %v2260_v16 = vsel %vm551_vm0, %v2258_v60, %v2259_v42  ;;  %v2261_v62 = vsel %vm551_vm0, %v2259_v42, %v2258_v60  ;;  %v2490_v49 = vld [vmem:[#allocation7 + $0x1c8] sm:$0xff]  ;;  %v2489_v42 = vld [vmem:[#allocation7 + $0x1c0] sm:$0xff]  ;;  %v2511_v46 = vld [vmem:[#allocation7 + $0x270] sm:$0xff] }
 0x50b   : > { %3041 = vmatmul.mubr.msk.f32.vlgmr.msra.gmra.mrb[32].mxu0 %vm4763_vm14, %v2253_v14  ;;  %v3450_v1 = vpack.c.bf16 %v2492_v52, %v2490_v49  ;;  %v2494_v50 = vld [vmem:[#allocation7 + $0x1e8] sm:$0xff]  ;;  %v3452_v60 = vpack.c.bf16 %v2491_v56, %v2489_v42  ;;  %v2515_v42 = vld [vmem:[#allocation7 + $0x290] sm:$0xff] }
 0x50c   : > { %3365 = vmatpush1.bf16.msra.mxu0 %v3364_v27  ;;  %2345 = vmatprep.mubr.f32.mxu0 %v2247_v8  ;;  %v2488_v8 = vld [vmem:[#allocation7 + $0x1b8] sm:$0xff]  ;;  %v2518_v56 = vld [vmem:[#allocation7 + $0x2a8] sm:$0xff] }
 0x50d   : > { %3367 = vmatprep.subr.bf16.mxu0 %v3366_v9  ;;  %v3446_v10 = vpack.c.bf16 %v2488_v8, %v2486_v58  ;;  %v2496_v27 = vld [vmem:[#allocation7 + $0x1f8] sm:$0xff]  ;;  %v2493_v9 = vld [vmem:[#allocation7 + $0x1e0] sm:$0xff] }
 0x50e   : > { %v3454_v3 = vpack.c.bf16 %v2496_v27, %v2494_v50  ;;  %v3456_v14 = vpack.c.bf16 %v2495_v23, %v2493_v9  ;;  %v2512_v58 = vld [vmem:[#allocation7 + $0x278] sm:$0xff]  ;;  %v2517_v9 = vld [vmem:[#allocation7 + $0x2a0] sm:$0xff]  ;;  %v2519_v23 = vld [vmem:[#allocation7 + $0x2b0] sm:$0xff] }
 0x50f   : > { %2346 = vmatmul.mubr.f32.gmra.mrb[34].mxu0 %v2252_v5  ;;  %3447 = vmatprep.subr.bf16.mxu1 %v3446_v10  ;;  %v2498_v5 = vld [vmem:[#allocation7 + $0x208] sm:$0xff]  ;;  %v2509_v10 = vld [vmem:[#allocation7 + $0x260] sm:$0xff]  ;;  %v2520_v50 = vld [vmem:[#allocation7 + $0x2b8] sm:$0xff] }
 0x510   : > { %3369 = vmatpush1.bf16.msra.mxu0 %v3368_v6  ;;  %2416 = vmatprep.mubr.f32.mxu0 %v3856_v11  ;;  %v3458_v13 = vpack.c.bf16 %v2500_v63, %v2498_v5  ;;  %v3472_v49 = vpack.c.bf16 %v2511_v46, %v2509_v10  ;;  %v3478_v27 = vpack.c.bf16 %v2520_v50, %v2518_v56  ;;  %v2550_v10 = vld [vmem:[#allocation7 + $0x3a8] sm:$0xff]  ;;  %v2552_v46 = vld [vmem:[#allocation7 + $0x3b8] sm:$0xff] }
 0x511   : > { %3371 = vmatprep.subr.bf16.mxu0 %v3370_v29  ;;  %3449 = vmatpush1.bf16.msra.mxu1 %v3448_v33  ;;  %v2516_v33 = vld [vmem:[#allocation7 + $0x298] sm:$0xff]  ;;  %v3480_v5 = vpack.c.bf16 %v2519_v23, %v2517_v9  ;;  %v2558_v9 = vld [vmem:[#allocation7 + $0x3e8] sm:$0xff] }
 0x512   : > { %3451 = vmatprep.subr.bf16.mxu1 %v3450_v1  ;;  %v3474_v52 = vpack.c.bf16 %v2516_v33, %v2514_v47  ;;  %v2513_v1 = vld [vmem:[#allocation7 + $0x280] sm:$0xff]  ;;  %v3510_v33 = vpack.c.bf16 %v2552_v46, %v2550_v10  ;;  %v2560_v23 = vld [vmem:[#allocation7 + $0x3f8] sm:$0xff]  ;;  %v2583_v10 = vld [vmem:[#allocation7 + $0x4b0] sm:$0xff] }
 0x513   : > { %v2586_v46 = vld [vmem:[#allocation7 + $0x4c8] sm:$0xff] }
 0x514   : > { %3373 = vmatpush1.bf16.msra.mxu0 %v3372_v40 }
 0x515   : > { %3375 = vmatprep.subr.bf16.mxu0 %v3374_v34  ;;  %3453 = vmatpush1.bf16.msra.mxu1 %v3452_v60  ;;  %v3476_v60 = vpack.c.bf16 %v2515_v42, %v2513_v1  ;;  %v2554_v1 = vld [vmem:[#allocation7 + $0x3c8] sm:$0xff]  ;;  %v2556_v42 = vld [vmem:[#allocation7 + $0x3d8] sm:$0xff] }
 0x516   : > { %3455 = vmatprep.subr.bf16.mxu1 %v3454_v3  ;;  %v2522_v3 = vld [vmem:[#allocation7 + $0x2c8] sm:$0xff]  ;;  %v3514_v50 = vpack.c.bf16 %v2556_v42, %v2554_v1  ;;  %v2587_v1 = vld [vmem:[#allocation7 + $0x4d0] sm:$0xff] }
 0x517   : > { %v2590_v42 = vld [vmem:[#allocation7 + $0x4e8] sm:$0xff] }
 0x518   : > { %3377 = vmatpush1.bf16.msra.mxu0 %v3376_v26  ;;  %v2497_v26 = vld [vmem:[#allocation7 + $0x200] sm:$0xff] }
 0x519   : > { %3379 = vmatprep.subr.bf16.mxu0 %v3378_v15  ;;  %3457 = vmatpush1.bf16.msra.mxu1 %v3456_v14  ;;  %v2499_v15 = vld [vmem:[#allocation7 + $0x210] sm:$0xff]  ;;  %v2524_v14 = vld [vmem:[#allocation7 + $0x2d8] sm:$0xff] }
 0x51a   : > { %3459 = vmatprep.subr.bf16.mxu1 %v3458_v13  ;;  %v3460_v0 = vpack.c.bf16 %v2499_v15, %v2497_v26  ;;  %v3482_v63 = vpack.c.bf16 %v2524_v14, %v2522_v3  ;;  %v2521_v13 = vld [vmem:[#allocation7 + $0x2c0] sm:$0xff]  ;;  %v2531_v15 = vld [vmem:[#allocation7 + $0x310] sm:$0xff]  ;;  %v3518_v14 = vpack.c.bf16 %v2560_v23, %v2558_v9  ;;  %v2594_v23 = vld [vmem:[#allocation7 + $0x508] sm:$0xff] }
 0x51b   : > { %v2529_v26 = vld [vmem:[#allocation7 + $0x300] sm:$0xff]  ;;  %v2591_v9 = vld [vmem:[#allocation7 + $0x4f0] sm:$0xff] }
 0x51c   : > { %3381 = vmatpush1.bf16.msra.mxu0 %v3380_v45  ;;  %v3492_v35 = vpack.c.bf16 %v2531_v15, %v2529_v26  ;;  %v2570_v26 = vld [vmem:[#allocation7 + $0x448] sm:$0xff]  ;;  %v2572_v15 = vld [vmem:[#allocation7 + $0x458] sm:$0xff] }
 0x51d   : > { %3383 = vmatprep.subr.bf16.mxu0 %v3382_v36 }
 0x520   : > { %3385 = vmatpush1.bf16.msra.mxu0 %v3384_v61  ;;  %v2503_v61 = vld [vmem:[#allocation7 + $0x230] sm:$0xff] }
 0x521   : > { %3387 = vmatprep.subr.bf16.mxu0 %v3386_v22  ;;  %v3464_v24 = vpack.c.bf16 %v2503_v61, %v2501_v41  ;;  %v2537_v61 = vld [vmem:[#allocation7 + $0x340] sm:$0xff] }
 0x524   : > { %3389 = vmatpush1.bf16.msra.mxu0 %v3388_v20  ;;  %v3466_v20 = vpack.c.bf16 %v2508_v37, %v2506_v38  ;;  %v2542_v38 = vld [vmem:[#allocation7 + $0x368] sm:$0xff]  ;;  %v2544_v37 = vld [vmem:[#allocation7 + $0x378] sm:$0xff] }
 0x525   : > { %3391 = vmatprep.subr.bf16.mxu0 %v3390_v57  ;;  %v2505_v57 = vld [vmem:[#allocation7 + $0x240] sm:$0xff] }
 0x526   : > { %v3468_v48 = vpack.c.bf16 %v2507_v12, %v2505_v57  ;;  %v2543_v57 = vld [vmem:[#allocation7 + $0x370] sm:$0xff]  ;;  %v2546_v12 = vld [vmem:[#allocation7 + $0x388] sm:$0xff] }
 0x528   : > { %3393 = vmatpush1.bf16.msra.mxu0 %v3392_v54  ;;  %v2510_v54 = vld [vmem:[#allocation7 + $0x268] sm:$0xff] }
 0x529   : > { %v3470_v8 = vpack.c.bf16 %v2512_v58, %v2510_v54 }
 0x52b   : > { %2417 = vmatmul.mubr.f32.vlgmr.msra.gmra.mrb[32].mxu0 %v2260_v16  ;;  %v2217_v16 = vld [vmem:[%s4994_s10] sm:$0x3] }
 0x52c   : > { %2422 = vmatprep.mubr.f32.mxu0 %v3856_v11  ;;  %v2268_v6 = vrot.slane %v2217_v16, %v4218_v18 }
 0x52f   : > { %3043 = vmatmul.mubr.msk.f32.gmra.mrb[34].mxu0 %vm3059_vm3, %v2261_v62  ;;  %v2272_v62 = vrot.slane %v2217_v16, %v4224_v21  ;;  %v2523_v16 = vld [vmem:[#allocation7 + $0x2d0] sm:$0xff] }
 0x5fe   : > { %v2418_v29 = vpop.f32.mrb[32].mxu0 }
 0x5ff   : > { %v2420_v19 = vpop.f32.mrb[33].mxu0  ;;  %v3586_v31 = vadd.f32 %v2418_v29, %v2268_v6  ;;  %v3484_v29 = vpack.c.bf16 %v2523_v16, %v2521_v13  ;;  %v2562_v13 = vld [vmem:[#allocation7 + $0x408] sm:$0xff]  ;;  %v2564_v16 = vld [vmem:[#allocation7 + $0x418] sm:$0xff] }
 0x600   : > { %v3587_v17 = vadd.f32 %v2420_v19, %v2272_v62 }
 0x601   : > { %v4879_v30 = vmax.f32 %v3586_v31, 0.0  ;;  %v2527_v31 = vld [vmem:[#allocation7 + $0x2f0] sm:$0xff] }
 0x602   : > { %v2424_v32 = vpop.f32.mrb[34].mxu0  ;;  %v4877_v34 = vmax.f32 %v3587_v17, 0.0  ;;  %v2525_v17 = vld [vmem:[#allocation7 + $0x2e0] sm:$0xff] }
 0x603   : > { %v3588_v40 = vadd.f32 %v2424_v32, %v2268_v6  ;;  %v2426_v11 = vpop.f32.mrb[35].mxu0  ;;  %v2626_v36 = vrot.slane %v4879_v30, 7  ;;  %v2528_v6 = vld [vmem:[#allocation7 + $0x2f8] sm:$0xff]  ;;  %v2530_v32 = vld [vmem:[#allocation7 + $0x308] sm:$0xff] }
 0x604   : > { %v3589_v51 = vadd.f32 %v2426_v11, %v2272_v62  ;;  %v2627_v53 = vrot.slane %v4877_v34, 7  ;;  %v2526_v62 = vld [vmem:[#allocation7 + $0x2e8] sm:$0xff]  ;;  %v3488_v11 = vpack.c.bf16 %v2527_v31, %v2525_v17  ;;  %v2568_v31 = vld [vmem:[#allocation7 + $0x438] sm:$0xff] }
 0x605   : > { %v4881_v7 = vmax.f32 %v3588_v40, 0.0  ;;  %v3486_v19 = vpack.c.bf16 %v2528_v6, %v2526_v62  ;;  %v2532_v40 = vld [vmem:[#allocation7 + $0x318] sm:$0xff]  ;;  %v3522_v6 = vpack.c.bf16 %v2564_v16, %v2562_v13  ;;  %v2566_v17 = vld [vmem:[#allocation7 + $0x428] sm:$0xff]  ;;  %v2595_v13 = vld [vmem:[#allocation7 + $0x510] sm:$0xff] }
 0x606   : > { %v4883_v59 = vmax.f32 %v3589_v51, 0.0  ;;  %v3490_v51 = vpack.c.bf16 %v2532_v40, %v2530_v32  ;;  %v3526_v40 = vpack.c.bf16 %v2568_v31, %v2566_v17  ;;  %v2598_v16 = vld [vmem:[#allocation7 + $0x528] sm:$0xff]  ;;  %v2599_v17 = vld [vmem:[#allocation7 + $0x530] sm:$0xff] }
 0x607   : > { %v2628_v28 = vrot.slane %v4881_v7, 7  ;;  %v2602_v31 = vld [vmem:[#allocation7 + $0x548] sm:$0xff] }
 0x608   : > { %v2629_v45 = vrot.slane %v4883_v59, 7 }
 0x609   : > { %v2632_v22 = vsel %vm518_vm1, %v2628_v28, %v2626_v36  ;;  %v2630_v4 = vsel %vm518_vm1, %v2626_v36, %v2628_v28  ;;  %v2534_v28 = vld [vmem:[#allocation7 + $0x328] sm:$0xff]  ;;  %v2535_v36 = vld [vmem:[#allocation7 + $0x330] sm:$0xff] }
 0x60a   : > { %v2633_v39 = vsel %vm518_vm1, %v2629_v45, %v2627_v53  ;;  %v2631_v43 = vsel %vm518_vm1, %v2627_v53, %v2629_v45  ;;  %v3494_v53 = vpack.c.bf16 %v2536_v55, %v2534_v28  ;;  %v2533_v45 = vld [vmem:[#allocation7 + $0x320] sm:$0xff]  ;;  %v2641_v28 = vrot.slane %v4883_v59, 1 }
 0x60b   : > { %3045 = vmatprep.mubr.msk.f32.mxu1 %vm4763_vm14, %v2633_v39  ;;  %v2540_v39 = vld [vmem:[#allocation7 + $0x358] sm:$0xff] }
 0x60c   : > { %3047 = vmatmul.mubr.msk.f32.vlgmr.msra.gmra.mrb[4].mxu1 %vm4763_vm14, %v2632_v22  ;;  %v2539_v22 = vld [vmem:[#allocation7 + $0x350] sm:$0xff] }
 0x60d   : > { %3461 = vmatpush1.bf16.msra.mxu1 %v3460_v0  ;;  %2731 = vmatprep.mubr.f32.mxu1 %v2631_v43  ;;  %v2538_v0 = vld [vmem:[#allocation7 + $0x348] sm:$0xff]  ;;  %v3500_v43 = vpack.c.bf16 %v2539_v22, %v2537_v61  ;;  %v2573_v22 = vld [vmem:[#allocation7 + $0x460] sm:$0xff] }
 0x60e   : > { %3463 = vmatprep.subr.bf16.mxu1 %v3462_v25  ;;  %v3496_v25 = vpack.c.bf16 %v2535_v36, %v2533_v45  ;;  %v3498_v41 = vpack.c.bf16 %v2540_v39, %v2538_v0  ;;  %v2569_v45 = vld [vmem:[#allocation7 + $0x440] sm:$0xff]  ;;  %v2571_v36 = vld [vmem:[#allocation7 + $0x450] sm:$0xff]  ;;  %v2574_v0 = vld [vmem:[#allocation7 + $0x468] sm:$0xff] }
 0x60f   : > { %v2576_v39 = vld [vmem:[#allocation7 + $0x478] sm:$0xff] }
 0x610   : > { %2732 = vmatmul.mubr.f32.gmra.mrb[6].mxu1 %v2630_v4  ;;  %v2548_v4 = vld [vmem:[#allocation7 + $0x398] sm:$0xff]  ;;  %v3534_v61 = vpack.c.bf16 %v2576_v39, %v2574_v0  ;;  %v2607_v0 = vld [vmem:[#allocation7 + $0x570] sm:$0xff]  ;;  %v2610_v39 = vld [vmem:[#allocation7 + $0x588] sm:$0xff] }
 0x611   : > { %3465 = vmatpush1.bf16.msra.mxu1 %v3464_v24  ;;  %2802 = vmatprep.mubr.f32.mxu1 %v4877_v34  ;;  %v3502_v24 = vpack.c.bf16 %v2544_v37, %v2542_v38  ;;  %v3506_v58 = vpack.c.bf16 %v2548_v4, %v2546_v12  ;;  %v2575_v38 = vld [vmem:[#allocation7 + $0x470] sm:$0xff]  ;;  %v2578_v37 = vld [vmem:[#allocation7 + $0x488] sm:$0xff] }
 0x612   : > { %3467 = vmatprep.subr.bf16.mxu1 %v3466_v20  ;;  %v2541_v20 = vld [vmem:[#allocation7 + $0x360] sm:$0xff]  ;;  %v2579_v12 = vld [vmem:[#allocation7 + $0x490] sm:$0xff]  ;;  %v2582_v4 = vld [vmem:[#allocation7 + $0x4a8] sm:$0xff] }
 0x613   : > { %v3504_v54 = vpack.c.bf16 %v2543_v57, %v2541_v20  ;;  %v2577_v57 = vld [vmem:[#allocation7 + $0x480] sm:$0xff] }
 0x615   : > { %3469 = vmatpush1.bf16.msra.mxu1 %v3468_v48  ;;  %v2545_v48 = vld [vmem:[#allocation7 + $0x380] sm:$0xff] }
 0x616   : > { %3471 = vmatprep.subr.bf16.mxu1 %v3470_v8  ;;  %v2547_v8 = vld [vmem:[#allocation7 + $0x390] sm:$0xff] }
 0x617   : > { %v3508_v47 = vpack.c.bf16 %v2547_v8, %v2545_v48  ;;  %v2581_v8 = vld [vmem:[#allocation7 + $0x4a0] sm:$0xff] }
 0x619   : > { %3473 = vmatpush1.bf16.msra.mxu1 %v3472_v49  ;;  %v2549_v49 = vld [vmem:[#allocation7 + $0x3a0] sm:$0xff] }
 0x61a   : > { %3475 = vmatprep.subr.bf16.mxu1 %v3474_v52  ;;  %v2551_v52 = vld [vmem:[#allocation7 + $0x3b0] sm:$0xff] }
 0x61b   : > { %v3512_v56 = vpack.c.bf16 %v2551_v52, %v2549_v49  ;;  %v2585_v52 = vld [vmem:[#allocation7 + $0x4c0] sm:$0xff] }
 0x61d   : > { %3477 = vmatpush1.bf16.msra.mxu1 %v3476_v60  ;;  %v2553_v60 = vld [vmem:[#allocation7 + $0x3c0] sm:$0xff] }
 0x61e   : > { %3479 = vmatprep.subr.bf16.mxu1 %v3478_v27  ;;  %v2555_v27 = vld [vmem:[#allocation7 + $0x3d0] sm:$0xff] }
 0x61f   : > { %v3516_v3 = vpack.c.bf16 %v2555_v27, %v2553_v60  ;;  %v2589_v27 = vld [vmem:[#allocation7 + $0x4e0] sm:$0xff] }
 0x621   : > { %3481 = vmatpush1.bf16.msra.mxu1 %v3480_v5  ;;  %v2557_v5 = vld [vmem:[#allocation7 + $0x3e0] sm:$0xff] }
 0x622   : > { %3483 = vmatprep.subr.bf16.mxu1 %v3482_v63  ;;  %v2559_v63 = vld [vmem:[#allocation7 + $0x3f0] sm:$0xff] }
 0x623   : > { %v3520_v62 = vpack.c.bf16 %v2559_v63, %v2557_v5  ;;  %v2593_v63 = vld [vmem:[#allocation7 + $0x500] sm:$0xff] }
 0x625   : > { %3485 = vmatpush1.bf16.msra.mxu1 %v3484_v29  ;;  %v2561_v29 = vld [vmem:[#allocation7 + $0x400] sm:$0xff] }
 0x626   : > { %3487 = vmatprep.subr.bf16.mxu1 %v3486_v19  ;;  %v2563_v19 = vld [vmem:[#allocation7 + $0x410] sm:$0xff] }
 0x627   : > { %v3524_v32 = vpack.c.bf16 %v2563_v19, %v2561_v29  ;;  %v2597_v19 = vld [vmem:[#allocation7 + $0x520] sm:$0xff] }
 0x629   : > { %3489 = vmatpush1.bf16.msra.mxu1 %v3488_v11  ;;  %v2565_v11 = vld [vmem:[#allocation7 + $0x420] sm:$0xff] }
 0x62a   : > { %3491 = vmatprep.subr.bf16.mxu1 %v3490_v51  ;;  %v2567_v51 = vld [vmem:[#allocation7 + $0x430] sm:$0xff] }
 0x62b   : > { %v3528_v55 = vpack.c.bf16 %v2567_v51, %v2565_v11  ;;  %v2601_v51 = vld [vmem:[#allocation7 + $0x540] sm:$0xff] }
 0x62d   : > { %3493 = vmatpush1.bf16.msra.mxu1 %v3492_v35  ;;  %v2639_v35 = vrot.slane %v4877_v34, 1 }
 0x62e   : > { %3495 = vmatprep.subr.bf16.mxu1 %v3494_v53  ;;  %v3530_v53 = vpack.c.bf16 %v2572_v15, %v2570_v26  ;;  %v2603_v26 = vld [vmem:[#allocation7 + $0x550] sm:$0xff]  ;;  %v2606_v15 = vld [vmem:[#allocation7 + $0x568] sm:$0xff] }
 0x631   : > { %3497 = vmatpush1.bf16.msra.mxu1 %v3496_v25  ;;  %v2643_v25 = vsel %vm551_vm0, %v2639_v35, %v2641_v28 }
 0x632   : > { %3499 = vmatprep.subr.bf16.mxu1 %v3498_v41  ;;  %v3532_v41 = vpack.c.bf16 %v2571_v36, %v2569_v45  ;;  %v2605_v36 = vld [vmem:[#allocation7 + $0x560] sm:$0xff] }
 0x635   : > { %3501 = vmatpush1.bf16.msra.mxu1 %v3500_v43  ;;  %v2580_v43 = vld [vmem:[#allocation7 + $0x498] sm:$0xff] }
 0x636   : > { %3503 = vmatprep.subr.bf16.mxu1 %v3502_v24  ;;  %v3536_v24 = vpack.c.bf16 %v2575_v38, %v2573_v22  ;;  %v3538_v20 = vpack.c.bf16 %v2580_v43, %v2578_v37  ;;  %v2609_v22 = vld [vmem:[#allocation7 + $0x580] sm:$0xff]  ;;  %v2611_v38 = vld [vmem:[#allocation7 + $0x590] sm:$0xff]  ;;  %v2614_v37 = vld [vmem:[#allocation7 + $0x5a8] sm:$0xff] }
 0x637   : > { %v2616_v43 = vld [vmem:[#allocation7 + $0x5b8] sm:$0xff] }
 0x639   : > { %3505 = vmatpush1.bf16.msra.mxu1 %v3504_v54  ;;  %v2584_v54 = vld [vmem:[#allocation7 + $0x4b8] sm:$0xff] }
 0x63a   : > { %3507 = vmatprep.subr.bf16.mxu1 %v3506_v58  ;;  %v3540_v58 = vpack.c.bf16 %v2579_v12, %v2577_v57  ;;  %v3542_v48 = vpack.c.bf16 %v2584_v54, %v2582_v4  ;;  %v2613_v57 = vld [vmem:[#allocation7 + $0x5a0] sm:$0xff]  ;;  %v2615_v12 = vld [vmem:[#allocation7 + $0x5b0] sm:$0xff]  ;;  %v2618_v4 = vld [vmem:[#allocation7 + $0x5c8] sm:$0xff] }
 0x63b   : > { %v2620_v54 = vld [vmem:[#allocation7 + $0x5d8] sm:$0xff] }
 0x63d   : > { %3509 = vmatpush1.bf16.msra.mxu1 %v3508_v47  ;;  %v2588_v47 = vld [vmem:[#allocation7 + $0x4d8] sm:$0xff] }
 0x63e   : > { %3511 = vmatprep.subr.bf16.mxu1 %v3510_v33  ;;  %v3544_v33 = vpack.c.bf16 %v2583_v10, %v2581_v8  ;;  %v3546_v49 = vpack.c.bf16 %v2588_v47, %v2586_v46  ;;  %v2617_v8 = vld [vmem:[#allocation7 + $0x5c0] sm:$0xff]  ;;  %v2619_v10 = vld [vmem:[#allocation7 + $0x5d0] sm:$0xff]  ;;  %v2622_v46 = vld [vmem:[#allocation7 + $0x5e8] sm:$0xff] }
 0x63f   : > { %v2624_v47 = vld [vmem:[#allocation7 + $0x5f8] sm:$0xff] }
 0x641   : > { %3513 = vmatpush1.bf16.msra.mxu1 %v3512_v56  ;;  %v2592_v56 = vld [vmem:[#allocation7 + $0x4f8] sm:$0xff] }
 0x642   : > { %3515 = vmatprep.subr.bf16.mxu1 %v3514_v50  ;;  %v3548_v50 = vpack.c.bf16 %v2587_v1, %v2585_v52  ;;  %v3550_v60 = vpack.c.bf16 %v2592_v56, %v2590_v42  ;;  %v2621_v52 = vld [vmem:[#allocation7 + $0x5e0] sm:$0xff]  ;;  %v2623_v1 = vld [vmem:[#allocation7 + $0x5f0] sm:$0xff]  ;;  %v2640_v56 = vrot.slane %v4881_v7, 1 }
 0x643   : > { %v3584_v42 = vpack.c.bf16 %v2623_v1, %v2621_v52 }
 0x645   : > { %3517 = vmatpush1.bf16.msra.mxu1 %v3516_v3  ;;  %v2596_v3 = vld [vmem:[#allocation7 + $0x518] sm:$0xff] }
 0x646   : > { %3519 = vmatprep.subr.bf16.mxu1 %v3518_v14  ;;  %v3552_v14 = vpack.c.bf16 %v2591_v9, %v2589_v27  ;;  %v3554_v5 = vpack.c.bf16 %v2596_v3, %v2594_v23  ;;  %v2645_v27 = vsel %vm551_vm0, %v2641_v28, %v2639_v35 }
 0x649   : > { %3521 = vmatpush1.bf16.msra.mxu1 %v3520_v62  ;;  %v2600_v62 = vld [vmem:[#allocation7 + $0x538] sm:$0xff] }
 0x64a   : > { %3523 = vmatprep.subr.bf16.mxu1 %v3522_v6  ;;  %v3556_v6 = vpack.c.bf16 %v2595_v13, %v2593_v63  ;;  %v3558_v29 = vpack.c.bf16 %v2600_v62, %v2598_v16 }
 0x64c   : > { %2803 = vmatmul.mubr.f32.vlgmr.msra.gmra.mrb[4].mxu1 %v4879_v30 }
 0x64d   : > { %2808 = vmatprep.mubr.f32.mxu1 %v4883_v59  ;;  %3525 = vmatpush1.bf16.msra.mxu1 %v3524_v32  ;;  %v2604_v32 = vld [vmem:[#allocation7 + $0x558] sm:$0xff] }
 0x64e   : > { %3527 = vmatprep.subr.bf16.mxu1 %v3526_v40  ;;  %v3560_v40 = vpack.c.bf16 %v2599_v17, %v2597_v19  ;;  %v3562_v11 = vpack.c.bf16 %v2604_v32, %v2602_v31 }
 0x650   : > { %2809 = vmatmul.mubr.f32.gmra.mrb[6].mxu1 %v4881_v7 }
 0x651   : > { %3529 = vmatpush1.bf16.msra.mxu1 %v3528_v55  ;;  %2879 = vmatprep.mubr.f32.mxu1 %v2643_v25  ;;  %v2608_v55 = vld [vmem:[#allocation7 + $0x578] sm:$0xff] }
 0x652   : > { %3531 = vmatprep.subr.bf16.mxu1 %v3530_v53  ;;  %v3564_v53 = vpack.c.bf16 %v2603_v26, %v2601_v51  ;;  %v3566_v45 = vpack.c.bf16 %v2608_v55, %v2606_v15  ;;  %v2612_v25 = vld [vmem:[#allocation7 + $0x598] sm:$0xff] }
 0x655   : > { %3533 = vmatpush1.bf16.msra.mxu1 %v3532_v41  ;;  %v3568_v41 = vpack.c.bf16 %v2607_v0, %v2605_v36 }
 0x656   : > { %3535 = vmatprep.subr.bf16.mxu1 %v3534_v61  ;;  %v3570_v61 = vpack.c.bf16 %v2612_v25, %v2610_v39 }
 0x659   : > { %3537 = vmatpush1.bf16.msra.mxu1 %v3536_v24  ;;  %v3572_v24 = vpack.c.bf16 %v2611_v38, %v2609_v22 }
 0x65a   : > { %3539 = vmatprep.subr.bf16.mxu1 %v3538_v20  ;;  %v3574_v20 = vpack.c.bf16 %v2616_v43, %v2614_v37 }
 0x65d   : > { %3541 = vmatpush1.bf16.msra.mxu1 %v3540_v58  ;;  %v3576_v58 = vpack.c.bf16 %v2615_v12, %v2613_v57 }
 0x65e   : > { %3543 = vmatprep.subr.bf16.mxu1 %v3542_v48  ;;  %v3578_v48 = vpack.c.bf16 %v2620_v54, %v2618_v4 }
 0x661   : > { %3545 = vmatpush1.bf16.msra.mxu1 %v3544_v33  ;;  %v3580_v33 = vpack.c.bf16 %v2619_v10, %v2617_v8 }
 0x662   : > { %3547 = vmatprep.subr.bf16.mxu1 %v3546_v49  ;;  %v3582_v49 = vpack.c.bf16 %v2624_v47, %v2622_v46 }
 0x665   : > { %3549 = vmatpush1.bf16.msra.mxu1 %v3548_v50  ;;  %v2638_v50 = vrot.slane %v4879_v30, 1  ;;  %v2625_v30 = vld [vmem:[%s4996_s12] sm:$0x3] }
 0x666   : > { %3551 = vmatprep.subr.bf16.mxu1 %v3550_v60  ;;  %v2654_v34 = vrot.slane %v2625_v30, %v4218_v18  ;;  %v2658_v59 = vrot.slane %v2625_v30, %v4224_v21 }
 0x667   : > { %v2642_v60 = vsel %vm551_vm0, %v2638_v50, %v2640_v56  ;;  %v2644_v7 = vsel %vm551_vm0, %v2640_v56, %v2638_v50 }
 0x669   : > { %3553 = vmatpush1.bf16.msra.mxu1 %v3552_v14 }
 0x66a   : > { %3555 = vmatprep.subr.bf16.mxu1 %v3554_v5 }
 0x66d   : > { %3557 = vmatpush1.bf16.msra.mxu1 %v3556_v6 }
 0x66e   : > { %3559 = vmatprep.subr.bf16.mxu1 %v3558_v29 }
 0x671   : > { %3561 = vmatpush1.bf16.msra.mxu1 %v3560_v40 }
 0x672   : > { %3563 = vmatprep.subr.bf16.mxu1 %v3562_v11 }
 0x675   : > { %3565 = vmatpush1.bf16.msra.mxu1 %v3564_v53 }
 0x676   : > { %3567 = vmatprep.subr.bf16.mxu1 %v3566_v45 }
 0x679   : > { %3569 = vmatpush1.bf16.msra.mxu1 %v3568_v41 }
 0x67a   : > { %3571 = vmatprep.subr.bf16.mxu1 %v3570_v61 }
 0x67d   : > { %3573 = vmatpush1.bf16.msra.mxu1 %v3572_v24 }
 0x67e   : > { %3575 = vmatprep.subr.bf16.mxu1 %v3574_v20 }
 0x681   : > { %3577 = vmatpush1.bf16.msra.mxu1 %v3576_v58 }
 0x682   : > { %3579 = vmatprep.subr.bf16.mxu1 %v3578_v48 }
 0x685   : > { %3581 = vmatpush1.bf16.msra.mxu1 %v3580_v33 }
 0x686   : > { %3583 = vmatprep.subr.bf16.mxu1 %v3582_v49 }
 0x689   : > { %3585 = vmatpush1.bf16.msra.mxu1 %v3584_v42 }
 0x68c   : > { %2880 = vmatmul.mubr.f32.vlgmr.msra.gmra.mrb[4].mxu1 %v2642_v60 }
 0x68d   : > { %3049 = vmatprep.mubr.msk.f32.mxu1 %vm3059_vm3, %v2645_v27 }
 0x690   : > { %3051 = vmatmul.mubr.msk.f32.gmra.mrb[6].mxu1 %vm3059_vm3, %v2644_v7 }
 0x75f   : > { %v2881_v28 = vpop.f32.mrb[4].mxu1 }
 0x760   : > { %v3590_v35 = vadd.f32 %v2881_v28, %v2654_v34  ;;  %v2883_v9 = vpop.f32.mrb[5].mxu1 }
 0x761   : > { %v3591_v23 = vadd.f32 %v2883_v9, %v2658_v59 }
 0x762   : > { %v2892_v2 = vmax.f32 %v3590_v35, 0.0 }
 0x763   : > { %v2893_v44 = vmax.f32 %v3591_v23, 0.0  ;;  %v2887_v3 = vpop.f32.mrb[6].mxu1 }
 0x764   : > { %2896 = vst [vmem:[%s477_s27] sm:$0xff] %v2892_v2  ;;  %v3592_v14 = vadd.f32 %v2887_v3, %v2654_v34  ;;  %v2889_v5 = vpop.f32.mrb[7].mxu1 }
 0x765   : > { %2897 = vst [vmem:[%s477_s27 + $0x8] sm:$0xff] %v2893_v44  ;;  %v3593_v63 = vadd.f32 %v2889_v5, %v2658_v59 }
 0x766   : > { %v2894_v18 = vmax.f32 %v3592_v14, 0.0 }
 0x767   : > { %v2895_v21 = vmax.f32 %v3593_v63, 0.0 }
 0x768   : > { %2898 = vst [vmem:[%s477_s27 + $0x10] sm:$0xff] %v2894_v18 }
 0x769   : > { %2899 = vst [vmem:[%s477_s27 + $0x18] sm:$0xff] %v2895_v21 }
 0x76a   : > { %3786 = shalt.err (!%p3783_p11)
}
 0x76b   : > { %s3787_s16 = scalar_lea.hbm %s4941_s13, 512  ;;  %s3791_s22 = scalar_lea.hbm %s5037_s21, 1024 }
 0x76c   : > { %p3788_p5 = scmp.ne.s32.totalorder %s4941_s13, %s3787_s16  ;;  %p3792_p9 = scmp.lt.u32.totalorder %s4941_s13, %s5037_s21 }
 0x76d   : > { %p3793_p10 = scmp.lt.u32.totalorder %s3791_s22, %s3787_s16  ;;  %p3795_p12 = scmp.lt.u32.totalorder %s3787_s16, %s4941_s13 }
 0x76e   : > { %p3789_p0 = pnand %p3788_p5, %p5038_p1 }
 0x76f   : > { %p3794_p13 = por %p3793_p10, %p3792_p9 }
 0x770   : > { %p3790_p6 = pneg %p3789_p0 }
 0x771   : > { %p3796_p2 = por %p3795_p12, %p3794_p13 }
 0x773   : > { %p3797_p3 = pnand %p3796_p2, %p3790_p6 }
 0x775   : > { %3800 = shalt.err (!%p3797_p3)
}
 0x776   : > { %s3858_s14 = smov 256   ;;  %s3859_s20 = smov 16  }
 0x777   : > { %3618 = dma.vmem_to_hbm [thread:$0]  (%p5038_p1), %s4936_s28, 512, %s4941_s13, %s4943_s25, %s3858_s14, %s3858_s14, %s3859_s20  }
 0x778 PF: > { %s5039_s23 = sld [smem:[#allocation14_spill]]  ;;  %s5040_s18 = sld [smem:[#allocation12_spill]] }
 0x779   : > { %s5041_s29 = sld [smem:[#allocation18_spill]] }
 0x77e   : > { %p3640_p4 = scmp.ge.s32.totalorder %s5039_s23, 2  ;;  %s2929_s17 = sand.u32 1, %s5040_s18  }
 0x77f   : > { %p5042_p7 = scmp.ne.s32.totalorder %s5041_s29, 0  ;;  %s2930_s19 = scalar_lea.sflag [#allocation4], %s2929_s17 }
 0x781   : > { %p3631_p8 = pnand %p3640_p4, %p5042_p7 }
 0x783   : > { %3826 = dma.done.wait (!%p3631_p8), %s2930_s19, 512  }
 0x784   : > { %3828 = vsyncadd (!%p3631_p8), %s2930_s19, 4294966784  ;;  %s5043_s28 = sld [smem:[#allocation15_spill]]  ;;  %s5044_s16 = sld [smem:[#allocation13_spill]] }
 0x785   : > { %s5045_s27 = sld [smem:[#allocation16_spill]]  ;;  %s5046_s25 = smov %s3835_s26 }
 0x78a   : > { %p25_p11 = scmp.ge.s32.totalorder %s5043_s28, 4   ;;  %s5047_s26 = smov %s5044_s16 }
 0x78c   :  { %27 = sbr.rel (!%p25_p11) target bundleno = 8 (0x8), region = 120 }
 0x793   :  { %2935 = vsyncpa [#allocation3], 1 }
 0x794   :  { %2937 = vsyncpa [#allocation3 + $0x1], 1 }
 0x795   :  { %2938 = vsyncpa [#allocation6], 1 }
 0x796   :  { %2939 = vsyncpa [#allocation4], 1 }
 0x797   :  { %2941 = vsyncpa [#allocation4 + $0x1], 1 }

</bundles_post_ra>
